<compile_context>
chip_gen: v6e
topology: v6e:2x2x1
jax: 0.10.0
libtpu: 0.0.40
codegen_flags: <defaults>
</compile_context>

<pallas_src>
import functools

import jax
import jax.numpy as jnp
from jax.experimental import pallas as pl
from jax.experimental.pallas import tpu as pltpu

LANE = 128  # channels are zero-padded to this lane width (lane-dense vregs)


def _round_up(v, m):
    return ((v + m - 1) // m) * m


def _gelu(x):
    # tanh-approx GELU (EUP-friendly).
    # TODO(synk): PyTorch F.gelu default is erf-based; tanh approximation used here.
    c = jnp.float32(0.7978845608028654)  # sqrt(2/pi)
    return 0.5 * x * (1.0 + jnp.tanh(c * (x + 0.044715 * x * x * x)))


# ---------------------------------------------------------------------------
# Fused encoder kernel: one grid step per batch block of BB elements.
#
# Scratch layout (rows):
#   [0, G)                         global top halo   (zeroed, never written)
#   per element e in [0, BB):
#     [G + e*Tp,            +d_top)  element top halo  (zeroed each step)
#     [G + e*Tp + d_top,    +T    )  center rows       (rewritten every conv)
#     [G + e*Tp + d_top + T,+d_bot)  element bottom halo (zeroed each step)
#   [G + BB*Tp, G + BB*Tp + G)     global bottom halo (zeroed, never written)
# ---------------------------------------------------------------------------
def _encoder_kernel(*refs, T, dilations, has_proj, BB, Tp, d_top, d_bot, G,
                    compute_dtype):
    x_ref, fc_w_ref, fc_b_ref = refs[0], refs[1], refs[2]
    idx = 3
    blocks = []
    for hp in has_proj:
        n = 6 if hp else 4
        blocks.append(refs[idx:idx + n])
        idx += n
    o_ref = refs[idx]
    xp_ref = refs[idx + 1]

    cdt = compute_dtype
    m_rows = BB * Tp

    # Zero ONLY the halo rows, once per grid step (center rows are always
    # overwritten before any tap read).  This is done per step -- not only at
    # program_id == 0 -- because with a "parallel" grid each TensorCore's
    # scratch is uninitialized on its own first step.
    halo = [(0, G), (G + m_rows, G)]
    for e in range(BB):
        base = G + e * Tp
        halo.append((base, d_top))
        halo.append((base + d_top + T, d_bot))
    for start, n in halo:
        xp_ref[pl.ds(start, n), :] = jnp.zeros((n, LANE), cdt)

    # input_fc per batch element, written into the padded layout.
    xb = x_ref[0]                                              # [BB, T, Cin]
    for e in range(BB):
        xe = xb[e].astype(cdt)                                 # [T, Cin]
        he = (jnp.dot(xe, fc_w_ref[...], preferred_element_type=jnp.float32)
              + fc_b_ref[...])                                 # [T, LANE] f32
        xp_ref[pl.ds(G + e * Tp + d_top, T), :] = he.astype(cdt)
    # Padded activation value: per-element halo rows are exactly zero.
    h = xp_ref[pl.ds(G, m_rows), :].astype(jnp.float32)        # [BB*Tp, LANE]

    def conv3(g, w_ref, b_ref, d):
        """Dilated k=3 'same' conv over all BB elements at once.

        Center rows of `g` are written into the scratch (halos stay zero), then
        each tap is ONE contiguous shifted [BB*Tp, LANE] load feeding a K=128
        MXU dot, accumulated in f32.  No [M, 3*C] concat is materialized.
        Halo rows of the returned value are unused garbage (never written back
        to the scratch, never read).
        """
        gc = g.astype(cdt)
        for e in range(BB):
            row = e * Tp + d_top
            xp_ref[pl.ds(G + row, T), :] = gc[row:row + T, :]
        # If d >= T, the shifted taps read only zero padding -> skip them.
        ks = (0, 1, 2) if d < T else (1,)
        acc = None
        for k in ks:
            tap = xp_ref[pl.ds(G + (k - 1) * d, m_rows), :]
            part = jnp.dot(tap, w_ref[k], preferred_element_type=jnp.float32)
            acc = part if acc is None else acc + part
        return acc + b_ref[...]

    for bi, hp in enumerate(has_proj):
        d = dilations[bi]
        if hp:
            w1, b1, w2, b2, pw, pb = blocks[bi]
            res = (jnp.dot(h.astype(cdt), pw[...],
                           preferred_element_type=jnp.float32) + pb[...])
        else:
            w1, b1, w2, b2 = blocks[bi]
            res = h
        t = conv3(_gelu(h), w1, b1, d)
        h = conv3(_gelu(t), w2, b2, d) + res

    # encoder(...)[:, -1]: gather the last timestep of each element into one
    # sublane-dense (BB, LANE) store; only this is written back to HBM.
    last = [h[e * Tp + d_top + T - 1:e * Tp + d_top + T, :] for e in range(BB)]
    out = last[0] if BB == 1 else jnp.concatenate(last, axis=0)
    o_ref[0] = out.astype(o_ref.dtype)


# ---------------------------------------------------------------------------
# Parameter packing: zero-pad channels to LANE; conv taps kept as [3, LANE, LANE].
# Weights carried in compute_dtype (bf16 by default); biases stay f32.
# ---------------------------------------------------------------------------
def _pack_params(params, compute_dtype):
    fc_w = params["input_fc"]["w"]            # [Cin, H]
    fc_b = params["input_fc"]["b"]            # [H]
    cin, hid = fc_w.shape
    assert hid <= LANE, "hidden_dims > 128 not supported"
    fc_w_p = (jnp.zeros((cin, LANE), compute_dtype)
              .at[:, :hid].set(fc_w.astype(compute_dtype)))
    fc_b_p = jnp.zeros((1, LANE), jnp.float32).at[0, :hid].set(fc_b)

    def pack_conv(w, b):
        _, ci, co = w.shape
        assert ci <= LANE and co <= LANE, "channels > 128 not supported"
        wp = (jnp.zeros((3, LANE, LANE), compute_dtype)
              .at[:, :ci, :co].set(w.astype(compute_dtype)))
        bp = jnp.zeros((1, LANE), jnp.float32).at[0, :co].set(b)
        return wp, bp

    blocks = []
    for blk in params["blocks"]:
        w1, b1 = pack_conv(blk["w1"], blk["b1"])
        w2, b2 = pack_conv(blk["w2"], blk["b2"])
        entry = {"w1": w1, "b1": b1, "w2": w2, "b2": b2}
        if blk["proj"] is not None:
            pw, pb = blk["proj"]["w"], blk["proj"]["b"]
            ci, co = pw.shape
            entry["pw"] = (jnp.zeros((LANE, LANE), compute_dtype)
                           .at[:ci, :co].set(pw.astype(compute_dtype)))
            entry["pb"] = jnp.zeros((1, LANE), jnp.float32).at[0, :co].set(pb)
        blocks.append(entry)
    return fc_w_p, fc_b_p, blocks


def _choose_bb(B, Tp, max_rows=2048):
    """Batch-block size: feed the MXU (BB*Tp >= 256) under a VMEM row budget,
    keeping >= 2 grid steps when possible (v7x: 2 TensorCores + DMA overlap)."""
    divs = [d for d in range(1, B + 1) if B % d == 0 and d * Tp <= max_rows]
    if not divs:
        divs = [1]
    target = -(-256 // Tp)
    cand = [d for d in divs if d >= target]
    bb = min(cand) if cand else max(divs)
    if B // bb < 2:
        two_step = [d for d in divs if B // d >= 2]
        if two_step:
            bb = max(two_step)
    return bb


# ---------------------------------------------------------------------------
# Wrapper forward: encoder(input, mask='all_true')[:, -1]
# ---------------------------------------------------------------------------
def ts2vec_encoder_wrapper_forward(params, x, mask="all_true",
                                   compute_dtype=jnp.bfloat16):
    # TODO(synk): binomial/continuous mask generation and NaN-mask handling are
    #             omitted (mask='all_true' eval path); repr_dropout is identity.
    B, T, Cin = x.shape
    n_blocks = len(params["blocks"])
    dilations = tuple(2 ** i for i in range(n_blocks))
    # Halo only needs to cover dilations that actually reach inside the window.
    d_halo = max([d for d in dilations if d < T], default=1)

    # Sublane-tile-aligned halo geometry (8 rows for f32, 16 for bf16).
    sub_align = 8 * (4 // jnp.dtype(compute_dtype).itemsize)
    d_top = _round_up(d_halo, sub_align)
    d_bot = d_halo + ((-(T + d_halo)) % sub_align)
    Tp = d_top + T + d_bot                       # per-element padded length
    G = d_top                                    # global halo: shifted taps stay in-bounds

    BB = _choose_bb(B, Tp)
    n_steps = B // BB

    fc_w, fc_b, blocks = _pack_params(params, compute_dtype)
    has_proj = tuple("pw" in b for b in blocks)
    c_out = params["blocks"][-1]["w2"].shape[2]

    x4 = x.reshape(n_steps, BB, T, Cin)

    args = [x4, fc_w, fc_b]
    in_specs = [
        pl.BlockSpec((1, BB, T, Cin), lambda bi: (bi, 0, 0, 0)),
        pl.BlockSpec(fc_w.shape, lambda bi: (0, 0)),
        pl.BlockSpec(fc_b.shape, lambda bi: (0, 0)),
    ]

    def _w_spec(shape):
        nd = len(shape)
        # Constant index map -> weight DMA'd once, VMEM-resident across the grid.
        # TODO(synk): pipeline_mode=pl.Buffered(1) would single-buffer these and
        #             halve their VMEM footprint.
        return pl.BlockSpec(shape, lambda bi: (0,) * nd)

    for blk in blocks:
        keys = ("w1", "b1", "w2", "b2") + (("pw", "pb") if "pw" in blk else ())
        for k in keys:
            args.append(blk[k])
            in_specs.append(_w_spec(blk[k].shape))

    kernel = functools.partial(
        _encoder_kernel, T=T, dilations=dilations, has_proj=has_proj,
        BB=BB, Tp=Tp, d_top=d_top, d_bot=d_bot, G=G, compute_dtype=compute_dtype)

    scratch_rows = 2 * G + BB * Tp
    out = pl.pallas_call(
        kernel,
        out_shape=jax.ShapeDtypeStruct((n_steps, BB, LANE), x.dtype),
        grid=(n_steps,),
        in_specs=in_specs,
        out_specs=pl.BlockSpec((1, BB, LANE), lambda bi: (bi, 0, 0)),
        scratch_shapes=[pltpu.VMEM((scratch_rows, LANE), compute_dtype)],
        compiler_params=pltpu.CompilerParams(
            dimension_semantics=("parallel",),          # split across TCs on v7x
            vmem_limit_bytes=48 * 1024 * 1024),          # explicit budget (v7x: 64 MiB)
    )(*args)
    return out.reshape(B, LANE)[:, :c_out]


# ---------------------------------------------------------------------------
# Deterministic synthetic params (same structure/semantics as the torch module).
# ---------------------------------------------------------------------------
def init_params(key, input_dims, hidden_dims, output_dims, depth):
    channels = [hidden_dims] * depth + [output_dims]
    params = {}
    key, k1, k2 = jax.random.split(key, 3)
    params["input_fc"] = {
        "w": 0.1 * jax.random.normal(k1, (input_dims, hidden_dims), jnp.float32),
        "b": 0.1 * jax.random.normal(k2, (hidden_dims,), jnp.float32),
    }
    blocks = []
    in_ch = hidden_dims
    for i, out_ch in enumerate(channels):
        final = i == len(channels) - 1
        key, ka, kb, kc, kd, ke, kf = jax.random.split(key, 7)
        blk = {
            "w1": 0.1 * jax.random.normal(ka, (3, in_ch, out_ch), jnp.float32),
            "b1": 0.1 * jax.random.normal(kb, (out_ch,), jnp.float32),
            "w2": 0.1 * jax.random.normal(kc, (3, out_ch, out_ch), jnp.float32),
            "b2": 0.1 * jax.random.normal(kd, (out_ch,), jnp.float32),
            "proj": None,
        }
        if in_ch != out_ch or final:
            blk["proj"] = {
                "w": 0.1 * jax.random.normal(ke, (in_ch, out_ch), jnp.float32),
                "b": 0.1 * jax.random.normal(kf, (out_ch,), jnp.float32),
            }
        blocks.append(blk)
        in_ch = out_ch
    params["blocks"] = blocks
    return params


# Pure-JAX (XLA) reference of the same forward, for a sanity check.
def _reference_forward(params, x):
    _, T, _ = x.shape
    h = x @ params["input_fc"]["w"] + params["input_fc"]["b"]
    for i, blk in enumerate(params["blocks"]):
        d = 2 ** i
        res = h if blk["proj"] is None else h @ blk["proj"]["w"] + blk["proj"]["b"]

        def conv(v, w, b):
            vp = jnp.pad(v, ((0, 0), (d, d), (0, 0)))
            out = sum(jnp.einsum("btc,cd->btd", vp[:, k * d:k * d + T, :], w[k])
                      for k in range(3))
            return out + b

        t = conv(_gelu(h), blk["w1"], blk["b1"])
        h = conv(_gelu(t), blk["w2"], blk["b2"]) + res
    return h[:, -1]


if __name__ == "__main__":
    def run_case(key, B, T, c_in, hidden, c_out, depth, compute_dtype, tol):
        kx, kp = jax.random.split(key)
        x = jax.random.normal(kx, (B, T, c_in), jnp.float32)
        params = init_params(kp, c_in, hidden, c_out, depth)
        out = ts2vec_encoder_wrapper_forward(params, x, mask="all_true",
                                             compute_dtype=compute_dtype)
        out = jax.block_until_ready(out)
        assert out.shape == (B, c_out), out.shape
        ref = _reference_forward(params, x)
        max_err = float(jnp.max(jnp.abs(out - ref)))
        assert bool(jnp.allclose(out, ref, rtol=tol, atol=tol)), max_err

    key = jax.random.PRNGKey(0)
    k1, k2 = jax.random.split(key)
    # Small case: BB=1 per grid step, all-f32 carry.
    run_case(k1, B=2, T=16, c_in=4, hidden=32, c_out=32, depth=2,
             compute_dtype=jnp.float32, tol=5e-2)
    # Batch-blocked case: BB=2 elements per grid step, bf16 carry / f32 accum.
    run_case(k2, B=4, T=16, c_in=4, hidden=32, c_out=32, depth=2,
             compute_dtype=jnp.bfloat16, tol=5e-2)
    print("KERNEL_OK")
</pallas_src>

<mosaic_0001>
module attributes {stable_mosaic.version = 11 : i64} {
  func.func @_encoder_kernel(%arg0: i32, %arg1: memref<1x1x16x4xf32, #tpu.memory_space<vmem>>, %arg2: memref<4x128xf32, #tpu.memory_space<vmem>>, %arg3: memref<1x128xf32, #tpu.memory_space<vmem>>, %arg4: memref<3x128x128xf32, #tpu.memory_space<vmem>>, %arg5: memref<1x128xf32, #tpu.memory_space<vmem>>, %arg6: memref<3x128x128xf32, #tpu.memory_space<vmem>>, %arg7: memref<1x128xf32, #tpu.memory_space<vmem>>, %arg8: memref<3x128x128xf32, #tpu.memory_space<vmem>>, %arg9: memref<1x128xf32, #tpu.memory_space<vmem>>, %arg10: memref<3x128x128xf32, #tpu.memory_space<vmem>>, %arg11: memref<1x128xf32, #tpu.memory_space<vmem>>, %arg12: memref<3x128x128xf32, #tpu.memory_space<vmem>>, %arg13: memref<1x128xf32, #tpu.memory_space<vmem>>, %arg14: memref<3x128x128xf32, #tpu.memory_space<vmem>>, %arg15: memref<1x128xf32, #tpu.memory_space<vmem>>, %arg16: memref<128x128xf32, #tpu.memory_space<vmem>>, %arg17: memref<1x128xf32, #tpu.memory_space<vmem>>, %arg18: memref<1x1x128xf32, #tpu.memory_space<vmem>>, %arg19: memref<48x128xf32, #tpu.memory_space<vmem>>) attributes {dimension_semantics = [#tpu.dimension_semantics<parallel>], iteration_bounds = array<i64: 2>, scalar_prefetch = 0 : i64, scratch_operands = 1 : i64, tpu.core_type = #tpu.core_type<tc>, window_params = [{transform_indices = @transform_0, window_bounds = array<i64: 1, 1, 16, 4>}, {pipeline_mode = #tpu.pipeline_mode<synchronous>, transform_indices = @transform_1, window_bounds = array<i64: 4, 128>}, {pipeline_mode = #tpu.pipeline_mode<synchronous>, transform_indices = @transform_2, window_bounds = array<i64: 1, 128>}, {pipeline_mode = #tpu.pipeline_mode<synchronous>, transform_indices = @transform_3, window_bounds = array<i64: 3, 128, 128>}, {pipeline_mode = #tpu.pipeline_mode<synchronous>, transform_indices = @transform_4, window_bounds = array<i64: 1, 128>}, {pipeline_mode = #tpu.pipeline_mode<synchronous>, transform_indices = @transform_5, window_bounds = array<i64: 3, 128, 128>}, {pipeline_mode = #tpu.pipeline_mode<synchronous>, transform_indices = @transform_6, window_bounds = array<i64: 1, 128>}, {pipeline_mode = #tpu.pipeline_mode<synchronous>, transform_indices = @transform_7, window_bounds = array<i64: 3, 128, 128>}, {pipeline_mode = #tpu.pipeline_mode<synchronous>, transform_indices = @transform_8, window_bounds = array<i64: 1, 128>}, {pipeline_mode = #tpu.pipeline_mode<synchronous>, transform_indices = @transform_9, window_bounds = array<i64: 3, 128, 128>}, {pipeline_mode = #tpu.pipeline_mode<synchronous>, transform_indices = @transform_10, window_bounds = array<i64: 1, 128>}, {pipeline_mode = #tpu.pipeline_mode<synchronous>, transform_indices = @transform_11, window_bounds = array<i64: 3, 128, 128>}, {pipeline_mode = #tpu.pipeline_mode<synchronous>, transform_indices = @transform_12, window_bounds = array<i64: 1, 128>}, {pipeline_mode = #tpu.pipeline_mode<synchronous>, transform_indices = @transform_13, window_bounds = array<i64: 3, 128, 128>}, {pipeline_mode = #tpu.pipeline_mode<synchronous>, transform_indices = @transform_14, window_bounds = array<i64: 1, 128>}, {pipeline_mode = #tpu.pipeline_mode<synchronous>, transform_indices = @transform_15, window_bounds = array<i64: 128, 128>}, {pipeline_mode = #tpu.pipeline_mode<synchronous>, transform_indices = @transform_16, window_bounds = array<i64: 1, 128>}, {transform_indices = @transform_17, window_bounds = array<i64: 1, 1, 128>}]} {
    %cst = arith.constant 0.000000e+00 : f32
    %0 = vector.broadcast %cst : f32 to vector<8x128xf32>
    %c0 = arith.constant 0 : index
    %c0_0 = arith.constant 0 : index
    %1 = vector.load %arg19[%c0, %c0_0] : memref<48x128xf32, #tpu.memory_space<vmem>>, vector<8x128xf32>
    tpu.vector_store %arg19[%c0, %c0_0], %0 {strides = array<i32>} : memref<48x128xf32, #tpu.memory_space<vmem>>, vector<8x128xf32>,
    %cst_1 = arith.constant 0.000000e+00 : f32
    %2 = vector.broadcast %cst_1 : f32 to vector<8x128xf32>
    %c40 = arith.constant 40 : index
    %c0_2 = arith.constant 0 : index
    %3 = vector.load %arg19[%c40, %c0_2] : memref<48x128xf32, #tpu.memory_space<vmem>>, vector<8x128xf32>
    tpu.vector_store %arg19[%c40, %c0_2], %2 {strides = array<i32>} : memref<48x128xf32, #tpu.memory_space<vmem>>, vector<8x128xf32>,
    %cst_3 = arith.constant 0.000000e+00 : f32
    %4 = vector.broadcast %cst_3 : f32 to vector<8x128xf32>
    %c8 = arith.constant 8 : index
    %c0_4 = arith.constant 0 : index
    %5 = vector.load %arg19[%c8, %c0_4] : memref<48x128xf32, #tpu.memory_space<vmem>>, vector<8x128xf32>
    tpu.vector_store %arg19[%c8, %c0_4], %4 {strides = array<i32>} : memref<48x128xf32, #tpu.memory_space<vmem>>, vector<8x128xf32>,
    %cst_5 = arith.constant 0.000000e+00 : f32
    %6 = vector.broadcast %cst_5 : f32 to vector<8x128xf32>
    %c32 = arith.constant 32 : index
    %c0_6 = arith.constant 0 : index
    %7 = vector.load %arg19[%c32, %c0_6] : memref<48x128xf32, #tpu.memory_space<vmem>>, vector<8x128xf32>
    tpu.vector_store %arg19[%c32, %c0_6], %6 {strides = array<i32>} : memref<48x128xf32, #tpu.memory_space<vmem>>, vector<8x128xf32>,
    %c0_7 = arith.constant 0 : index
    %c0_8 = arith.constant 0 : index
    %c0_9 = arith.constant 0 : index
    %c0_10 = arith.constant 0 : index
    %8 = vector.load %arg1[%c0_7, %c0_8, %c0_9, %c0_10] : memref<1x1x16x4xf32, #tpu.memory_space<vmem>>, vector<1x1x16x4xf32>
    %9 = vector.shape_cast %8 : vector<1x1x16x4xf32> to vector<1x16x4xf32>
    %10 = vector.shape_cast %9 : vector<1x16x4xf32> to vector<16x4xf32>
    %c0_11 = arith.constant 0 : index
    %c0_12 = arith.constant 0 : index
    %11 = vector.load %arg2[%c0_11, %c0_12] : memref<4x128xf32, #tpu.memory_space<vmem>>, vector<4x128xf32>
    %cst_13 = arith.constant dense<0.000000e+00> : vector<16x128xf32>
    %12 = tpu.matmul %10, %11, %cst_13 {dimension_numbers = #tpu.dot_dimension_numbers<[1], [0], [0], [1], [0, 0, 1, 1], [], []>} : vector<16x4xf32>, vector<4x128xf32>, vector<16x128xf32> -> vector<16x128xf32>
    %c0_14 = arith.constant 0 : index
    %c0_15 = arith.constant 0 : index
    %13 = vector.load %arg3[%c0_14, %c0_15] : memref<1x128xf32, #tpu.memory_space<vmem>>, vector<1x128xf32>
    %14 = vector.broadcast %13 : vector<1x128xf32> to vector<16x128xf32>
    %15 = arith.addf %12, %14 : vector<16x128xf32>
    %c16 = arith.constant 16 : index
    %c0_16 = arith.constant 0 : index
    %16 = vector.load %arg19[%c16, %c0_16] : memref<48x128xf32, #tpu.memory_space<vmem>>, vector<16x128xf32>
    tpu.vector_store %arg19[%c16, %c0_16], %15 {strides = array<i32>} : memref<48x128xf32, #tpu.memory_space<vmem>>, vector<16x128xf32>,
    %c8_17 = arith.constant 8 : index
    %c0_18 = arith.constant 0 : index
    %17 = vector.load %arg19[%c8_17, %c0_18] : memref<48x128xf32, #tpu.memory_space<vmem>>, vector<32x128xf32>
    %cst_19 = arith.constant 5.000000e-01 : f32
    %18 = vector.broadcast %cst_19 : f32 to vector<32x128xf32>
    %19 = arith.mulf %18, %17 : vector<32x128xf32>
    %cst_20 = arith.constant 4.471500e-02 : f32
    %20 = vector.broadcast %cst_20 : f32 to vector<32x128xf32>
    %21 = arith.mulf %20, %17 : vector<32x128xf32>
    %22 = arith.mulf %21, %17 : vector<32x128xf32>
    %23 = arith.mulf %22, %17 : vector<32x128xf32>
    %24 = arith.addf %17, %23 : vector<32x128xf32>
    %cst_21 = arith.constant 0.797884583 : f32
    %25 = vector.broadcast %cst_21 : f32 to vector<32x128xf32>
    %26 = arith.mulf %25, %24 : vector<32x128xf32>
    %27 = math.tanh %26 : vector<32x128xf32>
    %cst_22 = arith.constant 1.000000e+00 : f32
    %28 = vector.broadcast %cst_22 : f32 to vector<32x128xf32>
    %29 = arith.addf %28, %27 : vector<32x128xf32>
    %30 = arith.mulf %19, %29 : vector<32x128xf32>
    %31 = vector.extract_strided_slice %30 {offsets = [8, 0], sizes = [16, 128], strides = [1, 1]} : vector<32x128xf32> to vector<16x128xf32>
    %c16_23 = arith.constant 16 : index
    %c0_24 = arith.constant 0 : index
    %32 = vector.load %arg19[%c16_23, %c0_24] : memref<48x128xf32, #tpu.memory_space<vmem>>, vector<16x128xf32>
    tpu.vector_store %arg19[%c16_23, %c0_24], %31 {strides = array<i32>} : memref<48x128xf32, #tpu.memory_space<vmem>>, vector<16x128xf32>,
    %c7 = arith.constant 7 : index
    %c0_25 = arith.constant 0 : index
    %33 = vector.load %arg19[%c7, %c0_25] : memref<48x128xf32, #tpu.memory_space<vmem>>, vector<32x128xf32>
    %c0_26 = arith.constant 0 : index
    %c0_27 = arith.constant 0 : index
    %c0_28 = arith.constant 0 : index
    %34 = vector.load %arg4[%c0_26, %c0_27, %c0_28] : memref<3x128x128xf32, #tpu.memory_space<vmem>>, vector<1x128x128xf32>
    %35 = vector.shape_cast %34 : vector<1x128x128xf32> to vector<128x128xf32>
    %cst_29 = arith.constant dense<0.000000e+00> : vector<32x128xf32>
    %36 = tpu.matmul %33, %35, %cst_29 {dimension_numbers = #tpu.dot_dimension_numbers<[1], [0], [0], [1], [0, 0, 1, 1], [], []>} : vector<32x128xf32>, vector<128x128xf32>, vector<32x128xf32> -> vector<32x128xf32>
    %c8_30 = arith.constant 8 : index
    %c0_31 = arith.constant 0 : index
    %37 = vector.load %arg19[%c8_30, %c0_31] : memref<48x128xf32, #tpu.memory_space<vmem>>, vector<32x128xf32>
    %c1 = arith.constant 1 : index
    %c0_32 = arith.constant 0 : index
    %c0_33 = arith.constant 0 : index
    %38 = vector.load %arg4[%c1, %c0_32, %c0_33] : memref<3x128x128xf32, #tpu.memory_space<vmem>>, vector<1x128x128xf32>
    %39 = vector.shape_cast %38 : vector<1x128x128xf32> to vector<128x128xf32>
    %cst_34 = arith.constant dense<0.000000e+00> : vector<32x128xf32>
    %40 = tpu.matmul %37, %39, %cst_34 {dimension_numbers = #tpu.dot_dimension_numbers<[1], [0], [0], [1], [0, 0, 1, 1], [], []>} : vector<32x128xf32>, vector<128x128xf32>, vector<32x128xf32> -> vector<32x128xf32>
    %41 = arith.addf %36, %40 : vector<32x128xf32>
    %c9 = arith.constant 9 : index
    %c0_35 = arith.constant 0 : index
    %42 = vector.load %arg19[%c9, %c0_35] : memref<48x128xf32, #tpu.memory_space<vmem>>, vector<32x128xf32>
    %c2 = arith.constant 2 : index
    %c0_36 = arith.constant 0 : index
    %c0_37 = arith.constant 0 : index
    %43 = vector.load %arg4[%c2, %c0_36, %c0_37] : memref<3x128x128xf32, #tpu.memory_space<vmem>>, vector<1x128x128xf32>
    %44 = vector.shape_cast %43 : vector<1x128x128xf32> to vector<128x128xf32>
    %cst_38 = arith.constant dense<0.000000e+00> : vector<32x128xf32>
    %45 = tpu.matmul %42, %44, %cst_38 {dimension_numbers = #tpu.dot_dimension_numbers<[1], [0], [0], [1], [0, 0, 1, 1], [], []>} : vector<32x128xf32>, vector<128x128xf32>, vector<32x128xf32> -> vector<32x128xf32>
    %46 = arith.addf %41, %45 : vector<32x128xf32>
    %c0_39 = arith.constant 0 : index
    %c0_40 = arith.constant 0 : index
    %47 = vector.load %arg5[%c0_39, %c0_40] : memref<1x128xf32, #tpu.memory_space<vmem>>, vector<1x128xf32>
    %48 = vector.broadcast %47 : vector<1x128xf32> to vector<32x128xf32>
    %49 = arith.addf %46, %48 : vector<32x128xf32>
    %cst_41 = arith.constant 5.000000e-01 : f32
    %50 = vector.broadcast %cst_41 : f32 to vector<32x128xf32>
    %51 = arith.mulf %50, %49 : vector<32x128xf32>
    %cst_42 = arith.constant 4.471500e-02 : f32
    %52 = vector.broadcast %cst_42 : f32 to vector<32x128xf32>
    %53 = arith.mulf %52, %49 : vector<32x128xf32>
    %54 = arith.mulf %53, %49 : vector<32x128xf32>
    %55 = arith.mulf %54, %49 : vector<32x128xf32>
    %56 = arith.addf %49, %55 : vector<32x128xf32>
    %cst_43 = arith.constant 0.797884583 : f32
    %57 = vector.broadcast %cst_43 : f32 to vector<32x128xf32>
    %58 = arith.mulf %57, %56 : vector<32x128xf32>
    %59 = math.tanh %58 : vector<32x128xf32>
    %cst_44 = arith.constant 1.000000e+00 : f32
    %60 = vector.broadcast %cst_44 : f32 to vector<32x128xf32>
    %61 = arith.addf %60, %59 : vector<32x128xf32>
    %62 = arith.mulf %51, %61 : vector<32x128xf32>
    %63 = vector.extract_strided_slice %62 {offsets = [8, 0], sizes = [16, 128], strides = [1, 1]} : vector<32x128xf32> to vector<16x128xf32>
    %c16_45 = arith.constant 16 : index
    %c0_46 = arith.constant 0 : index
    %64 = vector.load %arg19[%c16_45, %c0_46] : memref<48x128xf32, #tpu.memory_space<vmem>>, vector<16x128xf32>
    tpu.vector_store %arg19[%c16_45, %c0_46], %63 {strides = array<i32>} : memref<48x128xf32, #tpu.memory_space<vmem>>, vector<16x128xf32>,
    %c7_47 = arith.constant 7 : index
    %c0_48 = arith.constant 0 : index
    %65 = vector.load %arg19[%c7_47, %c0_48] : memref<48x128xf32, #tpu.memory_space<vmem>>, vector<32x128xf32>
    %c0_49 = arith.constant 0 : index
    %c0_50 = arith.constant 0 : index
    %c0_51 = arith.constant 0 : index
    %66 = vector.load %arg6[%c0_49, %c0_50, %c0_51] : memref<3x128x128xf32, #tpu.memory_space<vmem>>, vector<1x128x128xf32>
    %67 = vector.shape_cast %66 : vector<1x128x128xf32> to vector<128x128xf32>
    %cst_52 = arith.constant dense<0.000000e+00> : vector<32x128xf32>
    %68 = tpu.matmul %65, %67, %cst_52 {dimension_numbers = #tpu.dot_dimension_numbers<[1], [0], [0], [1], [0, 0, 1, 1], [], []>} : vector<32x128xf32>, vector<128x128xf32>, vector<32x128xf32> -> vector<32x128xf32>
    %c8_53 = arith.constant 8 : index
    %c0_54 = arith.constant 0 : index
    %69 = vector.load %arg19[%c8_53, %c0_54] : memref<48x128xf32, #tpu.memory_space<vmem>>, vector<32x128xf32>
    %c1_55 = arith.constant 1 : index
    %c0_56 = arith.constant 0 : index
    %c0_57 = arith.constant 0 : index
    %70 = vector.load %arg6[%c1_55, %c0_56, %c0_57] : memref<3x128x128xf32, #tpu.memory_space<vmem>>, vector<1x128x128xf32>
    %71 = vector.shape_cast %70 : vector<1x128x128xf32> to vector<128x128xf32>
    %cst_58 = arith.constant dense<0.000000e+00> : vector<32x128xf32>
    %72 = tpu.matmul %69, %71, %cst_58 {dimension_numbers = #tpu.dot_dimension_numbers<[1], [0], [0], [1], [0, 0, 1, 1], [], []>} : vector<32x128xf32>, vector<128x128xf32>, vector<32x128xf32> -> vector<32x128xf32>
    %73 = arith.addf %68, %72 : vector<32x128xf32>
    %c9_59 = arith.constant 9 : index
    %c0_60 = arith.constant 0 : index
    %74 = vector.load %arg19[%c9_59, %c0_60] : memref<48x128xf32, #tpu.memory_space<vmem>>, vector<32x128xf32>
    %c2_61 = arith.constant 2 : index
    %c0_62 = arith.constant 0 : index
    %c0_63 = arith.constant 0 : index
    %75 = vector.load %arg6[%c2_61, %c0_62, %c0_63] : memref<3x128x128xf32, #tpu.memory_space<vmem>>, vector<1x128x128xf32>
    %76 = vector.shape_cast %75 : vector<1x128x128xf32> to vector<128x128xf32>
    %cst_64 = arith.constant dense<0.000000e+00> : vector<32x128xf32>
    %77 = tpu.matmul %74, %76, %cst_64 {dimension_numbers = #tpu.dot_dimension_numbers<[1], [0], [0], [1], [0, 0, 1, 1], [], []>} : vector<32x128xf32>, vector<128x128xf32>, vector<32x128xf32> -> vector<32x128xf32>
    %78 = arith.addf %73, %77 : vector<32x128xf32>
    %c0_65 = arith.constant 0 : index
    %c0_66 = arith.constant 0 : index
    %79 = vector.load %arg7[%c0_65, %c0_66] : memref<1x128xf32, #tpu.memory_space<vmem>>, vector<1x128xf32>
    %80 = vector.broadcast %79 : vector<1x128xf32> to vector<32x128xf32>
    %81 = arith.addf %78, %80 : vector<32x128xf32>
    %82 = arith.addf %81, %17 : vector<32x128xf32>
    %cst_67 = arith.constant 5.000000e-01 : f32
    %83 = vector.broadcast %cst_67 : f32 to vector<32x128xf32>
    %84 = arith.mulf %83, %82 : vector<32x128xf32>
    %cst_68 = arith.constant 4.471500e-02 : f32
    %85 = vector.broadcast %cst_68 : f32 to vector<32x128xf32>
    %86 = arith.mulf %85, %82 : vector<32x128xf32>
    %87 = arith.mulf %86, %82 : vector<32x128xf32>
    %88 = arith.mulf %87, %82 : vector<32x128xf32>
    %89 = arith.addf %82, %88 : vector<32x128xf32>
    %cst_69 = arith.constant 0.797884583 : f32
    %90 = vector.broadcast %cst_69 : f32 to vector<32x128xf32>
    %91 = arith.mulf %90, %89 : vector<32x128xf32>
    %92 = math.tanh %91 : vector<32x128xf32>
    %cst_70 = arith.constant 1.000000e+00 : f32
    %93 = vector.broadcast %cst_70 : f32 to vector<32x128xf32>
    %94 = arith.addf %93, %92 : vector<32x128xf32>
    %95 = arith.mulf %84, %94 : vector<32x128xf32>
    %96 = vector.extract_strided_slice %95 {offsets = [8, 0], sizes = [16, 128], strides = [1, 1]} : vector<32x128xf32> to vector<16x128xf32>
    %c16_71 = arith.constant 16 : index
    %c0_72 = arith.constant 0 : index
    %97 = vector.load %arg19[%c16_71, %c0_72] : memref<48x128xf32, #tpu.memory_space<vmem>>, vector<16x128xf32>
    tpu.vector_store %arg19[%c16_71, %c0_72], %96 {strides = array<i32>} : memref<48x128xf32, #tpu.memory_space<vmem>>, vector<16x128xf32>,
    %c6 = arith.constant 6 : index
    %c0_73 = arith.constant 0 : index
    %98 = vector.load %arg19[%c6, %c0_73] : memref<48x128xf32, #tpu.memory_space<vmem>>, vector<32x128xf32>
    %c0_74 = arith.constant 0 : index
    %c0_75 = arith.constant 0 : index
    %c0_76 = arith.constant 0 : index
    %99 = vector.load %arg8[%c0_74, %c0_75, %c0_76] : memref<3x128x128xf32, #tpu.memory_space<vmem>>, vector<1x128x128xf32>
    %100 = vector.shape_cast %99 : vector<1x128x128xf32> to vector<128x128xf32>
    %cst_77 = arith.constant dense<0.000000e+00> : vector<32x128xf32>
    %101 = tpu.matmul %98, %100, %cst_77 {dimension_numbers = #tpu.dot_dimension_numbers<[1], [0], [0], [1], [0, 0, 1, 1], [], []>} : vector<32x128xf32>, vector<128x128xf32>, vector<32x128xf32> -> vector<32x128xf32>
    %c8_78 = arith.constant 8 : index
    %c0_79 = arith.constant 0 : index
    %102 = vector.load %arg19[%c8_78, %c0_79] : memref<48x128xf32, #tpu.memory_space<vmem>>, vector<32x128xf32>
    %c1_80 = arith.constant 1 : index
    %c0_81 = arith.constant 0 : index
    %c0_82 = arith.constant 0 : index
    %103 = vector.load %arg8[%c1_80, %c0_81, %c0_82] : memref<3x128x128xf32, #tpu.memory_space<vmem>>, vector<1x128x128xf32>
    %104 = vector.shape_cast %103 : vector<1x128x128xf32> to vector<128x128xf32>
    %cst_83 = arith.constant dense<0.000000e+00> : vector<32x128xf32>
    %105 = tpu.matmul %102, %104, %cst_83 {dimension_numbers = #tpu.dot_dimension_numbers<[1], [0], [0], [1], [0, 0, 1, 1], [], []>} : vector<32x128xf32>, vector<128x128xf32>, vector<32x128xf32> -> vector<32x128xf32>
    %106 = arith.addf %101, %105 : vector<32x128xf32>
    %c10 = arith.constant 10 : index
    %c0_84 = arith.constant 0 : index
    %107 = vector.load %arg19[%c10, %c0_84] : memref<48x128xf32, #tpu.memory_space<vmem>>, vector<32x128xf32>
    %c2_85 = arith.constant 2 : index
    %c0_86 = arith.constant 0 : index
    %c0_87 = arith.constant 0 : index
    %108 = vector.load %arg8[%c2_85, %c0_86, %c0_87] : memref<3x128x128xf32, #tpu.memory_space<vmem>>, vector<1x128x128xf32>
    %109 = vector.shape_cast %108 : vector<1x128x128xf32> to vector<128x128xf32>
    %cst_88 = arith.constant dense<0.000000e+00> : vector<32x128xf32>
    %110 = tpu.matmul %107, %109, %cst_88 {dimension_numbers = #tpu.dot_dimension_numbers<[1], [0], [0], [1], [0, 0, 1, 1], [], []>} : vector<32x128xf32>, vector<128x128xf32>, vector<32x128xf32> -> vector<32x128xf32>
    %111 = arith.addf %106, %110 : vector<32x128xf32>
    %c0_89 = arith.constant 0 : index
    %c0_90 = arith.constant 0 : index
    %112 = vector.load %arg9[%c0_89, %c0_90] : memref<1x128xf32, #tpu.memory_space<vmem>>, vector<1x128xf32>
    %113 = vector.broadcast %112 : vector<1x128xf32> to vector<32x128xf32>
    %114 = arith.addf %111, %113 : vector<32x128xf32>
    %cst_91 = arith.constant 5.000000e-01 : f32
    %115 = vector.broadcast %cst_91 : f32 to vector<32x128xf32>
    %116 = arith.mulf %115, %114 : vector<32x128xf32>
    %cst_92 = arith.constant 4.471500e-02 : f32
    %117 = vector.broadcast %cst_92 : f32 to vector<32x128xf32>
    %118 = arith.mulf %117, %114 : vector<32x128xf32>
    %119 = arith.mulf %118, %114 : vector<32x128xf32>
    %120 = arith.mulf %119, %114 : vector<32x128xf32>
    %121 = arith.addf %114, %120 : vector<32x128xf32>
    %cst_93 = arith.constant 0.797884583 : f32
    %122 = vector.broadcast %cst_93 : f32 to vector<32x128xf32>
    %123 = arith.mulf %122, %121 : vector<32x128xf32>
    %124 = math.tanh %123 : vector<32x128xf32>
    %cst_94 = arith.constant 1.000000e+00 : f32
    %125 = vector.broadcast %cst_94 : f32 to vector<32x128xf32>
    %126 = arith.addf %125, %124 : vector<32x128xf32>
    %127 = arith.mulf %116, %126 : vector<32x128xf32>
    %128 = vector.extract_strided_slice %127 {offsets = [8, 0], sizes = [16, 128], strides = [1, 1]} : vector<32x128xf32> to vector<16x128xf32>
    %c16_95 = arith.constant 16 : index
    %c0_96 = arith.constant 0 : index
    %129 = vector.load %arg19[%c16_95, %c0_96] : memref<48x128xf32, #tpu.memory_space<vmem>>, vector<16x128xf32>
    tpu.vector_store %arg19[%c16_95, %c0_96], %128 {strides = array<i32>} : memref<48x128xf32, #tpu.memory_space<vmem>>, vector<16x128xf32>,
    %c6_97 = arith.constant 6 : index
    %c0_98 = arith.constant 0 : index
    %130 = vector.load %arg19[%c6_97, %c0_98] : memref<48x128xf32, #tpu.memory_space<vmem>>, vector<32x128xf32>
    %c0_99 = arith.constant 0 : index
    %c0_100 = arith.constant 0 : index
    %c0_101 = arith.constant 0 : index
    %131 = vector.load %arg10[%c0_99, %c0_100, %c0_101] : memref<3x128x128xf32, #tpu.memory_space<vmem>>, vector<1x128x128xf32>
    %132 = vector.shape_cast %131 : vector<1x128x128xf32> to vector<128x128xf32>
    %cst_102 = arith.constant dense<0.000000e+00> : vector<32x128xf32>
    %133 = tpu.matmul %130, %132, %cst_102 {dimension_numbers = #tpu.dot_dimension_numbers<[1], [0], [0], [1], [0, 0, 1, 1], [], []>} : vector<32x128xf32>, vector<128x128xf32>, vector<32x128xf32> -> vector<32x128xf32>
    %c8_103 = arith.constant 8 : index
    %c0_104 = arith.constant 0 : index
    %134 = vector.load %arg19[%c8_103, %c0_104] : memref<48x128xf32, #tpu.memory_space<vmem>>, vector<32x128xf32>
    %c1_105 = arith.constant 1 : index
    %c0_106 = arith.constant 0 : index
    %c0_107 = arith.constant 0 : index
    %135 = vector.load %arg10[%c1_105, %c0_106, %c0_107] : memref<3x128x128xf32, #tpu.memory_space<vmem>>, vector<1x128x128xf32>
    %136 = vector.shape_cast %135 : vector<1x128x128xf32> to vector<128x128xf32>
    %cst_108 = arith.constant dense<0.000000e+00> : vector<32x128xf32>
    %137 = tpu.matmul %134, %136, %cst_108 {dimension_numbers = #tpu.dot_dimension_numbers<[1], [0], [0], [1], [0, 0, 1, 1], [], []>} : vector<32x128xf32>, vector<128x128xf32>, vector<32x128xf32> -> vector<32x128xf32>
    %138 = arith.addf %133, %137 : vector<32x128xf32>
    %c10_109 = arith.constant 10 : index
    %c0_110 = arith.constant 0 : index
    %139 = vector.load %arg19[%c10_109, %c0_110] : memref<48x128xf32, #tpu.memory_space<vmem>>, vector<32x128xf32>
    %c2_111 = arith.constant 2 : index
    %c0_112 = arith.constant 0 : index
    %c0_113 = arith.constant 0 : index
    %140 = vector.load %arg10[%c2_111, %c0_112, %c0_113] : memref<3x128x128xf32, #tpu.memory_space<vmem>>, vector<1x128x128xf32>
    %141 = vector.shape_cast %140 : vector<1x128x128xf32> to vector<128x128xf32>
    %cst_114 = arith.constant dense<0.000000e+00> : vector<32x128xf32>
    %142 = tpu.matmul %139, %141, %cst_114 {dimension_numbers = #tpu.dot_dimension_numbers<[1], [0], [0], [1], [0, 0, 1, 1], [], []>} : vector<32x128xf32>, vector<128x128xf32>, vector<32x128xf32> -> vector<32x128xf32>
    %143 = arith.addf %138, %142 : vector<32x128xf32>
    %c0_115 = arith.constant 0 : index
    %c0_116 = arith.constant 0 : index
    %144 = vector.load %arg11[%c0_115, %c0_116] : memref<1x128xf32, #tpu.memory_space<vmem>>, vector<1x128xf32>
    %145 = vector.broadcast %144 : vector<1x128xf32> to vector<32x128xf32>
    %146 = arith.addf %143, %145 : vector<32x128xf32>
    %147 = arith.addf %146, %82 : vector<32x128xf32>
    %c0_117 = arith.constant 0 : index
    %c0_118 = arith.constant 0 : index
    %148 = vector.load %arg16[%c0_117, %c0_118] : memref<128x128xf32, #tpu.memory_space<vmem>>, vector<128x128xf32>
    %cst_119 = arith.constant dense<0.000000e+00> : vector<32x128xf32>
    %149 = tpu.matmul %147, %148, %cst_119 {dimension_numbers = #tpu.dot_dimension_numbers<[1], [0], [0], [1], [0, 0, 1, 1], [], []>} : vector<32x128xf32>, vector<128x128xf32>, vector<32x128xf32> -> vector<32x128xf32>
    %c0_120 = arith.constant 0 : index
    %c0_121 = arith.constant 0 : index
    %150 = vector.load %arg17[%c0_120, %c0_121] : memref<1x128xf32, #tpu.memory_space<vmem>>, vector<1x128xf32>
    %151 = vector.broadcast %150 : vector<1x128xf32> to vector<32x128xf32>
    %152 = arith.addf %149, %151 : vector<32x128xf32>
    %cst_122 = arith.constant 5.000000e-01 : f32
    %153 = vector.broadcast %cst_122 : f32 to vector<32x128xf32>
    %154 = arith.mulf %153, %147 : vector<32x128xf32>
    %cst_123 = arith.constant 4.471500e-02 : f32
    %155 = vector.broadcast %cst_123 : f32 to vector<32x128xf32>
    %156 = arith.mulf %155, %147 : vector<32x128xf32>
    %157 = arith.mulf %156, %147 : vector<32x128xf32>
    %158 = arith.mulf %157, %147 : vector<32x128xf32>
    %159 = arith.addf %147, %158 : vector<32x128xf32>
    %cst_124 = arith.constant 0.797884583 : f32
    %160 = vector.broadcast %cst_124 : f32 to vector<32x128xf32>
    %161 = arith.mulf %160, %159 : vector<32x128xf32>
    %162 = math.tanh %161 : vector<32x128xf32>
    %cst_125 = arith.constant 1.000000e+00 : f32
    %163 = vector.broadcast %cst_125 : f32 to vector<32x128xf32>
    %164 = arith.addf %163, %162 : vector<32x128xf32>
    %165 = arith.mulf %154, %164 : vector<32x128xf32>
    %166 = vector.extract_strided_slice %165 {offsets = [8, 0], sizes = [16, 128], strides = [1, 1]} : vector<32x128xf32> to vector<16x128xf32>
    %c16_126 = arith.constant 16 : index
    %c0_127 = arith.constant 0 : index
    %167 = vector.load %arg19[%c16_126, %c0_127] : memref<48x128xf32, #tpu.memory_space<vmem>>, vector<16x128xf32>
    tpu.vector_store %arg19[%c16_126, %c0_127], %166 {strides = array<i32>} : memref<48x128xf32, #tpu.memory_space<vmem>>, vector<16x128xf32>,
    %c4 = arith.constant 4 : index
    %c0_128 = arith.constant 0 : index
    %168 = vector.load %arg19[%c4, %c0_128] : memref<48x128xf32, #tpu.memory_space<vmem>>, vector<32x128xf32>
    %c0_129 = arith.constant 0 : index
    %c0_130 = arith.constant 0 : index
    %c0_131 = arith.constant 0 : index
    %169 = vector.load %arg12[%c0_129, %c0_130, %c0_131] : memref<3x128x128xf32, #tpu.memory_space<vmem>>, vector<1x128x128xf32>
    %170 = vector.shape_cast %169 : vector<1x128x128xf32> to vector<128x128xf32>
    %cst_132 = arith.constant dense<0.000000e+00> : vector<32x128xf32>
    %171 = tpu.matmul %168, %170, %cst_132 {dimension_numbers = #tpu.dot_dimension_numbers<[1], [0], [0], [1], [0, 0, 1, 1], [], []>} : vector<32x128xf32>, vector<128x128xf32>, vector<32x128xf32> -> vector<32x128xf32>
    %c8_133 = arith.constant 8 : index
    %c0_134 = arith.constant 0 : index
    %172 = vector.load %arg19[%c8_133, %c0_134] : memref<48x128xf32, #tpu.memory_space<vmem>>, vector<32x128xf32>
    %c1_135 = arith.constant 1 : index
    %c0_136 = arith.constant 0 : index
    %c0_137 = arith.constant 0 : index
    %173 = vector.load %arg12[%c1_135, %c0_136, %c0_137] : memref<3x128x128xf32, #tpu.memory_space<vmem>>, vector<1x128x128xf32>
    %174 = vector.shape_cast %173 : vector<1x128x128xf32> to vector<128x128xf32>
    %cst_138 = arith.constant dense<0.000000e+00> : vector<32x128xf32>
    %175 = tpu.matmul %172, %174, %cst_138 {dimension_numbers = #tpu.dot_dimension_numbers<[1], [0], [0], [1], [0, 0, 1, 1], [], []>} : vector<32x128xf32>, vector<128x128xf32>, vector<32x128xf32> -> vector<32x128xf32>
    %176 = arith.addf %171, %175 : vector<32x128xf32>
    %c12 = arith.constant 12 : index
    %c0_139 = arith.constant 0 : index
    %177 = vector.load %arg19[%c12, %c0_139] : memref<48x128xf32, #tpu.memory_space<vmem>>, vector<32x128xf32>
    %c2_140 = arith.constant 2 : index
    %c0_141 = arith.constant 0 : index
    %c0_142 = arith.constant 0 : index
    %178 = vector.load %arg12[%c2_140, %c0_141, %c0_142] : memref<3x128x128xf32, #tpu.memory_space<vmem>>, vector<1x128x128xf32>
    %179 = vector.shape_cast %178 : vector<1x128x128xf32> to vector<128x128xf32>
    %cst_143 = arith.constant dense<0.000000e+00> : vector<32x128xf32>
    %180 = tpu.matmul %177, %179, %cst_143 {dimension_numbers = #tpu.dot_dimension_numbers<[1], [0], [0], [1], [0, 0, 1, 1], [], []>} : vector<32x128xf32>, vector<128x128xf32>, vector<32x128xf32> -> vector<32x128xf32>
    %181 = arith.addf %176, %180 : vector<32x128xf32>
    %c0_144 = arith.constant 0 : index
    %c0_145 = arith.constant 0 : index
    %182 = vector.load %arg13[%c0_144, %c0_145] : memref<1x128xf32, #tpu.memory_space<vmem>>, vector<1x128xf32>
    %183 = vector.broadcast %182 : vector<1x128xf32> to vector<32x128xf32>
    %184 = arith.addf %181, %183 : vector<32x128xf32>
    %cst_146 = arith.constant 5.000000e-01 : f32
    %185 = vector.broadcast %cst_146 : f32 to vector<32x128xf32>
    %186 = arith.mulf %185, %184 : vector<32x128xf32>
    %cst_147 = arith.constant 4.471500e-02 : f32
    %187 = vector.broadcast %cst_147 : f32 to vector<32x128xf32>
    %188 = arith.mulf %187, %184 : vector<32x128xf32>
    %189 = arith.mulf %188, %184 : vector<32x128xf32>
    %190 = arith.mulf %189, %184 : vector<32x128xf32>
    %191 = arith.addf %184, %190 : vector<32x128xf32>
    %cst_148 = arith.constant 0.797884583 : f32
    %192 = vector.broadcast %cst_148 : f32 to vector<32x128xf32>
    %193 = arith.mulf %192, %191 : vector<32x128xf32>
    %194 = math.tanh %193 : vector<32x128xf32>
    %cst_149 = arith.constant 1.000000e+00 : f32
    %195 = vector.broadcast %cst_149 : f32 to vector<32x128xf32>
    %196 = arith.addf %195, %194 : vector<32x128xf32>
    %197 = arith.mulf %186, %196 : vector<32x128xf32>
    %198 = vector.extract_strided_slice %197 {offsets = [8, 0], sizes = [16, 128], strides = [1, 1]} : vector<32x128xf32> to vector<16x128xf32>
    %c16_150 = arith.constant 16 : index
    %c0_151 = arith.constant 0 : index
    %199 = vector.load %arg19[%c16_150, %c0_151] : memref<48x128xf32, #tpu.memory_space<vmem>>, vector<16x128xf32>
    tpu.vector_store %arg19[%c16_150, %c0_151], %198 {strides = array<i32>} : memref<48x128xf32, #tpu.memory_space<vmem>>, vector<16x128xf32>,
    %c4_152 = arith.constant 4 : index
    %c0_153 = arith.constant 0 : index
    %200 = vector.load %arg19[%c4_152, %c0_153] : memref<48x128xf32, #tpu.memory_space<vmem>>, vector<32x128xf32>
    %c0_154 = arith.constant 0 : index
    %c0_155 = arith.constant 0 : index
    %c0_156 = arith.constant 0 : index
    %201 = vector.load %arg14[%c0_154, %c0_155, %c0_156] : memref<3x128x128xf32, #tpu.memory_space<vmem>>, vector<1x128x128xf32>
    %202 = vector.shape_cast %201 : vector<1x128x128xf32> to vector<128x128xf32>
    %cst_157 = arith.constant dense<0.000000e+00> : vector<32x128xf32>
    %203 = tpu.matmul %200, %202, %cst_157 {dimension_numbers = #tpu.dot_dimension_numbers<[1], [0], [0], [1], [0, 0, 1, 1], [], []>} : vector<32x128xf32>, vector<128x128xf32>, vector<32x128xf32> -> vector<32x128xf32>
    %c8_158 = arith.constant 8 : index
    %c0_159 = arith.constant 0 : index
    %204 = vector.load %arg19[%c8_158, %c0_159] : memref<48x128xf32, #tpu.memory_space<vmem>>, vector<32x128xf32>
    %c1_160 = arith.constant 1 : index
    %c0_161 = arith.constant 0 : index
    %c0_162 = arith.constant 0 : index
    %205 = vector.load %arg14[%c1_160, %c0_161, %c0_162] : memref<3x128x128xf32, #tpu.memory_space<vmem>>, vector<1x128x128xf32>
    %206 = vector.shape_cast %205 : vector<1x128x128xf32> to vector<128x128xf32>
    %cst_163 = arith.constant dense<0.000000e+00> : vector<32x128xf32>
    %207 = tpu.matmul %204, %206, %cst_163 {dimension_numbers = #tpu.dot_dimension_numbers<[1], [0], [0], [1], [0, 0, 1, 1], [], []>} : vector<32x128xf32>, vector<128x128xf32>, vector<32x128xf32> -> vector<32x128xf32>
    %208 = arith.addf %203, %207 : vector<32x128xf32>
    %c12_164 = arith.constant 12 : index
    %c0_165 = arith.constant 0 : index
    %209 = vector.load %arg19[%c12_164, %c0_165] : memref<48x128xf32, #tpu.memory_space<vmem>>, vector<32x128xf32>
    %c2_166 = arith.constant 2 : index
    %c0_167 = arith.constant 0 : index
    %c0_168 = arith.constant 0 : index
    %210 = vector.load %arg14[%c2_166, %c0_167, %c0_168] : memref<3x128x128xf32, #tpu.memory_space<vmem>>, vector<1x128x128xf32>
    %211 = vector.shape_cast %210 : vector<1x128x128xf32> to vector<128x128xf32>
    %cst_169 = arith.constant dense<0.000000e+00> : vector<32x128xf32>
    %212 = tpu.matmul %209, %211, %cst_169 {dimension_numbers = #tpu.dot_dimension_numbers<[1], [0], [0], [1], [0, 0, 1, 1], [], []>} : vector<32x128xf32>, vector<128x128xf32>, vector<32x128xf32> -> vector<32x128xf32>
    %213 = arith.addf %208, %212 : vector<32x128xf32>
    %c0_170 = arith.constant 0 : index
    %c0_171 = arith.constant 0 : index
    %214 = vector.load %arg15[%c0_170, %c0_171] : memref<1x128xf32, #tpu.memory_space<vmem>>, vector<1x128xf32>
    %215 = vector.broadcast %214 : vector<1x128xf32> to vector<32x128xf32>
    %216 = arith.addf %213, %215 : vector<32x128xf32>
    %217 = arith.addf %216, %152 : vector<32x128xf32>
    %218 = vector.extract_strided_slice %217 {offsets = [23, 0], sizes = [1, 128], strides = [1, 1]} : vector<32x128xf32> to vector<1x128xf32>
    %c0_172 = arith.constant 0 : index
    %c0_173 = arith.constant 0 : index
    %c0_174 = arith.constant 0 : index
    %219 = vector.load %arg18[%c0_172, %c0_173, %c0_174] : memref<1x1x128xf32, #tpu.memory_space<vmem>>, vector<1x1x128xf32>
    %220 = vector.shape_cast %219 : vector<1x1x128xf32> to vector<1x128xf32>
    %221 = vector.shape_cast %218 : vector<1x128xf32> to vector<1x1x128xf32>
    tpu.vector_store %arg18[%c0_172, %c0_173, %c0_174], %221 {strides = array<i32>} : memref<1x1x128xf32, #tpu.memory_space<vmem>>, vector<1x1x128xf32>,
    return
  }
  func.func @transform_0(%arg0: i32) -> (i32, i32, i32, i32) {
    %c0_i32 = arith.constant 0 : i32
    %c0_i32_0 = arith.constant 0 : i32
    %c0_i32_1 = arith.constant 0 : i32
    %c0_i32_2 = arith.constant 0 : i32
    return %arg0, %c0_i32, %c0_i32_0, %c0_i32_1 : i32, i32, i32, i32
  }
  func.func @transform_1(%arg0: i32) -> (i32, i32) {
    %c0_i32 = arith.constant 0 : i32
    %c0_i32_0 = arith.constant 0 : i32
    %c0_i32_1 = arith.constant 0 : i32
    return %c0_i32, %c0_i32_0 : i32, i32
  }
  func.func @transform_2(%arg0: i32) -> (i32, i32) {
    %c0_i32 = arith.constant 0 : i32
    %c0_i32_0 = arith.constant 0 : i32
    %c0_i32_1 = arith.constant 0 : i32
    return %c0_i32, %c0_i32_0 : i32, i32
  }
  func.func @transform_3(%arg0: i32) -> (i32, i32, i32) {
    %c0_i32 = arith.constant 0 : i32
    %c0_i32_0 = arith.constant 0 : i32
    %c0_i32_1 = arith.constant 0 : i32
    %c0_i32_2 = arith.constant 0 : i32
    return %c0_i32, %c0_i32_0, %c0_i32_1 : i32, i32, i32
  }
  func.func @transform_4(%arg0: i32) -> (i32, i32) {
    %c0_i32 = arith.constant 0 : i32
    %c0_i32_0 = arith.constant 0 : i32
    %c0_i32_1 = arith.constant 0 : i32
    return %c0_i32, %c0_i32_0 : i32, i32
  }
  func.func @transform_5(%arg0: i32) -> (i32, i32, i32) {
    %c0_i32 = arith.constant 0 : i32
    %c0_i32_0 = arith.constant 0 : i32
    %c0_i32_1 = arith.constant 0 : i32
    %c0_i32_2 = arith.constant 0 : i32
    return %c0_i32, %c0_i32_0, %c0_i32_1 : i32, i32, i32
  }
  func.func @transform_6(%arg0: i32) -> (i32, i32) {
    %c0_i32 = arith.constant 0 : i32
    %c0_i32_0 = arith.constant 0 : i32
    %c0_i32_1 = arith.constant 0 : i32
    return %c0_i32, %c0_i32_0 : i32, i32
  }
  func.func @transform_7(%arg0: i32) -> (i32, i32, i32) {
    %c0_i32 = arith.constant 0 : i32
    %c0_i32_0 = arith.constant 0 : i32
    %c0_i32_1 = arith.constant 0 : i32
    %c0_i32_2 = arith.constant 0 : i32
    return %c0_i32, %c0_i32_0, %c0_i32_1 : i32, i32, i32
  }
  func.func @transform_8(%arg0: i32) -> (i32, i32) {
    %c0_i32 = arith.constant 0 : i32
    %c0_i32_0 = arith.constant 0 : i32
    %c0_i32_1 = arith.constant 0 : i32
    return %c0_i32, %c0_i32_0 : i32, i32
  }
  func.func @transform_9(%arg0: i32) -> (i32, i32, i32) {
    %c0_i32 = arith.constant 0 : i32
    %c0_i32_0 = arith.constant 0 : i32
    %c0_i32_1 = arith.constant 0 : i32
    %c0_i32_2 = arith.constant 0 : i32
    return %c0_i32, %c0_i32_0, %c0_i32_1 : i32, i32, i32
  }
  func.func @transform_10(%arg0: i32) -> (i32, i32) {
    %c0_i32 = arith.constant 0 : i32
    %c0_i32_0 = arith.constant 0 : i32
    %c0_i32_1 = arith.constant 0 : i32
    return %c0_i32, %c0_i32_0 : i32, i32
  }
  func.func @transform_11(%arg0: i32) -> (i32, i32, i32) {
    %c0_i32 = arith.constant 0 : i32
    %c0_i32_0 = arith.constant 0 : i32
    %c0_i32_1 = arith.constant 0 : i32
    %c0_i32_2 = arith.constant 0 : i32
    return %c0_i32, %c0_i32_0, %c0_i32_1 : i32, i32, i32
  }
  func.func @transform_12(%arg0: i32) -> (i32, i32) {
    %c0_i32 = arith.constant 0 : i32
    %c0_i32_0 = arith.constant 0 : i32
    %c0_i32_1 = arith.constant 0 : i32
    return %c0_i32, %c0_i32_0 : i32, i32
  }
  func.func @transform_13(%arg0: i32) -> (i32, i32, i32) {
    %c0_i32 = arith.constant 0 : i32
    %c0_i32_0 = arith.constant 0 : i32
    %c0_i32_1 = arith.constant 0 : i32
    %c0_i32_2 = arith.constant 0 : i32
    return %c0_i32, %c0_i32_0, %c0_i32_1 : i32, i32, i32
  }
  func.func @transform_14(%arg0: i32) -> (i32, i32) {
    %c0_i32 = arith.constant 0 : i32
    %c0_i32_0 = arith.constant 0 : i32
    %c0_i32_1 = arith.constant 0 : i32
    return %c0_i32, %c0_i32_0 : i32, i32
  }
  func.func @transform_15(%arg0: i32) -> (i32, i32) {
    %c0_i32 = arith.constant 0 : i32
    %c0_i32_0 = arith.constant 0 : i32
    %c0_i32_1 = arith.constant 0 : i32
    return %c0_i32, %c0_i32_0 : i32, i32
  }
  func.func @transform_16(%arg0: i32) -> (i32, i32) {
    %c0_i32 = arith.constant 0 : i32
    %c0_i32_0 = arith.constant 0 : i32
    %c0_i32_1 = arith.constant 0 : i32
    return %c0_i32, %c0_i32_0 : i32, i32
  }
  func.func @transform_17(%arg0: i32) -> (i32, i32, i32) {
    %c0_i32 = arith.constant 0 : i32
    %c0_i32_0 = arith.constant 0 : i32
    %c0_i32_1 = arith.constant 0 : i32
    return %arg0, %c0_i32, %c0_i32_0 : i32, i32, i32
  }
}

</mosaic_0001>

<bundles_post_ra>
// kernel: tpu_custom_call.1
= control target key start
LH: loop header
LB: loop body
LE: loop exit
PB: predicated region body
PF: predicated region fallthrough
CT: control target
= control target key end

     0   :  { %s5077_s0 = inlined_call_operand.vmem [shape: f32[2,1,16,4], index: 0, kind: input, shape index: {}]   ;;  %s5078_s1 = inlined_call_operand.vmem [shape: f32[4,128], index: 1, kind: input, shape index: {}]   ;;  %s5079_s2 = inlined_call_operand.vmem [shape: f32[1,128], index: 2, kind: input, shape index: {}]   ;;  %s5080_s3 = inlined_call_operand.hbm [shape: f32[3,128,128], index: 3, kind: input, shape index: {}]   ;;  %s5081_s4 = inlined_call_operand.vmem [shape: f32[1,128], index: 4, kind: input, shape index: {}]   ;;  %s5082_s5 = inlined_call_operand.hbm [shape: f32[3,128,128], index: 5, kind: input, shape index: {}]   ;;  %s5083_s6 = inlined_call_operand.vmem [shape: f32[1,128], index: 6, kind: input, shape index: {}]   ;;  %s5084_s7 = inlined_call_operand.hbm [shape: f32[3,128,128], index: 7, kind: input, shape index: {}]   ;;  %s5085_s8 = inlined_call_operand.vmem [shape: f32[1,128], index: 8, kind: input, shape index: {}]   ;;  %s5086_s9 = inlined_call_operand.hbm [shape: f32[3,128,128], index: 9, kind: input, shape index: {}]   ;;  %s5087_s10 = inlined_call_operand.vmem [shape: f32[1,128], index: 10, kind: input, shape index: {}]   ;;  %s5088_s11 = inlined_call_operand.hbm [shape: f32[3,128,128], index: 11, kind: input, shape index: {}]   ;;  %s5089_s12 = inlined_call_operand.vmem [shape: f32[1,128], index: 12, kind: input, shape index: {}]   ;;  %s5090_s13 = inlined_call_operand.hbm [shape: f32[3,128,128], index: 13, kind: input, shape index: {}]   ;;  %s5091_s14 = inlined_call_operand.vmem [shape: f32[1,128], index: 14, kind: input, shape index: {}]   ;;  %s5092_s15 = inlined_call_operand.hbm [shape: f32[128,128], index: 15, kind: input, shape index: {}]   ;;  %s5093_s16 = inlined_call_operand.vmem [shape: f32[1,128], index: 16, kind: input, shape index: {}]   ;;  %s5094_s17 = inlined_call_operand.hbm [shape: f32[2,1,128], index: 17, kind: output, shape index: {}]  }
   0x1   :  { %5103 = sst [smem:[#allocation27_spill]] %s5077_s0 }
   0x2   :  { %5104 = sst [smem:[#allocation28_spill]] %s5078_s1 }
   0x3   :  { %5105 = sst [smem:[#allocation29_spill]] %s5082_s5 }
   0x4   :  { %5106 = sst [smem:[#allocation30_spill]] %s5094_s17 }
   0x5   :  { %22 = vsyncpa [#allocation4], 0 }
   0x6   :  { %23 = vsyncpa [#allocation7], 0 }
   0x7   :  { %24 = vsyncpa [#allocation10], 0 }
   0x8   :  { %25 = vsyncpa [#allocation13], 0 }
   0x9   :  { %26 = vsyncpa [#allocation5], 0 }
   0xa   :  { %28 = vsyncpa [#allocation5 + $0x1], 0  ;;  %s4749_s24 = smov 0   ;;  %s4751_s25 = smov 0  }
   0xb   :  { %s4753_s26 = smov 0   ;;  %s4755_s27 = smov 0  }
   0xc LB: > { %5107 = sst [smem:[#allocation21_spill]] %s4634_s24  ;;  %s4770_s28 = sadd.s32 4294967295, %s4646_s27   ;;  %s4646_s27 = sphi %s4755_s27, %s5133_s27   ;;  %s4642_s26 = sphi %s4753_s26, %s5138_s26   ;;  %s4638_s25 = sphi %s4751_s25, %s5137_s25   ;;  %s4634_s24 = sphi %s4749_s24, %s5136_s24  }
   0xd   : > { %5108 = sst [smem:[#allocation22_spill]] %s4642_s26  ;;  %s3073_s29 = sadd.s32 4294967294, %s4646_s27  }
   0xe   : > { %5109 = sst [smem:[#allocation23_spill]] %s4646_s27  ;;  %s4774_s0 = sadd.s32 1, %s4646_s27  }
   0xf   : > { %5110 = sst [smem:[#allocation24_spill]] %s4774_s0  ;;  %s403_s30 = sadd.s32 1, %s4642_s26 }
  0x10   : > { %s400_s18 = ssub.s32 %s4646_s27, %s4774_s0  ;;  %p413_p0 = scmp.ne.s32.totalorder %s4642_s26, %s4638_s25 }
  0x11   : > { %p401_p1 = scmp.eq.s32.totalorder %s400_s18, 0  ;;  %p414_p2 = scmp.eq.s32.totalorder %s4770_s28, 1 }
  0x12   : > { %p419_p3 = scmp.ne.s32.totalorder %s4638_s25, %s4634_s24  ;;  %p420_p4 = scmp.eq.s32.totalorder %s3073_s29, 1 }
  0x13   : > { %s4785_s19 = scalar_select %p401_p1, %s4642_s26, %s403_s30  }
  0x14   : > { %p4787_p5 = por %p414_p2, %p413_p0  ;;  %p4791_p6 = por %p420_p4, %p419_p3 }
  0x15   : > { %5111 = sst [smem:[#allocation25_spill]] %s4785_s19  ;;  %p3074_p7 = scmp.ge.s32.totalorder %s4646_s27, 1 }
  0x16   : > { %s5113_s20 = scalar_select %p4791_p6, 1, 0 }
  0x17   : > { %p427_p8 = scmp.lt.s32.totalorder %s4646_s27, 3  ;;  %p5102_p9 = scmp.eq.s32.totalorder %s4770_s28, 0 }
  0x18   : > { %5114 = sst [smem:[#allocation26_spill]] %s5113_s20  ;;  %s4648_s22 = smov [#allocation6]  }
  0x19   : > { %p4798_p10 = pnand %p3074_p7, %p427_p8  ;;  %s461_s23 = sshll.u32 %s4648_s22, 4  ;;  %s462_s23 = int_to_ptr.vmem [resolvable:$true] %s461_s23 }
  0x1a   : > { %s4649_s30 = smov [#allocation9]   ;;  %s4650_s19 = smov [#allocation12]  }
  0x1b   : > { %p4280_p11 = pneg %p4798_p10  ;;  %s493_s18 = sshll.u32 %s4649_s30, 4  ;;  %s494_s18 = int_to_ptr.vmem [resolvable:$true] %s493_s18 }
  0x1c   : > { %s525_s26 = sshll.u32 %s4650_s19, 4  ;;  %s4399_s20 = scalar_lea.vmem %s462_s23, 6144  ;;  %s526_s26 = int_to_ptr.vmem [resolvable:$true] %s525_s26 }
  0x1d   : > { %p4806_p12 = pnand %p5102_p9, %p4280_p11  ;;  %p4400_p0 = scmp.ne.s32.totalorder %s462_s23, %s4399_s20 }
  0x1e   : > { %p4407_p3 = scmp.lt.s32.totalorder %s462_s23, %s462_s23  ;;  %p4408_p4 = scmp.lt.s32.totalorder %s4399_s20, %s4399_s20 }
  0x1f   : > { %p4812_p13 = pneg %p4806_p12 }
  0x20   : > { %p4409_p7 = por %p4408_p4, %p4407_p3 }
  0x21   : > { %p4402_p1 = pnand %p4400_p0, %p4812_p13 }
  0x23   : > { %p4403_p2 = pneg %p4402_p1 }
  0x25   : > { %p4410_p8 = pnand %p4409_p7, %p4403_p2 }
  0x27   : > { %4413 = shalt.err (!%p4410_p8)
}
  0x28   : > { %s4651_s22 = smov 128   ;;  %s4652_s19 = smov 8  }
  0x29   : > { %s5118_s5 = sld [smem:[#allocation29_spill]]  ;;  %s4425_s27 = scalar_lea.vmem %s494_s18, 6144 }
  0x2a   : > { %p4426_p11 = scmp.ne.s32.totalorder %s494_s18, %s4425_s27  ;;  %p4433_p3 = scmp.lt.s32.totalorder %s494_s18, %s494_s18 }
  0x2b   : > { %p4434_p2 = scmp.lt.s32.totalorder %s4425_s27, %s4425_s27 }
  0x2c   : > { %p4428_p0 = pnand %p4426_p11, %p4812_p13 }
  0x2d   : > { %p4435_p4 = por %p4434_p2, %p4433_p3 }
  0x2e   : > { %p4429_p1 = pneg %p4428_p0 }
  0x2f   : > { %4286 = dma.hbm_to_vmem [thread:$0]  (!%p4806_p12), %s5118_s5, 6144, %s462_s23, [#allocation7], %s4651_s22, %s4651_s22, %s4652_s19  }
  0x30   : > { %p4436_p7 = pnand %p4435_p4, %p4429_p1 }
  0x32   : > { %4439 = shalt.err (!%p4436_p7)
}
  0x33   : > { %4292 = dma.hbm_to_vmem [thread:$0]  (!%p4806_p12), %s5086_s9, 6144, %s494_s18, [#allocation10], %s4651_s22, %s4651_s22, %s4652_s19  }
  0x34   : > { %s4451_s24 = scalar_lea.vmem %s526_s26, 6144  ;;  %p4459_p9 = scmp.lt.s32.totalorder %s526_s26, %s526_s26 }
  0x35   : > { %p4452_p8 = scmp.ne.s32.totalorder %s526_s26, %s4451_s24  ;;  %p4460_p3 = scmp.lt.s32.totalorder %s4451_s24, %s4451_s24 }
  0x37   : > { %p4454_p11 = pnand %p4452_p8, %p4812_p13  ;;  %p4461_p1 = por %p4460_p3, %p4459_p9 }
  0x39   : > { %p4455_p0 = pneg %p4454_p11 }
  0x3b   : > { %p4462_p2 = pnand %p4461_p1, %p4455_p0 }
  0x3d   : > { %4465 = shalt.err (!%p4462_p2)
}
  0x3e   : > { %4298 = dma.hbm_to_vmem [thread:$0]  (!%p4806_p12), %s5090_s13, 6144, %s526_s26, [#allocation13], %s4651_s22, %s4651_s22, %s4652_s19  }
  0x3f   : > { %s4653_s23 = smov [#allocation3]   ;;  %s4654_s30 = smov [#allocation8]  }
  0x40   : > { %s445_s18 = sshll.u32 %s4653_s23, 4  ;;  %s477_s20 = sshll.u32 %s4654_s30, 4  ;;  %s446_s18 = int_to_ptr.vmem [resolvable:$true] %s445_s18  ;;  %s478_s20 = int_to_ptr.vmem [resolvable:$true] %s477_s20 }
  0x41   : > { %s4477_s5 = scalar_lea.vmem %s446_s18, 6144  ;;  %p4485_p8 = scmp.lt.s32.totalorder %s446_s18, %s446_s18 }
  0x42   : > { %p4478_p4 = scmp.ne.s32.totalorder %s446_s18, %s4477_s5  ;;  %p4486_p11 = scmp.lt.s32.totalorder %s4477_s5, %s4477_s5 }
  0x44   : > { %p4480_p9 = pnand %p4478_p4, %p4812_p13  ;;  %p4487_p0 = por %p4486_p11, %p4485_p8 }
  0x46   : > { %p4481_p7 = pneg %p4480_p9 }
  0x48   : > { %p4488_p3 = pnand %p4487_p0, %p4481_p7 }
  0x4a   : > { %4491 = shalt.err (!%p4488_p3)
}
  0x4b   : > { %4283 = dma.hbm_to_vmem [thread:$0]  (!%p4806_p12), %s5080_s3, 6144, %s446_s18, [#allocation4], %s4651_s22, %s4651_s22, %s4652_s19  }
  0x4c   : > { %s4503_s27 = scalar_lea.vmem %s478_s20, 6144  ;;  %p4511_p9 = scmp.lt.s32.totalorder %s478_s20, %s478_s20 }
  0x4d   : > { %p4504_p1 = scmp.ne.s32.totalorder %s478_s20, %s4503_s27  ;;  %p4512_p8 = scmp.lt.s32.totalorder %s4503_s27, %s4503_s27 }
  0x4f   : > { %p4506_p2 = pnand %p4504_p1, %p4812_p13  ;;  %p4513_p7 = por %p4512_p8, %p4511_p9 }
  0x51   : > { %p4507_p4 = pneg %p4506_p2 }
  0x53   : > { %p4514_p11 = pnand %p4513_p7, %p4507_p4 }
  0x55   : > { %4517 = shalt.err (!%p4514_p11)
}
  0x56   : > { %4289 = dma.hbm_to_vmem [thread:$0]  (!%p4806_p12), %s5084_s7, 6144, %s478_s20, [#allocation7], %s4651_s22, %s4651_s22, %s4652_s19  }
  0x57   : > { %s4655_s23 = smov [#allocation11]   ;;  %s4656_s30 = smov [#allocation14]  }
  0x58   : > { %s509_s18 = sshll.u32 %s4655_s23, 4  ;;  %s541_s26 = sshll.u32 %s4656_s30, 4  ;;  %s510_s18 = int_to_ptr.vmem [resolvable:$true] %s509_s18  ;;  %s542_s26 = int_to_ptr.vmem [resolvable:$true] %s541_s26 }
  0x59   : > { %s4529_s24 = scalar_lea.vmem %s510_s18, 6144  ;;  %p4537_p2 = scmp.lt.s32.totalorder %s510_s18, %s510_s18 }
  0x5a   : > { %p4530_p0 = scmp.ne.s32.totalorder %s510_s18, %s4529_s24  ;;  %p4538_p4 = scmp.lt.s32.totalorder %s4529_s24, %s4529_s24 }
  0x5c   : > { %p4532_p3 = pnand %p4530_p0, %p4812_p13  ;;  %p4539_p9 = por %p4538_p4, %p4537_p2 }
  0x5e   : > { %p4533_p1 = pneg %p4532_p3 }
  0x60   : > { %p4540_p8 = pnand %p4539_p9, %p4533_p1 }
  0x62   : > { %4543 = shalt.err (!%p4540_p8)
}
  0x63   : > { %4295 = dma.hbm_to_vmem [thread:$0]  (!%p4806_p12), %s5088_s11, 6144, %s510_s18, [#allocation10], %s4651_s22, %s4651_s22, %s4652_s19  }
  0x64   : > { %s4555_s5 = scalar_lea.vmem %s542_s26, 2048  ;;  %p4563_p3 = scmp.lt.s32.totalorder %s542_s26, %s542_s26 }
  0x65   : > { %p4556_p7 = scmp.ne.s32.totalorder %s542_s26, %s4555_s5  ;;  %p4564_p2 = scmp.lt.s32.totalorder %s4555_s5, %s4555_s5 }
  0x67   : > { %p4558_p11 = pnand %p4556_p7, %p4812_p13  ;;  %p4565_p1 = por %p4564_p2, %p4563_p3 }
  0x69   : > { %p4559_p0 = pneg %p4558_p11 }
  0x6b   : > { %p4566_p4 = pnand %p4565_p1, %p4559_p0 }
  0x6d   : > { %4569 = shalt.err (!%p4566_p4)
}
  0x6e   : > { %4301 = dma.hbm_to_vmem [thread:$0]  (!%p4806_p12), %s5092_s15, 2048, %s542_s26, [#allocation13], %s4651_s22, %s4651_s22, %s4652_s19  }
  0x6f   : > { %568 = sbr.rel (%p4798_p10) target bundleno = 1908 (0x774), region = 88  ;;  %p5119_p13 = scmp.eq.s32.totalorder (!%p4798_p10), %s4770_s28, 0 }
  0x74   : > { %4613 = dma.done.wait (%p5119_p13), [#allocation4], 6144   ;;  %p5120_p9 = pmov %p5119_p13 }
  0x76   : > { %4615 = vsyncadd (%p5120_p9), [#allocation4], 4294961152  ;;  %p5121_p8 = pmov %p5120_p9 }
  0x78   : > { %4617 = dma.done.wait (%p5121_p8), [#allocation7], 12288   ;;  %p5122_p7 = pmov %p5121_p8 }
  0x7a   : > { %4619 = vsyncadd (%p5122_p7), [#allocation7], 4294955008  ;;  %p5123_p11 = pmov %p5122_p7 }
  0x7b   : > { %p5124_p12 = pmov %p5122_p7 }
  0x7c   : > { %4621 = dma.done.wait (%p5123_p11), [#allocation10], 12288  }
  0x7d   : > { %4623 = vsyncadd (%p5124_p12), [#allocation10], 4294955008  ;;  %p5125_p10 = pmov %p5122_p7 }
  0x7e   : > { %p5126_p0 = pmov %p5122_p7 }
  0x7f   : > { %4625 = dma.done.wait (%p5125_p10), [#allocation13], 8192  }
  0x80   : > { %4627 = vsyncadd (%p5126_p0), [#allocation13], 4294959104  ;;  %p643_p3 = scmp.lt.s32.totalorder %s4770_s28, 1  ;;  %vm669_vm0 = vcmask 1043456   ;;  %s5127_s19 = sld [smem:[#allocation27_spill]]  ;;  %vm662_vm1 = vcmask 31744  }
  0x81   : > { %s5128_s24 = sld [smem:[#allocation28_spill]]  ;;  %v814_v3 = vld [vmem:[#allocation3 + $0xf8] sm:$0xff]  ;;  %v813_v4 = vld [vmem:[#allocation3 + $0xf0] sm:$0xff]  ;;  %v812_v5 = vld [vmem:[#allocation3 + $0xe8] sm:$0xff]  ;;  %v4657_v31 = vmov 0.0   ;;  %s641_s26 = sand.u32 1, %s4638_s25  }
  0x82   : > { %s644_s0 = scalar_select %p643_p3, %s4770_s28, 1  ;;  %3496 = vmatprep.subr.mxu1 %v814_v3  ;;  %v811_v6 = vld [vmem:[#allocation3 + $0xe0] sm:$0xff]  ;;  %v810_v7 = vld [vmem:[#allocation3 + $0xd8] sm:$0xff]  ;;  %v809_v9 = vld [vmem:[#allocation3 + $0xd0] sm:$0xff]  ;;  %650 = vst [vmem:[#allocation2 + $0x8] sm:$0xff] %v4657_v31  ;;  %3528 = vmatprep.mubr.f32.mxu1 %v4657_v31 }
  0x83   : > { %3497 = vmatpush3.msra.mxu1 %v814_v3  ;;  %v793_v8 = vld [vmem:[#allocation3 + $0x78] sm:$0xff]  ;;  %v792_v10 = vld [vmem:[#allocation3 + $0x70] sm:$0xff]  ;;  %v808_v11 = vld [vmem:[#allocation3 + $0xc8] sm:$0xff]  ;;  %648 = vst [vmem:[#allocation2] sm:$0xff] %v4657_v31  ;;  %s3104_s17 = sshll.u32 %s4770_s28, 4  ;;  %s642_s23 = scalar_lea.vmem [#allocation15], %s641_s26 }
  0x84   : > { %s3107_s21 = sshll.u32 %s644_s0, 4  ;;  %3498 = vmatprep.subr.mxu1 %v813_v4  ;;  %v791_v12 = vld [vmem:[#allocation3 + $0x68] sm:$0xff]  ;;  %v807_v13 = vld [vmem:[#allocation3 + $0xc0] sm:$0xff]  ;;  %v806_v15 = vld [vmem:[#allocation3 + $0xb8] sm:$0xff]  ;;  %649 = vst [vmem:[#allocation2 + $0x28] sm:$0xff] %v4657_v31  ;;  %s2949_s0 = sshll.u32 %s642_s23, 4  ;;  %s2950_s0 = int_to_ptr.vmem [resolvable:$true] %s2949_s0 }
  0x85   : > { %3499 = vmatpush3.msra.mxu1 %v813_v4  ;;  %v790_v14 = vld [vmem:[#allocation3 + $0x60] sm:$0xff]  ;;  %v789_v16 = vld [vmem:[#allocation3 + $0x58] sm:$0xff]  ;;  %v805_v17 = vld [vmem:[#allocation3 + $0xb0] sm:$0xff]  ;;  %651 = vst [vmem:[#allocation2 + $0x20] sm:$0xff] %v4657_v31  ;;  %s5129_s22 = sld [smem:[#allocation30_spill]]  ;;  %s4570_s30 = scalar_lea.vmem %s2950_s0, 16 }
  0x86   : > { %s647_s18 = scalar_lea.vmem %s5127_s19, %s3107_s21  ;;  %3500 = vmatprep.subr.mxu1 %v812_v5  ;;  %v788_v18 = vld [vmem:[#allocation3 + $0x50] sm:$0xff]  ;;  %v804_v19 = vld [vmem:[#allocation3 + $0xa8] sm:$0xff]  ;;  %v803_v21 = vld [vmem:[#allocation3 + $0xa0] sm:$0xff]  ;;  %p4571_p2 = scmp.ne.s32.totalorder %s2950_s0, %s4570_s30 }
  0x87   : > { %v654_v0 = vld [vmem:[%s5128_s24] sm:$0xf]  ;;  %v653_v2 = vld [vmem:[%s647_s18 + $0x8] sm:$0xff]  ;;  %3501 = vmatpush3.msra.mxu1 %v812_v5  ;;  %v787_v20 = vld [vmem:[#allocation3 + $0x48] sm:$0xff]  ;;  %s4658_s28 = smov [#allocation15]  }
  0x88   : > { %v652_v1 = vld [vmem:[%s647_s18] sm:$0xff]  ;;  %3491 = vmatprep.subr.msk.mxu0 %vm669_vm0, %v654_v0  ;;  %3502 = vmatprep.subr.mxu1 %v811_v6  ;;  %v786_v22 = vld [vmem:[#allocation3 + $0x40] sm:$0xff]  ;;  %v802_v23 = vld [vmem:[#allocation3 + $0x98] sm:$0xff]  ;;  %s2937_s18 = scalar_lea.sflag [#allocation5], %s641_s26  ;;  %p4572_p1 = pnand %p4571_p2, %p4787_p5 }
  0x89   : > { %3493 = vmatprep.mubr.msk.f32.mxu0 %vm662_vm1, %v652_v1  ;;  %3492 = vmatpush3.msk.msra.mxu0 %vm669_vm0, %v654_v0  ;;  %v785_v24 = vld [vmem:[#allocation3 + $0x38] sm:$0xff]  ;;  %v801_v25 = vld [vmem:[#allocation3 + $0x90] sm:$0xff]  ;;  %v800_v27 = vld [vmem:[#allocation3 + $0x88] sm:$0xff]  ;;  %s4574_s24 = sshll.u32 %s4658_s28, 4  ;;  %s4575_s24 = int_to_ptr.vmem [resolvable:$false] %s4574_s24 }
  0x8a   : > { %3494 = vmatmul.mubr.msk.f32.vlgmr.msra.gmra.mxu0 %vm662_vm1, %v653_v2  ;;  %3503 = vmatpush3.msra.mxu1 %v811_v6  ;;  %v784_v26 = vld [vmem:[#allocation3 + $0x30] sm:$0xff]  ;;  %v783_v28 = vld [vmem:[#allocation3 + $0x28] sm:$0xff]  ;;  %v799_v29 = vld [vmem:[#allocation3 + $0x80] sm:$0xff]  ;;  %p4573_p4 = pneg %p4572_p1  ;;  %s4576_s20 = scalar_lea.vmem %s4575_s24, 32 }
  0x8b   : > { %3504 = vmatprep.subr.mxu1 %v810_v7  ;;  %3534 = vmatprep.subr.mxu0 %v793_v8  ;;  %v782_v30 = vld [vmem:[#allocation3 + $0x20] sm:$0xff]  ;;  %v1001_v32 = vld [vmem:[#allocation3 + $0x178] sm:$0xff]  ;;  %v780_v34 = vld [vmem:[#allocation3 + $0x10] sm:$0xff]  ;;  %s2947_s19 = scalar_lea.hbm %s5129_s22, %s3104_s17  ;;  %p4577_p13 = scmp.lt.s32.totalorder %s2950_s0, %s4575_s24 }
  0x8c   : > { %3505 = vmatpush3.msra.mxu1 %v810_v7  ;;  %3535 = vmatpush3.msra.mxu0 %v793_v8  ;;  %v781_v33 = vld [vmem:[#allocation3 + $0x18] sm:$0xff]  ;;  %v779_v35 = vld [vmem:[#allocation3 + $0x8] sm:$0xff]  ;;  %v778_v36 = vld [vmem:[#allocation3] sm:$0xff]  ;;  %p4578_p9 = scmp.lt.s32.totalorder %s4576_s20, %s4570_s30 }
  0x8d   : > { %3506 = vmatprep.subr.mxu1 %v809_v9  ;;  %3536 = vmatprep.subr.mxu0 %v792_v10  ;;  %v4917_v37 = vld [vmem:[#allocation2 + $0x7] sm:$0xff]  ;;  %v3093_v38 = vld [vmem:[%s5079_s2] ss:$0 sm:$0xff]  ;;  %v999_v62 = vld [vmem:[#allocation3 + $0x168] sm:$0xff] }
  0x8e   : > { %3507 = vmatpush3.msra.mxu1 %v809_v9  ;;  %3537 = vmatpush3.msra.mxu0 %v792_v10  ;;  %v1000_v61 = vld [vmem:[#allocation3 + $0x170] sm:$0xff]  ;;  %v998_v63 = vld [vmem:[#allocation3 + $0x160] sm:$0xff]  ;;  %v997_v0 = vld [vmem:[#allocation3 + $0x158] sm:$0xff]  ;;  %p4579_p8 = por %p4578_p9, %p4577_p13 }
  0x8f   : > { %3508 = vmatprep.subr.mxu1 %v808_v11  ;;  %3538 = vmatprep.subr.mxu0 %v791_v12  ;;  %v996_v4 = vld [vmem:[#allocation3 + $0x150] sm:$0xff]  ;;  %v995_v5 = vld [vmem:[#allocation3 + $0x148] sm:$0xff]  ;;  %v994_v7 = vld [vmem:[#allocation3 + $0x140] sm:$0xff] }
  0x90   : > { %3509 = vmatpush3.msra.mxu1 %v808_v11  ;;  %3539 = vmatpush3.msra.mxu0 %v791_v12  ;;  %v993_v8 = vld [vmem:[#allocation3 + $0x138] sm:$0xff]  ;;  %v992_v9 = vld [vmem:[#allocation3 + $0x130] sm:$0xff]  ;;  %v991_v10 = vld [vmem:[#allocation3 + $0x128] sm:$0xff]  ;;  %p4580_p7 = pnand %p4579_p8, %p4573_p4 }
  0x91   : > { %3510 = vmatprep.subr.mxu1 %v807_v13  ;;  %3540 = vmatprep.subr.mxu0 %v790_v14  ;;  %v990_v11 = vld [vmem:[#allocation3 + $0x120] sm:$0xff]  ;;  %v989_v12 = vld [vmem:[#allocation3 + $0x118] sm:$0xff] }
  0x92   : > { %3511 = vmatpush3.msra.mxu1 %v807_v13  ;;  %3541 = vmatpush3.msra.mxu0 %v790_v14  ;;  %v988_v13 = vld [vmem:[#allocation3 + $0x110] sm:$0xff]  ;;  %v987_v14 = vld [vmem:[#allocation3 + $0x108] sm:$0xff] }
  0x93   : > { %3512 = vmatprep.subr.mxu1 %v806_v15  ;;  %3542 = vmatprep.subr.mxu0 %v789_v16 }
  0x94   : > { %3513 = vmatpush3.msra.mxu1 %v806_v15  ;;  %3543 = vmatpush3.msra.mxu0 %v789_v16  ;;  %v986_v15 = vld [vmem:[#allocation3 + $0x100] sm:$0xff] }
  0x95   : > { %3514 = vmatprep.subr.mxu1 %v805_v17  ;;  %3544 = vmatprep.subr.mxu0 %v788_v18 }
  0x96   : > { %3515 = vmatpush3.msra.mxu1 %v805_v17  ;;  %3545 = vmatpush3.msra.mxu0 %v788_v18  ;;  %v4939_v18 = vld [vmem:[#allocation2 + $0x21] sm:$0xff] }
  0x97   : > { %3516 = vmatprep.subr.mxu1 %v804_v19  ;;  %3546 = vmatprep.subr.mxu0 %v787_v20 }
  0x98   : > { %3517 = vmatpush3.msra.mxu1 %v804_v19  ;;  %3547 = vmatpush3.msra.mxu0 %v787_v20  ;;  %v1156_v19 = vld [vmem:[#allocation6 + $0xf8] sm:$0xff]  ;;  %v1155_v20 = vld [vmem:[#allocation6 + $0xf0] sm:$0xff] }
  0x99   : > { %3518 = vmatprep.subr.mxu1 %v803_v21  ;;  %3548 = vmatprep.subr.mxu0 %v786_v22 }
  0x9a   : > { %3519 = vmatpush3.msra.mxu1 %v803_v21  ;;  %3549 = vmatpush3.msra.mxu0 %v786_v22  ;;  %v1154_v21 = vld [vmem:[#allocation6 + $0xe8] sm:$0xff]  ;;  %v1153_v22 = vld [vmem:[#allocation6 + $0xe0] sm:$0xff] }
  0x9b   : > { %3520 = vmatprep.subr.mxu1 %v802_v23  ;;  %3550 = vmatprep.subr.mxu0 %v785_v24 }
  0x9c   : > { %3521 = vmatpush3.msra.mxu1 %v802_v23  ;;  %3551 = vmatpush3.msra.mxu0 %v785_v24  ;;  %v1152_v23 = vld [vmem:[#allocation6 + $0xd8] sm:$0xff] }
  0x9d   : > { %3522 = vmatprep.subr.mxu1 %v801_v25  ;;  %3552 = vmatprep.subr.mxu0 %v784_v26  ;;  %v1135_v24 = vld [vmem:[#allocation6 + $0x78] sm:$0xff] }
  0x9e   : > { %3523 = vmatpush3.msra.mxu1 %v801_v25  ;;  %3553 = vmatpush3.msra.mxu0 %v784_v26  ;;  %v1151_v25 = vld [vmem:[#allocation6 + $0xd0] sm:$0xff] }
  0x9f   : > { %3524 = vmatprep.subr.mxu1 %v800_v27  ;;  %3554 = vmatprep.subr.mxu0 %v783_v28  ;;  %v1134_v26 = vld [vmem:[#allocation6 + $0x70] sm:$0xff] }
  0xa0   : > { %3525 = vmatpush3.msra.mxu1 %v800_v27  ;;  %3555 = vmatpush3.msra.mxu0 %v783_v28  ;;  %v1150_v27 = vld [vmem:[#allocation6 + $0xc8] sm:$0xff] }
  0xa1   : > { %3526 = vmatprep.subr.mxu1 %v799_v29  ;;  %3556 = vmatprep.subr.mxu0 %v782_v30  ;;  %v1133_v28 = vld [vmem:[#allocation6 + $0x68] sm:$0xff] }
  0xa2   : > { %3527 = vmatpush3.msra.mxu1 %v799_v29  ;;  %3557 = vmatpush3.msra.mxu0 %v782_v30  ;;  %v1149_v29 = vld [vmem:[#allocation6 + $0xc0] sm:$0xff] }
  0xa3   : > { %3558 = vmatprep.subr.mxu0 %v781_v33  ;;  %3572 = vmatprep.subr.mxu1 %v1001_v32  ;;  %v1132_v30 = vld [vmem:[#allocation6 + $0x60] sm:$0xff] }
  0xa4   : > { %3559 = vmatpush3.msra.mxu0 %v781_v33  ;;  %3566 = vmatprep.mubr.f32.mxu0 %v4917_v37  ;;  %v1131_v33 = vld [vmem:[#allocation6 + $0x58] sm:$0xff] }
  0xa5   : > { %3560 = vmatprep.subr.mxu0 %v780_v34 }
  0xa6   : > { %3561 = vmatpush3.msra.mxu0 %v780_v34  ;;  %v1147_v34 = vld [vmem:[#allocation6 + $0xb0] sm:$0xff] }
  0xa7   : > { %3562 = vmatprep.subr.mxu0 %v779_v35 }
  0xa8   : > { %3563 = vmatpush3.msra.mxu0 %v779_v35  ;;  %v1130_v35 = vld [vmem:[#allocation6 + $0x50] sm:$0xff] }
  0xa9   : > { %3564 = vmatprep.subr.mxu0 %v778_v36 }
  0xaa   : > { %3565 = vmatpush3.msra.mxu0 %v778_v36  ;;  %v1146_v36 = vld [vmem:[#allocation6 + $0xa8] sm:$0xff] }
  0xab   : > { %3610 = vmatprep.subr.mxu0 %v1156_v19 }
 0x14a   : > { %v3495_v39 = vpop.f32.mrf.mxu0 }
 0x14b   : > { %v4923_v40 = vadd.f32 %v3495_v39, %v3093_v38  ;;  %v1128_v39 = vld [vmem:[#allocation6 + $0x40] sm:$0xff] }
 0x14c   : > { %v739_v41 = vpop.f32.mrf.mxu0 }
 0x14d   : > { %v757_v42 = vmul.f32 0.044715, %v4923_v40  ;;  %v4926_v43 = vadd.f32 %v3093_v38, %v739_v41  ;;  %v755_v54 = vmul.f32 0.5, %v4923_v40  ;;  %v1145_v38 = vld [vmem:[#allocation6 + $0xa0] sm:$0xff]  ;;  %v1144_v41 = vld [vmem:[#allocation6 + $0x98] sm:$0xff] }
 0x14f   : > { %v759_v44 = vmul.f32 %v757_v42, %v4923_v40  ;;  %v756_v45 = vmul.f32 0.044715, %v4926_v43  ;;  %v754_v58 = vmul.f32 0.5, %v4926_v43  ;;  %v1127_v42 = vld [vmem:[#allocation6 + $0x38] sm:$0xff] }
 0x151   : > { %v761_v46 = vmul.f32 %v759_v44, %v4923_v40  ;;  %v758_v47 = vmul.f32 %v756_v45, %v4926_v43  ;;  %v1143_v44 = vld [vmem:[#allocation6 + $0x90] sm:$0xff] }
 0x152   : > { %v1126_v45 = vld [vmem:[#allocation6 + $0x30] sm:$0xff] }
 0x153   : > { %v763_v48 = vadd.f32 %v761_v46, %v4923_v40  ;;  %v760_v49 = vmul.f32 %v758_v47, %v4926_v43  ;;  %v1142_v46 = vld [vmem:[#allocation6 + $0x88] sm:$0xff] }
 0x154   : > { %v1125_v47 = vld [vmem:[#allocation6 + $0x28] sm:$0xff] }
 0x155   : > { %v765_v50 = vmul.f32 0.7978846, %v763_v48  ;;  %v762_v51 = vadd.f32 %v760_v49, %v4926_v43  ;;  %v1141_v48 = vld [vmem:[#allocation6 + $0x80] sm:$0xff] }
 0x156   : > { %v1124_v49 = vld [vmem:[#allocation6 + $0x20] sm:$0xff] }
 0x157   : > { %4363 = vtanh.f32 %v765_v50  ;;  %v764_v52 = vmul.f32 0.7978846, %v762_v51  ;;  %v1347_v50 = vld [vmem:[#allocation6 + $0x178] sm:$0xff] }
 0x158   : > { %v1123_v51 = vld [vmem:[#allocation6 + $0x18] sm:$0xff] }
 0x159   : > { %4365 = vtanh.f32 %v764_v52  ;;  %v1122_v52 = vld [vmem:[#allocation6 + $0x10] sm:$0xff] }
 0x164   : > { %v4364_v53 = vpop.eup %4363 }
 0x165   : > { %v769_v55 = vadd.f32 1.0, %v4364_v53  ;;  %v1121_v53 = vld [vmem:[#allocation6 + $0x8] sm:$0xff] }
 0x166   : > { %v4366_v56 = vpop.eup %4365 }
 0x167   : > { %v771_v57 = vmul.f32 %v769_v55, %v755_v54  ;;  %v768_v59 = vadd.f32 1.0, %v4366_v56  ;;  %v1120_v54 = vld [vmem:[#allocation6] sm:$0xff] }
 0x169   : > { %773 = vst [vmem:[#allocation2 + $0x18] sm:$0xff] %v771_v57  ;;  %v770_v60 = vmul.f32 %v768_v59, %v754_v58 }
 0x16b   : > { %772 = vst [vmem:[#allocation2 + $0x10] sm:$0xff] %v770_v60  ;;  %3529 = vmatmul.mubr.f32.vlgmr.msra.gmra.mxu1 %v770_v60 }
 0x16c   : > { %3573 = vmatpush3.msra.mxu1 %v1001_v32  ;;  %3531 = vmatprep.mubr.f32.mxu1 %v771_v57  ;;  %v1148_v32 = vld [vmem:[#allocation6 + $0xb8] sm:$0xff] }
 0x16d   : > { %3574 = vmatprep.subr.mxu1 %v1000_v61 }
 0x16e   : > { %3575 = vmatpush3.msra.mxu1 %v1000_v61 }
 0x16f   : > { %3576 = vmatprep.subr.mxu1 %v999_v62  ;;  %3532 = vmatmul.mubr.f32.gmra.mxu1 %v4657_v31 }
 0x170   : > { %3577 = vmatpush3.msra.mxu1 %v999_v62  ;;  %v777_v6 = vld [vmem:[#allocation2 + $0x1f] sm:$0xff] }
 0x171   : > { %3578 = vmatprep.subr.mxu1 %v998_v63  ;;  %v983_v17 = vld [vmem:[#allocation2 + $0x19] sm:$0xff] }
 0x172   : > { %v775_v1 = vld [vmem:[#allocation2 + $0xf] sm:$0xff]  ;;  %v776_v2 = vld [vmem:[#allocation2 + $0x17] sm:$0xff]  ;;  %3579 = vmatpush3.msra.mxu1 %v998_v63 }
 0x173   : > { %v981_v3 = vld [vmem:[#allocation2 + $0x9] sm:$0xff]  ;;  %3567 = vmatmul.mubr.f32.vlgmr.msra.gmra.mxu0 %v775_v1  ;;  %3580 = vmatprep.subr.mxu1 %v997_v0  ;;  %v982_v16 = vld [vmem:[#allocation2 + $0x11] sm:$0xff] }
 0x174   : > { %3604 = vmatprep.mubr.f32.mxu1 %v981_v3  ;;  %3569 = vmatprep.mubr.f32.mxu0 %v776_v2 }
 0x175   : > { %3581 = vmatpush3.msra.mxu1 %v997_v0  ;;  %3611 = vmatpush3.msra.mxu0 %v1156_v19  ;;  %v3097_v0 = vld [vmem:[%s5081_s4] ss:$0 sm:$0xff] }
 0x176   : > { %3582 = vmatprep.subr.mxu1 %v996_v4  ;;  %3612 = vmatprep.subr.mxu0 %v1155_v20 }
 0x177   : > { %3570 = vmatmul.mubr.f32.gmra.mxu0 %v777_v6  ;;  %3583 = vmatpush3.msra.mxu1 %v996_v4 }
 0x178   : > { %3584 = vmatprep.subr.mxu1 %v995_v5  ;;  %3642 = vmatprep.mubr.f32.mxu0 %v4657_v31 }
 0x179   : > { %3585 = vmatpush3.msra.mxu1 %v995_v5  ;;  %3613 = vmatpush3.msra.mxu0 %v1155_v20 }
 0x17a   : > { %3586 = vmatprep.subr.mxu1 %v994_v7  ;;  %3614 = vmatprep.subr.mxu0 %v1154_v21 }
 0x17b   : > { %3587 = vmatpush3.msra.mxu1 %v994_v7  ;;  %3615 = vmatpush3.msra.mxu0 %v1154_v21 }
 0x17c   : > { %3588 = vmatprep.subr.mxu1 %v993_v8  ;;  %3616 = vmatprep.subr.mxu0 %v1153_v22 }
 0x17d   : > { %3589 = vmatpush3.msra.mxu1 %v993_v8  ;;  %3617 = vmatpush3.msra.mxu0 %v1153_v22 }
 0x17e   : > { %3590 = vmatprep.subr.mxu1 %v992_v9  ;;  %3618 = vmatprep.subr.mxu0 %v1152_v23 }
 0x17f   : > { %3591 = vmatpush3.msra.mxu1 %v992_v9  ;;  %3619 = vmatpush3.msra.mxu0 %v1152_v23 }
 0x180   : > { %3592 = vmatprep.subr.mxu1 %v991_v10  ;;  %3620 = vmatprep.subr.mxu0 %v1151_v25 }
 0x181   : > { %3593 = vmatpush3.msra.mxu1 %v991_v10  ;;  %3621 = vmatpush3.msra.mxu0 %v1151_v25  ;;  %v1346_v25 = vld [vmem:[#allocation6 + $0x170] sm:$0xff] }
 0x182   : > { %3594 = vmatprep.subr.mxu1 %v990_v11  ;;  %3622 = vmatprep.subr.mxu0 %v1150_v27 }
 0x183   : > { %3595 = vmatpush3.msra.mxu1 %v990_v11  ;;  %3623 = vmatpush3.msra.mxu0 %v1150_v27  ;;  %v1345_v27 = vld [vmem:[#allocation6 + $0x168] sm:$0xff] }
 0x184   : > { %3596 = vmatprep.subr.mxu1 %v989_v12  ;;  %3624 = vmatprep.subr.mxu0 %v1149_v29 }
 0x185   : > { %3597 = vmatpush3.msra.mxu1 %v989_v12  ;;  %3625 = vmatpush3.msra.mxu0 %v1149_v29 }
 0x186   : > { %3598 = vmatprep.subr.mxu1 %v988_v13  ;;  %3626 = vmatprep.subr.mxu0 %v1148_v32 }
 0x187   : > { %3599 = vmatpush3.msra.mxu1 %v988_v13  ;;  %3627 = vmatpush3.msra.mxu0 %v1148_v32 }
 0x188   : > { %3600 = vmatprep.subr.mxu1 %v987_v14  ;;  %3628 = vmatprep.subr.mxu0 %v1147_v34 }
 0x189   : > { %3601 = vmatpush3.msra.mxu1 %v987_v14  ;;  %3629 = vmatpush3.msra.mxu0 %v1147_v34 }
 0x18a   : > { %3602 = vmatprep.subr.mxu1 %v986_v15  ;;  %3630 = vmatprep.subr.mxu0 %v1146_v36 }
 0x18b   : > { %3603 = vmatpush3.msra.mxu1 %v986_v15  ;;  %3631 = vmatpush3.msra.mxu0 %v1146_v36  ;;  %v1342_v36 = vld [vmem:[#allocation6 + $0x150] sm:$0xff] }
 0x18c   : > { %3605 = vmatmul.mubr.f32.vlgmr.msra.gmra.mxu1 %v982_v16  ;;  %3648 = vmatprep.subr.mxu1 %v1135_v24 }
 0x18d   : > { %3607 = vmatprep.mubr.f32.mxu1 %v983_v17  ;;  %3649 = vmatpush3.msra.mxu1 %v1135_v24 }
 0x18e   : > { %3650 = vmatprep.subr.mxu1 %v1134_v26  ;;  %3632 = vmatprep.subr.mxu0 %v1145_v38 }
 0x18f   : > { %3651 = vmatpush3.msra.mxu1 %v1134_v26  ;;  %3633 = vmatpush3.msra.mxu0 %v1145_v38  ;;  %v1340_v38 = vld [vmem:[#allocation6 + $0x140] sm:$0xff] }
 0x190   : > { %3608 = vmatmul.mubr.f32.gmra.mxu1 %v4939_v18  ;;  %3652 = vmatprep.subr.mxu1 %v1133_v28 }
 0x191   : > { %3680 = vmatprep.mubr.f32.mxu1 %v4917_v37  ;;  %3653 = vmatpush3.msra.mxu1 %v1133_v28  ;;  %v1129_v37 = vld [vmem:[#allocation6 + $0x48] sm:$0xff] }
 0x192   : > { %3654 = vmatprep.subr.mxu1 %v1132_v30  ;;  %3634 = vmatprep.subr.mxu0 %v1144_v41 }
 0x193   : > { %3655 = vmatpush3.msra.mxu1 %v1132_v30  ;;  %3635 = vmatpush3.msra.mxu0 %v1144_v41  ;;  %v1344_v30 = vld [vmem:[#allocation6 + $0x160] sm:$0xff] }
 0x194   : > { %3656 = vmatprep.subr.mxu1 %v1131_v33  ;;  %3636 = vmatprep.subr.mxu0 %v1143_v44 }
 0x195   : > { %3657 = vmatpush3.msra.mxu1 %v1131_v33  ;;  %3637 = vmatpush3.msra.mxu0 %v1143_v44  ;;  %v1343_v33 = vld [vmem:[#allocation6 + $0x158] sm:$0xff]  ;;  %v1338_v44 = vld [vmem:[#allocation6 + $0x130] sm:$0xff] }
 0x196   : > { %3658 = vmatprep.subr.mxu1 %v1130_v35  ;;  %3638 = vmatprep.subr.mxu0 %v1142_v46 }
 0x197   : > { %3659 = vmatpush3.msra.mxu1 %v1130_v35  ;;  %3639 = vmatpush3.msra.mxu0 %v1142_v46  ;;  %v1336_v46 = vld [vmem:[#allocation6 + $0x120] sm:$0xff] }
 0x198   : > { %3660 = vmatprep.subr.mxu1 %v1129_v37  ;;  %3640 = vmatprep.subr.mxu0 %v1141_v48 }
 0x199   : > { %3661 = vmatpush3.msra.mxu1 %v1129_v37  ;;  %3641 = vmatpush3.msra.mxu0 %v1141_v48  ;;  %v1341_v37 = vld [vmem:[#allocation6 + $0x148] sm:$0xff]  ;;  %v1334_v48 = vld [vmem:[#allocation6 + $0x110] sm:$0xff] }
 0x19a   : > { %3662 = vmatprep.subr.mxu1 %v1128_v39  ;;  %3686 = vmatprep.subr.mxu0 %v1347_v50 }
 0x19b   : > { %3663 = vmatpush3.msra.mxu1 %v1128_v39 }
 0x19c   : > { %3664 = vmatprep.subr.mxu1 %v1127_v42 }
 0x19d   : > { %3665 = vmatpush3.msra.mxu1 %v1127_v42  ;;  %v1339_v42 = vld [vmem:[#allocation6 + $0x138] sm:$0xff] }
 0x19e   : > { %3666 = vmatprep.subr.mxu1 %v1126_v45 }
 0x19f   : > { %3667 = vmatpush3.msra.mxu1 %v1126_v45  ;;  %v1337_v45 = vld [vmem:[#allocation6 + $0x128] sm:$0xff] }
 0x1a0   : > { %3668 = vmatprep.subr.mxu1 %v1125_v47 }
 0x1a1   : > { %3669 = vmatpush3.msra.mxu1 %v1125_v47  ;;  %v1335_v47 = vld [vmem:[#allocation6 + $0x118] sm:$0xff] }
 0x1a2   : > { %3670 = vmatprep.subr.mxu1 %v1124_v49 }
 0x1a3   : > { %3671 = vmatpush3.msra.mxu1 %v1124_v49  ;;  %v1333_v49 = vld [vmem:[#allocation6 + $0x108] sm:$0xff] }
 0x1a4   : > { %3672 = vmatprep.subr.mxu1 %v1123_v51 }
 0x1a5   : > { %3673 = vmatpush3.msra.mxu1 %v1123_v51 }
 0x1a6   : > { %3674 = vmatprep.subr.mxu1 %v1122_v52 }
 0x1a7   : > { %3675 = vmatpush3.msra.mxu1 %v1122_v52 }
 0x1a8   : > { %3676 = vmatprep.subr.mxu1 %v1121_v53 }
 0x1a9   : > { %3677 = vmatpush3.msra.mxu1 %v1121_v53  ;;  %v1512_v53 = vld [vmem:[#allocation8 + $0xf8] sm:$0xff] }
 0x1aa   : > { %3678 = vmatprep.subr.mxu1 %v1120_v54 }
 0x1ab   : > { %3679 = vmatpush3.msra.mxu1 %v1120_v54  ;;  %v1511_v54 = vld [vmem:[#allocation8 + $0xf0] sm:$0xff] }
 0x1ac   : > { %3724 = vmatprep.subr.mxu1 %v1512_v53 }
 0x22b   : > { %v3530_v55 = vpop.f32.mrf.mxu1 }
 0x22d   : > { %v881_v56 = vpop.f32.mrf.mxu1 }
 0x22e   : > { %v1509_v56 = vld [vmem:[#allocation8 + $0xe0] sm:$0xff] }
 0x22f   : > { %v3533_v57 = vpop.f32.mrf.mxu1 }
 0x230   : > { %v1508_v57 = vld [vmem:[#allocation8 + $0xd8] sm:$0xff] }
 0x231   : > { %v890_v61 = vpop.f32.mrf.mxu1 }
 0x233   : > { %v3568_v58 = vpop.f32.mrf.mxu0 }
 0x234   : > { %v969_v62 = vadd.f32 %v3568_v58, %v3530_v55  ;;  %v1510_v55 = vld [vmem:[#allocation8 + $0xe8] sm:$0xff]  ;;  %v1491_v58 = vld [vmem:[#allocation8 + $0x78] sm:$0xff] }
 0x235   : > { %v964_v59 = vpop.f32.mrf.mxu0 }
 0x236   : > { %v1507_v59 = vld [vmem:[#allocation8 + $0xd0] sm:$0xff] }
 0x237   : > { %v3571_v60 = vpop.f32.mrf.mxu0 }
 0x238   : > { %v1506_v60 = vld [vmem:[#allocation8 + $0xc8] sm:$0xff] }
 0x239   : > { %v973_v2 = vpop.f32.mrf.mxu0 }
 0x23a   : > { %v974_v6 = vadd.f32 %v973_v2, %v890_v61  ;;  %v1489_v61 = vld [vmem:[#allocation8 + $0x68] sm:$0xff]  ;;  %v1503_v2 = vld [vmem:[#allocation8 + $0xb0] sm:$0xff] }
 0x24c   : > { %v3606_v63 = vpop.f32.mrf.mxu1 }
 0x24d   : > { %v1085_v1 = vadd.f32 %v3606_v63, %v969_v62  ;;  %v1505_v62 = vld [vmem:[#allocation8 + $0xc0] sm:$0xff] }
 0x24e   : > { %v1068_v3 = vpop.f32.mrf.mxu1  ;;  %v1488_v63 = vld [vmem:[#allocation8 + $0x60] sm:$0xff] }
 0x24f   : > { %v1094_v4 = vadd.f32 %v3097_v0, %v1085_v1  ;;  %v1487_v1 = vld [vmem:[#allocation8 + $0x58] sm:$0xff]  ;;  %v1486_v3 = vld [vmem:[#allocation8 + $0x50] sm:$0xff] }
 0x250   : > { %v3609_v5 = vpop.f32.mrf.mxu1 }
 0x251   : > { %v1098_v7 = vmul.f32 0.044715, %v1094_v4  ;;  %v1096_v22 = vmul.f32 0.5, %v1094_v4  ;;  %v1485_v5 = vld [vmem:[#allocation8 + $0x48] sm:$0xff] }
 0x252   : > { %v1077_v8 = vpop.f32.mrf.mxu1 }
 0x253   : > { %v1100_v9 = vmul.f32 %v1098_v7, %v1094_v4  ;;  %v1086_v10 = vadd.f32 %v1077_v8, %v974_v6  ;;  %v1501_v6 = vld [vmem:[#allocation8 + $0xa0] sm:$0xff]  ;;  %v1500_v8 = vld [vmem:[#allocation8 + $0x98] sm:$0xff] }
 0x254   : > { %v1484_v7 = vld [vmem:[#allocation8 + $0x40] sm:$0xff] }
 0x255   : > { %v1102_v11 = vmul.f32 %v1100_v9, %v1094_v4  ;;  %v1095_v12 = vadd.f32 %v3097_v0, %v1086_v10  ;;  %v1504_v0 = vld [vmem:[#allocation8 + $0xb8] sm:$0xff]  ;;  %v1499_v10 = vld [vmem:[#allocation8 + $0x90] sm:$0xff] }
 0x256   : > { %v1483_v9 = vld [vmem:[#allocation8 + $0x38] sm:$0xff] }
 0x257   : > { %v1104_v13 = vadd.f32 %v1102_v11, %v1094_v4  ;;  %v1099_v14 = vmul.f32 0.044715, %v1095_v12  ;;  %v1097_v28 = vmul.f32 0.5, %v1095_v12  ;;  %v1502_v4 = vld [vmem:[#allocation8 + $0xa8] sm:$0xff]  ;;  %v1482_v11 = vld [vmem:[#allocation8 + $0x30] sm:$0xff] }
 0x259   : > { %v1106_v15 = vmul.f32 0.7978846, %v1104_v13  ;;  %v1101_v16 = vmul.f32 %v1099_v14, %v1095_v12  ;;  %v1481_v13 = vld [vmem:[#allocation8 + $0x28] sm:$0xff]  ;;  %v1497_v14 = vld [vmem:[#allocation8 + $0x80] sm:$0xff] }
 0x25b   : > { %4367 = vtanh.f32 %v1106_v15  ;;  %v1103_v17 = vmul.f32 %v1101_v16, %v1095_v12  ;;  %v1480_v15 = vld [vmem:[#allocation8 + $0x20] sm:$0xff]  ;;  %v1699_v16 = vld [vmem:[#allocation8 + $0x178] sm:$0xff] }
 0x25d   : > { %v1105_v19 = vadd.f32 %v1103_v17, %v1095_v12  ;;  %v1498_v12 = vld [vmem:[#allocation8 + $0x88] sm:$0xff]  ;;  %v1479_v17 = vld [vmem:[#allocation8 + $0x18] sm:$0xff] }
 0x25f   : > { %v1107_v20 = vmul.f32 0.7978846, %v1105_v19  ;;  %v1478_v19 = vld [vmem:[#allocation8 + $0x10] sm:$0xff] }
 0x261   : > { %4369 = vtanh.f32 %v1107_v20  ;;  %v1477_v20 = vld [vmem:[#allocation8 + $0x8] sm:$0xff] }
 0x268   : > { %v4368_v21 = vpop.eup %4367 }
 0x269   : > { %v1110_v23 = vadd.f32 1.0, %v4368_v21  ;;  %v1476_v21 = vld [vmem:[#allocation8] sm:$0xff] }
 0x26b   : > { %v1112_v24 = vmul.f32 %v1110_v23, %v1096_v22  ;;  %v4949_v22 = vld [vmem:[#allocation2 + $0x6] sm:$0xff] }
 0x26d   : > { %1114 = vst [vmem:[#allocation2 + $0x10] sm:$0xff] %v1112_v24  ;;  %3643 = vmatmul.mubr.f32.vlgmr.msra.gmra.mxu0 %v1112_v24 }
 0x26e   : > { %v4370_v26 = vpop.eup %4369  ;;  %3687 = vmatpush3.msra.mxu0 %v1347_v50  ;;  %v1332_v50 = vld [vmem:[#allocation6 + $0x100] sm:$0xff] }
 0x26f   : > { %v1111_v29 = vadd.f32 1.0, %v4370_v26  ;;  %3688 = vmatprep.subr.mxu0 %v1346_v25 }
 0x270   : > { %3689 = vmatpush3.msra.mxu0 %v1346_v25 }
 0x271   : > { %v1113_v32 = vmul.f32 %v1111_v29, %v1097_v28  ;;  %3690 = vmatprep.subr.mxu0 %v1345_v27 }
 0x272   : > { %3691 = vmatpush3.msra.mxu0 %v1345_v27 }
 0x273   : > { %1115 = vst [vmem:[#allocation2 + $0x18] sm:$0xff] %v1113_v32  ;;  %3692 = vmatprep.subr.mxu0 %v1344_v30  ;;  %3645 = vmatprep.mubr.f32.mxu0 %v1113_v32 }
 0x274   : > { %v1117_v34 = vld [vmem:[#allocation2 + $0xf] sm:$0xff]  ;;  %3693 = vmatpush3.msra.mxu0 %v1344_v30 }
 0x275   : > { %v1327_v35 = vld [vmem:[#allocation2 + $0x9] sm:$0xff]  ;;  %3681 = vmatmul.mubr.f32.vlgmr.msra.gmra.mxu1 %v1117_v34  ;;  %3646 = vmatmul.mubr.f32.gmra.mxu0 %v4657_v31 }
 0x276   : > { %3694 = vmatprep.subr.mxu0 %v1343_v33  ;;  %3718 = vmatprep.mubr.f32.mxu0 %v1327_v35  ;;  %v3098_v35 = vld [vmem:[%s5083_s6] ss:$0 sm:$0xff] }
 0x277   : > { %3695 = vmatpush3.msra.mxu0 %v1343_v33  ;;  %3725 = vmatpush3.msra.mxu1 %v1512_v53 }
 0x278   : > { %3696 = vmatprep.subr.mxu0 %v1342_v36  ;;  %3726 = vmatprep.subr.mxu1 %v1511_v54 }
 0x279   : > { %3697 = vmatpush3.msra.mxu0 %v1342_v36  ;;  %3727 = vmatpush3.msra.mxu1 %v1511_v54 }
 0x27a   : > { %v1118_v39 = vld [vmem:[#allocation2 + $0x17] sm:$0xff]  ;;  %v1119_v41 = vld [vmem:[#allocation2 + $0x1f] sm:$0xff]  ;;  %3698 = vmatprep.subr.mxu0 %v1341_v37  ;;  %3728 = vmatprep.subr.mxu1 %v1510_v55 }
 0x27b   : > { %3683 = vmatprep.mubr.f32.mxu1 %v1118_v39  ;;  %3699 = vmatpush3.msra.mxu0 %v1341_v37  ;;  %v1328_v51 = vld [vmem:[#allocation2 + $0x11] sm:$0xff]  ;;  %v1329_v52 = vld [vmem:[#allocation2 + $0x19] sm:$0xff] }
 0x27c   : > { %3684 = vmatmul.mubr.f32.gmra.mxu1 %v1119_v41  ;;  %3700 = vmatprep.subr.mxu0 %v1340_v38 }
 0x27d   : > { %3701 = vmatpush3.msra.mxu0 %v1340_v38  ;;  %3756 = vmatprep.mubr.f32.mxu1 %v4657_v31 }
 0x27e   : > { %3702 = vmatprep.subr.mxu0 %v1339_v42  ;;  %3729 = vmatpush3.msra.mxu1 %v1510_v55 }
 0x27f   : > { %3703 = vmatpush3.msra.mxu0 %v1339_v42  ;;  %3730 = vmatprep.subr.mxu1 %v1509_v56 }
 0x280   : > { %3704 = vmatprep.subr.mxu0 %v1338_v44  ;;  %3731 = vmatpush3.msra.mxu1 %v1509_v56 }
 0x281   : > { %3705 = vmatpush3.msra.mxu0 %v1338_v44  ;;  %3732 = vmatprep.subr.mxu1 %v1508_v57 }
 0x282   : > { %3706 = vmatprep.subr.mxu0 %v1337_v45  ;;  %3733 = vmatpush3.msra.mxu1 %v1508_v57 }
 0x283   : > { %3707 = vmatpush3.msra.mxu0 %v1337_v45  ;;  %3734 = vmatprep.subr.mxu1 %v1507_v59 }
 0x284   : > { %3708 = vmatprep.subr.mxu0 %v1336_v46  ;;  %3735 = vmatpush3.msra.mxu1 %v1507_v59 }
 0x285   : > { %3709 = vmatpush3.msra.mxu0 %v1336_v46  ;;  %3736 = vmatprep.subr.mxu1 %v1506_v60 }
 0x286   : > { %3710 = vmatprep.subr.mxu0 %v1335_v47  ;;  %3737 = vmatpush3.msra.mxu1 %v1506_v60 }
 0x287   : > { %3711 = vmatpush3.msra.mxu0 %v1335_v47  ;;  %3738 = vmatprep.subr.mxu1 %v1505_v62 }
 0x288   : > { %3712 = vmatprep.subr.mxu0 %v1334_v48  ;;  %3739 = vmatpush3.msra.mxu1 %v1505_v62 }
 0x289   : > { %3713 = vmatpush3.msra.mxu0 %v1334_v48  ;;  %3740 = vmatprep.subr.mxu1 %v1504_v0 }
 0x28a   : > { %3714 = vmatprep.subr.mxu0 %v1333_v49  ;;  %3741 = vmatpush3.msra.mxu1 %v1504_v0  ;;  %v1698_v0 = vld [vmem:[#allocation8 + $0x170] sm:$0xff] }
 0x28b   : > { %3715 = vmatpush3.msra.mxu0 %v1333_v49  ;;  %3742 = vmatprep.subr.mxu1 %v1503_v2 }
 0x28c   : > { %3716 = vmatprep.subr.mxu0 %v1332_v50  ;;  %3743 = vmatpush3.msra.mxu1 %v1503_v2 }
 0x28d   : > { %3717 = vmatpush3.msra.mxu0 %v1332_v50  ;;  %3744 = vmatprep.subr.mxu1 %v1502_v4 }
 0x28e   : > { %3719 = vmatmul.mubr.f32.vlgmr.msra.gmra.mxu0 %v1328_v51  ;;  %3762 = vmatprep.subr.mxu0 %v1491_v58 }
 0x28f   : > { %3721 = vmatprep.mubr.f32.mxu0 %v1329_v52  ;;  %3763 = vmatpush3.msra.mxu0 %v1491_v58 }
 0x290   : > { %3745 = vmatpush3.msra.mxu1 %v1502_v4 }
 0x291   : > { %3746 = vmatprep.subr.mxu1 %v1501_v6 }
 0x292   : > { %3722 = vmatmul.mubr.f32.gmra.mxu0 %v4939_v18  ;;  %v1490_v18 = vld [vmem:[#allocation8 + $0x70] sm:$0xff]  ;;  %3747 = vmatpush3.msra.mxu1 %v1501_v6 }
 0x293   : > { %3764 = vmatprep.subr.mxu0 %v1490_v18  ;;  %3748 = vmatprep.subr.mxu1 %v1500_v8 }
 0x294   : > { %3765 = vmatpush3.msra.mxu0 %v1490_v18  ;;  %3749 = vmatpush3.msra.mxu1 %v1500_v8 }
 0x295   : > { %3766 = vmatprep.subr.mxu0 %v1489_v61  ;;  %3750 = vmatprep.subr.mxu1 %v1499_v10 }
 0x296   : > { %3767 = vmatpush3.msra.mxu0 %v1489_v61  ;;  %3751 = vmatpush3.msra.mxu1 %v1499_v10  ;;  %v1694_v10 = vld [vmem:[#allocation8 + $0x150] sm:$0xff] }
 0x297   : > { %3768 = vmatprep.subr.mxu0 %v1488_v63  ;;  %3752 = vmatprep.subr.mxu1 %v1498_v12 }
 0x298   : > { %3769 = vmatpush3.msra.mxu0 %v1488_v63  ;;  %3753 = vmatpush3.msra.mxu1 %v1498_v12  ;;  %v1692_v12 = vld [vmem:[#allocation8 + $0x140] sm:$0xff] }
 0x299   : > { %3770 = vmatprep.subr.mxu0 %v1487_v1  ;;  %3754 = vmatprep.subr.mxu1 %v1497_v14 }
 0x29a   : > { %3771 = vmatpush3.msra.mxu0 %v1487_v1  ;;  %3755 = vmatpush3.msra.mxu1 %v1497_v14  ;;  %v1697_v1 = vld [vmem:[#allocation8 + $0x168] sm:$0xff] }
 0x29b   : > { %3772 = vmatprep.subr.mxu0 %v1486_v3  ;;  %3800 = vmatprep.subr.mxu1 %v1699_v16 }
 0x29c   : > { %3773 = vmatpush3.msra.mxu0 %v1486_v3  ;;  %3794 = vmatprep.mubr.f32.mxu0 %v4949_v22 }
 0x29d   : > { %3774 = vmatprep.subr.mxu0 %v1485_v5 }
 0x29e   : > { %3775 = vmatpush3.msra.mxu0 %v1485_v5  ;;  %v1696_v5 = vld [vmem:[#allocation8 + $0x160] sm:$0xff] }
 0x29f   : > { %3776 = vmatprep.subr.mxu0 %v1484_v7 }
 0x2a0   : > { %3777 = vmatpush3.msra.mxu0 %v1484_v7  ;;  %v1695_v7 = vld [vmem:[#allocation8 + $0x158] sm:$0xff] }
 0x2a1   : > { %3778 = vmatprep.subr.mxu0 %v1483_v9 }
 0x2a2   : > { %3779 = vmatpush3.msra.mxu0 %v1483_v9 }
 0x2a3   : > { %3780 = vmatprep.subr.mxu0 %v1482_v11 }
 0x2a4   : > { %3781 = vmatpush3.msra.mxu0 %v1482_v11  ;;  %v1693_v11 = vld [vmem:[#allocation8 + $0x148] sm:$0xff] }
 0x2a5   : > { %3782 = vmatprep.subr.mxu0 %v1481_v13 }
 0x2a6   : > { %3783 = vmatpush3.msra.mxu0 %v1481_v13 }
 0x2a7   : > { %3784 = vmatprep.subr.mxu0 %v1480_v15 }
 0x2a8   : > { %3785 = vmatpush3.msra.mxu0 %v1480_v15  ;;  %v1691_v15 = vld [vmem:[#allocation8 + $0x138] sm:$0xff] }
 0x2a9   : > { %3786 = vmatprep.subr.mxu0 %v1479_v17 }
 0x2aa   : > { %3787 = vmatpush3.msra.mxu0 %v1479_v17  ;;  %v1689_v17 = vld [vmem:[#allocation8 + $0x128] sm:$0xff] }
 0x2ab   : > { %3788 = vmatprep.subr.mxu0 %v1478_v19 }
 0x2ac   : > { %3789 = vmatpush3.msra.mxu0 %v1478_v19  ;;  %v1688_v19 = vld [vmem:[#allocation8 + $0x120] sm:$0xff] }
 0x2ad   : > { %3790 = vmatprep.subr.mxu0 %v1477_v20 }
 0x2ae   : > { %3791 = vmatpush3.msra.mxu0 %v1477_v20  ;;  %v1687_v20 = vld [vmem:[#allocation8 + $0x118] sm:$0xff] }
 0x2af   : > { %3792 = vmatprep.subr.mxu0 %v1476_v21 }
 0x2b0   : > { %3793 = vmatpush3.msra.mxu0 %v1476_v21  ;;  %v1686_v21 = vld [vmem:[#allocation8 + $0x110] sm:$0xff] }
 0x32d   : > { %v3644_v23 = vpop.f32.mrf.mxu0 }
 0x32f   : > { %v1223_v25 = vpop.f32.mrf.mxu0 }
 0x335   : > { %v3682_v24 = vpop.f32.mrf.mxu1  ;;  %v3647_v28 = vpop.f32.mrf.mxu0 }
 0x336   : > { %v1314_v33 = vadd.f32 %v3682_v24, %v3644_v23  ;;  %v1685_v23 = vld [vmem:[#allocation8 + $0x108] sm:$0xff]  ;;  %v1684_v24 = vld [vmem:[#allocation8 + $0x100] sm:$0xff] }
 0x337   : > { %v1308_v26 = vpop.f32.mrf.mxu1  ;;  %v1233_v32 = vpop.f32.mrf.mxu0 }
 0x338   : > { %v1309_v27 = vadd.f32 %v1308_v26, %v1223_v25  ;;  %v4977_v26 = vld [vmem:[#allocation2 + $0x22] sm:$0xff] }
 0x33c   : > { %v3685_v29 = vpop.f32.mrf.mxu1 }
 0x33d   : > { %v1324_v30 = vadd.f32 %v3685_v29, %v3647_v28  ;;  %v1853_v28 = vld [vmem:[#allocation9 + $0xf0] sm:$0xff]  ;;  %v1852_v29 = vld [vmem:[#allocation9 + $0xe8] sm:$0xff] }
 0x33e   : > { %v1318_v38 = vpop.f32.mrf.mxu1 }
 0x33f   : > { %v1319_v47 = vadd.f32 %v1318_v38, %v1233_v32  ;;  %v1850_v32 = vld [vmem:[#allocation9 + $0xd8] sm:$0xff]  ;;  %v1830_v38 = vld [vmem:[#allocation9 + $0x60] sm:$0xff] }
 0x34e   : > { %v3720_v34 = vpop.f32.mrf.mxu0 }
 0x34f   : > { %v1434_v36 = vadd.f32 %v3720_v34, %v1314_v33  ;;  %v1833_v33 = vld [vmem:[#allocation9 + $0x78] sm:$0xff]  ;;  %v1849_v34 = vld [vmem:[#allocation9 + $0xd0] sm:$0xff] }
 0x350   : > { %v1414_v37 = vpop.f32.mrf.mxu0 }
 0x351   : > { %v1445_v39 = vadd.f32 %v3098_v35, %v1434_v36  ;;  %v1433_v41 = vadd.f32 %v1414_v37, %v1309_v27  ;;  %v1854_v27 = vld [vmem:[#allocation9 + $0xf8] sm:$0xff]  ;;  %v1831_v36 = vld [vmem:[#allocation9 + $0x68] sm:$0xff]  ;;  %v1847_v37 = vld [vmem:[#allocation9 + $0xc0] sm:$0xff] }
 0x352   : > { %v3723_v42 = vpop.f32.mrf.mxu0  ;;  %3838 = vmatprep.subr.mxu0 %v1854_v27 }
 0x353   : > { %v4956_v44 = vadd.f32 %v1445_v39, %v4926_v43  ;;  %v4958_v45 = vadd.f32 %v3098_v35, %v1433_v41  ;;  %v1436_v46 = vadd.f32 %v3723_v42, %v1324_v30  ;;  %v1851_v30 = vld [vmem:[#allocation9 + $0xe0] sm:$0xff]  ;;  %v1846_v39 = vld [vmem:[#allocation9 + $0xb8] sm:$0xff]  ;;  %v1845_v42 = vld [vmem:[#allocation9 + $0xb0] sm:$0xff] }
 0x354   : > { %v1424_v48 = vpop.f32.mrf.mxu0  ;;  %v1829_v41 = vld [vmem:[#allocation9 + $0x58] sm:$0xff] }
 0x355   : > { %v1454_v49 = vmul.f32 0.044715, %v4956_v44  ;;  %v4961_v50 = vadd.f32 %v3098_v35, %v1436_v46  ;;  %v1435_v51 = vadd.f32 %v1424_v48, %v1319_v47  ;;  %v1452_v62 = vmul.f32 0.5, %v4956_v44  ;;  %v1828_v46 = vld [vmem:[#allocation9 + $0x50] sm:$0xff]  ;;  %v1844_v47 = vld [vmem:[#allocation9 + $0xa8] sm:$0xff] }
 0x356   : > { %v1827_v48 = vld [vmem:[#allocation9 + $0x48] sm:$0xff] }
 0x357   : > { %v1456_v52 = vmul.f32 %v1454_v49, %v4956_v44  ;;  %v1446_v53 = vadd.f32 %v3098_v35, %v1435_v51  ;;  %v1848_v35 = vld [vmem:[#allocation9 + $0xc8] sm:$0xff]  ;;  %v1843_v49 = vld [vmem:[#allocation9 + $0xa0] sm:$0xff] }
 0x358   : > { %v1826_v51 = vld [vmem:[#allocation9 + $0x40] sm:$0xff] }
 0x359   : > { %v1458_v54 = vmul.f32 %v1456_v52, %v4956_v44  ;;  %v4966_v55 = vadd.f32 %v1446_v53, %v4923_v40  ;;  %v1842_v52 = vld [vmem:[#allocation9 + $0x98] sm:$0xff] }
 0x35a   : > { %v1825_v53 = vld [vmem:[#allocation9 + $0x38] sm:$0xff] }
 0x35b   : > { %v1460_v43 = vadd.f32 %v1458_v54, %v4956_v44  ;;  %v1455_v56 = vmul.f32 0.044715, %v4966_v55  ;;  %v1453_v3 = vmul.f32 0.5, %v4966_v55  ;;  %v1841_v54 = vld [vmem:[#allocation9 + $0x90] sm:$0xff] }
 0x35d   : > { %v1462_v57 = vmul.f32 0.7978846, %v1460_v43  ;;  %v1457_v58 = vmul.f32 %v1455_v56, %v4966_v55  ;;  %v1824_v43 = vld [vmem:[#allocation9 + $0x30] sm:$0xff]  ;;  %v1840_v56 = vld [vmem:[#allocation9 + $0x88] sm:$0xff] }
 0x35f   : > { %4371 = vtanh.f32 %v1462_v57  ;;  %v1459_v59 = vmul.f32 %v1457_v58, %v4966_v55  ;;  %v1823_v57 = vld [vmem:[#allocation9 + $0x28] sm:$0xff]  ;;  %v1839_v58 = vld [vmem:[#allocation9 + $0x80] sm:$0xff] }
 0x361   : > { %v1461_v18 = vadd.f32 %v1459_v59, %v4966_v55  ;;  %v1822_v59 = vld [vmem:[#allocation9 + $0x20] sm:$0xff] }
 0x363   : > { %v1463_v60 = vmul.f32 0.7978846, %v1461_v18  ;;  %v2045_v18 = vld [vmem:[#allocation9 + $0x178] sm:$0xff] }
 0x365   : > { %4373 = vtanh.f32 %v1463_v60  ;;  %v1821_v60 = vld [vmem:[#allocation9 + $0x18] sm:$0xff] }
 0x36c   : > { %v4372_v61 = vpop.eup %4371 }
 0x36d   : > { %v1466_v63 = vadd.f32 1.0, %v4372_v61  ;;  %v1820_v61 = vld [vmem:[#allocation9 + $0x10] sm:$0xff] }
 0x36f   : > { %v1468_v40 = vmul.f32 %v1466_v63, %v1452_v62  ;;  %v1819_v62 = vld [vmem:[#allocation9 + $0x8] sm:$0xff]  ;;  %v1818_v63 = vld [vmem:[#allocation9] sm:$0xff] }
 0x371   : > { %1470 = vst [vmem:[#allocation2 + $0x10] sm:$0xff] %v1468_v40  ;;  %3757 = vmatmul.mubr.f32.vlgmr.msra.gmra.mxu1 %v1468_v40 }
 0x372   : > { %3801 = vmatpush3.msra.mxu1 %v1699_v16  ;;  %v4374_v2 = vpop.eup %4373  ;;  %v1690_v16 = vld [vmem:[#allocation8 + $0x130] sm:$0xff] }
 0x373   : > { %3802 = vmatprep.subr.mxu1 %v1698_v0  ;;  %v1467_v4 = vadd.f32 1.0, %v4374_v2 }
 0x374   : > { %3803 = vmatpush3.msra.mxu1 %v1698_v0 }
 0x375   : > { %3804 = vmatprep.subr.mxu1 %v1697_v1  ;;  %v1469_v6 = vmul.f32 %v1467_v4, %v1453_v3 }
 0x376   : > { %3805 = vmatpush3.msra.mxu1 %v1697_v1 }
 0x377   : > { %3806 = vmatprep.subr.mxu1 %v1696_v5  ;;  %1471 = vst [vmem:[#allocation2 + $0x18] sm:$0xff] %v1469_v6  ;;  %3759 = vmatprep.mubr.f32.mxu1 %v1469_v6 }
 0x378   : > { %v1473_v8 = vld [vmem:[#allocation2 + $0xe] sm:$0xff]  ;;  %3807 = vmatpush3.msra.mxu1 %v1696_v5 }
 0x379   : > { %v1679_v9 = vld [vmem:[#allocation2 + $0xa] sm:$0xff]  ;;  %3795 = vmatmul.mubr.f32.vlgmr.msra.gmra.mxu0 %v1473_v8  ;;  %3760 = vmatmul.mubr.f32.gmra.mxu1 %v4657_v31  ;;  %v3099_v8 = vld [vmem:[%s5085_s8] ss:$0 sm:$0xff] }
 0x37a   : > { %3808 = vmatprep.subr.mxu1 %v1695_v7  ;;  %3832 = vmatprep.mubr.f32.mxu1 %v1679_v9 }
 0x37b   : > { %3809 = vmatpush3.msra.mxu1 %v1695_v7  ;;  %3839 = vmatpush3.msra.mxu0 %v1854_v27 }
 0x37c   : > { %3810 = vmatprep.subr.mxu1 %v1694_v10  ;;  %3840 = vmatprep.subr.mxu0 %v1853_v28 }
 0x37d   : > { %3811 = vmatpush3.msra.mxu1 %v1694_v10  ;;  %3841 = vmatpush3.msra.mxu0 %v1853_v28 }
 0x37e   : > { %3812 = vmatprep.subr.mxu1 %v1693_v11  ;;  %v1474_v13 = vld [vmem:[#allocation2 + $0x16] sm:$0xff]  ;;  %v1475_v14 = vld [vmem:[#allocation2 + $0x1e] sm:$0xff]  ;;  %3842 = vmatprep.subr.mxu0 %v1852_v29 }
 0x37f   : > { %3813 = vmatpush3.msra.mxu1 %v1693_v11  ;;  %3797 = vmatprep.mubr.f32.mxu0 %v1474_v13  ;;  %v1681_v25 = vld [vmem:[#allocation2 + $0x1a] sm:$0xff] }
 0x380   : > { %3814 = vmatprep.subr.mxu1 %v1692_v12  ;;  %3798 = vmatmul.mubr.f32.gmra.mxu0 %v1475_v14 }
 0x381   : > { %3815 = vmatpush3.msra.mxu1 %v1692_v12  ;;  %3870 = vmatprep.mubr.f32.mxu0 %v4657_v31  ;;  %v1680_v31 = vld [vmem:[#allocation2 + $0x12] sm:$0xff] }
 0x382   : > { %3816 = vmatprep.subr.mxu1 %v1691_v15  ;;  %3843 = vmatpush3.msra.mxu0 %v1852_v29 }
 0x383   : > { %3817 = vmatpush3.msra.mxu1 %v1691_v15  ;;  %3844 = vmatprep.subr.mxu0 %v1851_v30 }
 0x384   : > { %3818 = vmatprep.subr.mxu1 %v1690_v16  ;;  %3845 = vmatpush3.msra.mxu0 %v1851_v30 }
 0x385   : > { %3819 = vmatpush3.msra.mxu1 %v1690_v16  ;;  %3846 = vmatprep.subr.mxu0 %v1850_v32 }
 0x386   : > { %3820 = vmatprep.subr.mxu1 %v1689_v17  ;;  %3847 = vmatpush3.msra.mxu0 %v1850_v32 }
 0x387   : > { %3821 = vmatpush3.msra.mxu1 %v1689_v17  ;;  %3848 = vmatprep.subr.mxu0 %v1849_v34 }
 0x388   : > { %3822 = vmatprep.subr.mxu1 %v1688_v19  ;;  %3849 = vmatpush3.msra.mxu0 %v1849_v34 }
 0x389   : > { %3823 = vmatpush3.msra.mxu1 %v1688_v19  ;;  %3850 = vmatprep.subr.mxu0 %v1848_v35 }
 0x38a   : > { %3824 = vmatprep.subr.mxu1 %v1687_v20  ;;  %3851 = vmatpush3.msra.mxu0 %v1848_v35 }
 0x38b   : > { %3825 = vmatpush3.msra.mxu1 %v1687_v20  ;;  %3852 = vmatprep.subr.mxu0 %v1847_v37 }
 0x38c   : > { %3826 = vmatprep.subr.mxu1 %v1686_v21  ;;  %3853 = vmatpush3.msra.mxu0 %v1847_v37 }
 0x38d   : > { %3827 = vmatpush3.msra.mxu1 %v1686_v21  ;;  %3854 = vmatprep.subr.mxu0 %v1846_v39 }
 0x38e   : > { %3828 = vmatprep.subr.mxu1 %v1685_v23  ;;  %3855 = vmatpush3.msra.mxu0 %v1846_v39  ;;  %v2042_v39 = vld [vmem:[#allocation9 + $0x160] sm:$0xff] }
 0x38f   : > { %3829 = vmatpush3.msra.mxu1 %v1685_v23  ;;  %3856 = vmatprep.subr.mxu0 %v1845_v42 }
 0x390   : > { %3830 = vmatprep.subr.mxu1 %v1684_v24  ;;  %3857 = vmatpush3.msra.mxu0 %v1845_v42  ;;  %v2041_v42 = vld [vmem:[#allocation9 + $0x158] sm:$0xff] }
 0x391   : > { %3831 = vmatpush3.msra.mxu1 %v1684_v24  ;;  %3858 = vmatprep.subr.mxu0 %v1844_v47 }
 0x392   : > { %3833 = vmatmul.mubr.f32.vlgmr.msra.gmra.mxu1 %v1680_v31  ;;  %3876 = vmatprep.subr.mxu1 %v1833_v33 }
 0x393   : > { %3835 = vmatprep.mubr.f32.mxu1 %v1681_v25  ;;  %3877 = vmatpush3.msra.mxu1 %v1833_v33 }
 0x394   : > { %3859 = vmatpush3.msra.mxu0 %v1844_v47 }
 0x395   : > { %3860 = vmatprep.subr.mxu0 %v1843_v49 }
 0x396   : > { %3836 = vmatmul.mubr.f32.gmra.mxu1 %v4977_v26  ;;  %3861 = vmatpush3.msra.mxu0 %v1843_v49  ;;  %v2040_v49 = vld [vmem:[#allocation9 + $0x150] sm:$0xff] }
 0x397   : > { %3908 = vmatprep.mubr.f32.mxu1 %v4949_v22  ;;  %v1832_v22 = vld [vmem:[#allocation9 + $0x70] sm:$0xff]  ;;  %3862 = vmatprep.subr.mxu0 %v1842_v52 }
 0x398   : > { %3878 = vmatprep.subr.mxu1 %v1832_v22  ;;  %3863 = vmatpush3.msra.mxu0 %v1842_v52  ;;  %v2038_v52 = vld [vmem:[#allocation9 + $0x140] sm:$0xff] }
 0x399   : > { %3879 = vmatpush3.msra.mxu1 %v1832_v22  ;;  %3864 = vmatprep.subr.mxu0 %v1841_v54  ;;  %v2044_v22 = vld [vmem:[#allocation9 + $0x170] sm:$0xff] }
 0x39a   : > { %3880 = vmatprep.subr.mxu1 %v1831_v36  ;;  %3865 = vmatpush3.msra.mxu0 %v1841_v54 }
 0x39b   : > { %3881 = vmatpush3.msra.mxu1 %v1831_v36  ;;  %3866 = vmatprep.subr.mxu0 %v1840_v56  ;;  %v2043_v36 = vld [vmem:[#allocation9 + $0x168] sm:$0xff] }
 0x39c   : > { %3882 = vmatprep.subr.mxu1 %v1830_v38  ;;  %3867 = vmatpush3.msra.mxu0 %v1840_v56  ;;  %v2036_v56 = vld [vmem:[#allocation9 + $0x130] sm:$0xff] }
 0x39d   : > { %3883 = vmatpush3.msra.mxu1 %v1830_v38  ;;  %3868 = vmatprep.subr.mxu0 %v1839_v58 }
 0x39e   : > { %3884 = vmatprep.subr.mxu1 %v1829_v41  ;;  %3869 = vmatpush3.msra.mxu0 %v1839_v58  ;;  %v2034_v58 = vld [vmem:[#allocation9 + $0x120] sm:$0xff] }
 0x39f   : > { %3885 = vmatpush3.msra.mxu1 %v1829_v41  ;;  %3914 = vmatprep.subr.mxu0 %v2045_v18 }
 0x3a0   : > { %3886 = vmatprep.subr.mxu1 %v1828_v46 }
 0x3a1   : > { %3887 = vmatpush3.msra.mxu1 %v1828_v46 }
 0x3a2   : > { %3888 = vmatprep.subr.mxu1 %v1827_v48 }
 0x3a3   : > { %3889 = vmatpush3.msra.mxu1 %v1827_v48  ;;  %v4984_v48 = vld [vmem:[#allocation2 + $0x8] sm:$0xff] }
 0x3a4   : > { %3890 = vmatprep.subr.mxu1 %v1826_v51 }
 0x3a5   : > { %3891 = vmatpush3.msra.mxu1 %v1826_v51  ;;  %v2039_v51 = vld [vmem:[#allocation9 + $0x148] sm:$0xff] }
 0x3a6   : > { %3892 = vmatprep.subr.mxu1 %v1825_v53 }
 0x3a7   : > { %3893 = vmatpush3.msra.mxu1 %v1825_v53 }
 0x3a8   : > { %3894 = vmatprep.subr.mxu1 %v1824_v43 }
 0x3a9   : > { %3895 = vmatpush3.msra.mxu1 %v1824_v43  ;;  %v2037_v43 = vld [vmem:[#allocation9 + $0x138] sm:$0xff] }
 0x3aa   : > { %3896 = vmatprep.subr.mxu1 %v1823_v57 }
 0x3ab   : > { %3897 = vmatpush3.msra.mxu1 %v1823_v57  ;;  %v2035_v57 = vld [vmem:[#allocation9 + $0x128] sm:$0xff] }
 0x3ac   : > { %3898 = vmatprep.subr.mxu1 %v1822_v59 }
 0x3ad   : > { %3899 = vmatpush3.msra.mxu1 %v1822_v59  ;;  %v2033_v59 = vld [vmem:[#allocation9 + $0x118] sm:$0xff] }
 0x3ae   : > { %3900 = vmatprep.subr.mxu1 %v1821_v60 }
 0x3af   : > { %3901 = vmatpush3.msra.mxu1 %v1821_v60  ;;  %v2031_v60 = vld [vmem:[#allocation9 + $0x108] sm:$0xff] }
 0x3b0   : > { %3902 = vmatprep.subr.mxu1 %v1820_v61 }
 0x3b1   : > { %3903 = vmatpush3.msra.mxu1 %v1820_v61  ;;  %v2030_v61 = vld [vmem:[#allocation9 + $0x100] sm:$0xff] }
 0x3b2   : > { %3904 = vmatprep.subr.mxu1 %v1819_v62 }
 0x3b3   : > { %3905 = vmatpush3.msra.mxu1 %v1819_v62 }
 0x3b4   : > { %3906 = vmatprep.subr.mxu1 %v1818_v63 }
 0x3b5   : > { %3907 = vmatpush3.msra.mxu1 %v1818_v63 }
 0x431   : > { %v3758_v40 = vpop.f32.mrf.mxu1 }
 0x433   : > { %v1579_v0 = vpop.f32.mrf.mxu1 }
 0x434   : > { %v2164_v0 = vld [vmem:[#allocation14 + $0x70] sm:$0xff] }
 0x439   : > { %v3796_v1 = vpop.f32.mrf.mxu0  ;;  %v3761_v2 = vpop.f32.mrf.mxu1 }
 0x43a   : > { %v1667_v6 = vadd.f32 %v3796_v1, %v3758_v40  ;;  %v2165_v40 = vld [vmem:[#allocation14 + $0x78] sm:$0xff]  ;;  %v2163_v1 = vld [vmem:[#allocation14 + $0x68] sm:$0xff]  ;;  %v2162_v2 = vld [vmem:[#allocation14 + $0x60] sm:$0xff] }
 0x43b   : > { %v1662_v3 = vpop.f32.mrf.mxu0  ;;  %v1588_v5 = vpop.f32.mrf.mxu1  ;;  %3952 = vmatprep.subr.mxu1 %v2165_v40 }
 0x43c   : > { %v2161_v3 = vld [vmem:[#allocation14 + $0x58] sm:$0xff] }
 0x440   : > { %v3799_v4 = vpop.f32.mrf.mxu0 }
 0x441   : > { %v2160_v4 = vld [vmem:[#allocation14 + $0x50] sm:$0xff] }
 0x442   : > { %v1671_v10 = vpop.f32.mrf.mxu0 }
 0x443   : > { %v1672_v14 = vadd.f32 %v1671_v10, %v1588_v5  ;;  %v2159_v5 = vld [vmem:[#allocation14 + $0x48] sm:$0xff]  ;;  %v2153_v10 = vld [vmem:[#allocation14 + $0x18] sm:$0xff] }
 0x452   : > { %v3834_v7 = vpop.f32.mrf.mxu1 }
 0x453   : > { %v1783_v9 = vadd.f32 %v3834_v7, %v1667_v6  ;;  %v2157_v6 = vld [vmem:[#allocation14 + $0x38] sm:$0xff]  ;;  %v2156_v7 = vld [vmem:[#allocation14 + $0x30] sm:$0xff] }
 0x454   : > { %v1766_v11 = vpop.f32.mrf.mxu1 }
 0x455   : > { %v1792_v12 = vadd.f32 %v3099_v8, %v1783_v9  ;;  %v2154_v9 = vld [vmem:[#allocation14 + $0x20] sm:$0xff]  ;;  %v2315_v11 = vld [vmem:[#allocation11 + $0xf8] sm:$0xff] }
 0x456   : > { %v3837_v13 = vpop.f32.mrf.mxu1 }
 0x457   : > { %v1796_v15 = vmul.f32 0.044715, %v1792_v12  ;;  %v1794_v32 = vmul.f32 0.5, %v1792_v12  ;;  %v2314_v13 = vld [vmem:[#allocation11 + $0xf0] sm:$0xff] }
 0x458   : > { %v1775_v16 = vpop.f32.mrf.mxu1 }
 0x459   : > { %v1798_v17 = vmul.f32 %v1796_v15, %v1792_v12  ;;  %v1784_v19 = vadd.f32 %v1775_v16, %v1672_v14  ;;  %v2151_v14 = vld [vmem:[#allocation14 + $0x8] sm:$0xff]  ;;  %v2150_v16 = vld [vmem:[#allocation14] sm:$0xff] }
 0x45a   : > { %v2313_v15 = vld [vmem:[#allocation11 + $0xe8] sm:$0xff] }
 0x45b   : > { %v1800_v20 = vmul.f32 %v1798_v17, %v1792_v12  ;;  %v1793_v21 = vadd.f32 %v3099_v8, %v1784_v19  ;;  %v2155_v8 = vld [vmem:[#allocation14 + $0x28] sm:$0xff]  ;;  %v2312_v17 = vld [vmem:[#allocation11 + $0xe0] sm:$0xff]  ;;  %v2311_v19 = vld [vmem:[#allocation11 + $0xd8] sm:$0xff] }
 0x45d   : > { %v1802_v23 = vadd.f32 %v1800_v20, %v1792_v12  ;;  %v1797_v24 = vmul.f32 0.044715, %v1793_v21  ;;  %v1795_v37 = vmul.f32 0.5, %v1793_v21  ;;  %v2152_v12 = vld [vmem:[#allocation14 + $0x10] sm:$0xff]  ;;  %v4989_v20 = vld [vmem:[#allocation11 + $0x78] sm:$0xff] }
 0x45f   : > { %v1804_v31 = vmul.f32 0.7978846, %v1802_v23  ;;  %v1799_v25 = vmul.f32 %v1797_v24, %v1793_v21  ;;  %v2309_v23 = vld [vmem:[#allocation11 + $0xc8] sm:$0xff]  ;;  %v2308_v24 = vld [vmem:[#allocation11 + $0xc0] sm:$0xff] }
 0x461   : > { %4375 = vtanh.f32 %v1804_v31  ;;  %v1801_v27 = vmul.f32 %v1799_v25, %v1793_v21  ;;  %v2307_v31 = vld [vmem:[#allocation11 + $0xb8] sm:$0xff]  ;;  %v2306_v25 = vld [vmem:[#allocation11 + $0xb0] sm:$0xff] }
 0x463   : > { %v1803_v28 = vadd.f32 %v1801_v27, %v1793_v21  ;;  %v2310_v21 = vld [vmem:[#allocation11 + $0xd0] sm:$0xff]  ;;  %v2305_v27 = vld [vmem:[#allocation11 + $0xa8] sm:$0xff] }
 0x465   : > { %v1805_v29 = vmul.f32 0.7978846, %v1803_v28  ;;  %v2304_v28 = vld [vmem:[#allocation11 + $0xa0] sm:$0xff] }
 0x467   : > { %4377 = vtanh.f32 %v1805_v29  ;;  %v2303_v29 = vld [vmem:[#allocation11 + $0x98] sm:$0xff] }
 0x46e   : > { %v4376_v30 = vpop.eup %4375 }
 0x46f   : > { %v1808_v33 = vadd.f32 1.0, %v4376_v30  ;;  %v2302_v30 = vld [vmem:[#allocation11 + $0x90] sm:$0xff] }
 0x471   : > { %v1810_v34 = vmul.f32 %v1808_v33, %v1794_v32  ;;  %v2301_v32 = vld [vmem:[#allocation11 + $0x88] sm:$0xff]  ;;  %v2300_v33 = vld [vmem:[#allocation11 + $0x80] sm:$0xff] }
 0x473   : > { %1812 = vst [vmem:[#allocation2 + $0x10] sm:$0xff] %v1810_v34  ;;  %3871 = vmatmul.mubr.f32.vlgmr.msra.gmra.mxu0 %v1810_v34  ;;  %v4992_v34 = vld [vmem:[#allocation11 + $0x178] sm:$0xff] }
 0x474   : > { %v4378_v35 = vpop.eup %4377  ;;  %3915 = vmatpush3.msra.mxu0 %v2045_v18  ;;  %v2032_v18 = vld [vmem:[#allocation9 + $0x110] sm:$0xff] }
 0x475   : > { %v1809_v38 = vadd.f32 1.0, %v4378_v35  ;;  %3916 = vmatprep.subr.mxu0 %v2044_v22 }
 0x476   : > { %3917 = vmatpush3.msra.mxu0 %v2044_v22 }
 0x477   : > { %v1811_v41 = vmul.f32 %v1809_v38, %v1795_v37  ;;  %3918 = vmatprep.subr.mxu0 %v2043_v36 }
 0x478   : > { %3919 = vmatpush3.msra.mxu0 %v2043_v36 }
 0x479   : > { %1813 = vst [vmem:[#allocation2 + $0x18] sm:$0xff] %v1811_v41  ;;  %3920 = vmatprep.subr.mxu0 %v2042_v39  ;;  %3873 = vmatprep.mubr.f32.mxu0 %v1811_v41 }
 0x47a   : > { %v1815_v46 = vld [vmem:[#allocation2 + $0xe] sm:$0xff]  ;;  %3921 = vmatpush3.msra.mxu0 %v2042_v39 }
 0x47b   : > { %v2025_v47 = vld [vmem:[#allocation2 + $0xa] sm:$0xff]  ;;  %3909 = vmatmul.mubr.f32.vlgmr.msra.gmra.mxu1 %v1815_v46  ;;  %3874 = vmatmul.mubr.f32.gmra.mxu0 %v4984_v48 }
 0x47c   : > { %3922 = vmatprep.subr.mxu0 %v2041_v42  ;;  %3946 = vmatprep.mubr.f32.mxu0 %v2025_v47  ;;  %v3100_v47 = vld [vmem:[%s5087_s10] ss:$0 sm:$0xff] }
 0x47d   : > { %3923 = vmatpush3.msra.mxu0 %v2041_v42  ;;  %3953 = vmatpush3.msra.mxu1 %v2165_v40 }
 0x47e   : > { %3924 = vmatprep.subr.mxu0 %v2040_v49  ;;  %3954 = vmatprep.subr.mxu1 %v2164_v0 }
 0x47f   : > { %3925 = vmatpush3.msra.mxu0 %v2040_v49  ;;  %3955 = vmatpush3.msra.mxu1 %v2164_v0 }
 0x480   : > { %v1816_v53 = vld [vmem:[#allocation2 + $0x16] sm:$0xff]  ;;  %v1817_v54 = vld [vmem:[#allocation2 + $0x1e] sm:$0xff]  ;;  %3926 = vmatprep.subr.mxu0 %v2039_v51  ;;  %3956 = vmatprep.subr.mxu1 %v2163_v1 }
 0x481   : > { %3911 = vmatprep.mubr.f32.mxu1 %v1816_v53  ;;  %3927 = vmatpush3.msra.mxu0 %v2039_v51  ;;  %v2026_v62 = vld [vmem:[#allocation2 + $0x12] sm:$0xff]  ;;  %v2027_v63 = vld [vmem:[#allocation2 + $0x1a] sm:$0xff] }
 0x482   : > { %3912 = vmatmul.mubr.f32.gmra.mxu1 %v1817_v54  ;;  %3928 = vmatprep.subr.mxu0 %v2038_v52 }
 0x483   : > { %3929 = vmatpush3.msra.mxu0 %v2038_v52  ;;  %3957 = vmatpush3.msra.mxu1 %v2163_v1 }
 0x484   : > { %3930 = vmatprep.subr.mxu0 %v2037_v43  ;;  %3958 = vmatprep.subr.mxu1 %v2162_v2 }
 0x485   : > { %3931 = vmatpush3.msra.mxu0 %v2037_v43  ;;  %3959 = vmatpush3.msra.mxu1 %v2162_v2 }
 0x486   : > { %3932 = vmatprep.subr.mxu0 %v2036_v56  ;;  %3960 = vmatprep.subr.mxu1 %v2161_v3 }
 0x487   : > { %3933 = vmatpush3.msra.mxu0 %v2036_v56  ;;  %3961 = vmatpush3.msra.mxu1 %v2161_v3 }
 0x488   : > { %3934 = vmatprep.subr.mxu0 %v2035_v57  ;;  %3962 = vmatprep.subr.mxu1 %v2160_v4 }
 0x489   : > { %3935 = vmatpush3.msra.mxu0 %v2035_v57  ;;  %3963 = vmatpush3.msra.mxu1 %v2160_v4  ;;  %v2293_v4 = vld [vmem:[#allocation11 + $0x70] sm:$0xff] }
 0x48a   : > { %3936 = vmatprep.subr.mxu0 %v2034_v58  ;;  %3964 = vmatprep.subr.mxu1 %v2159_v5 }
 0x48b   : > { %3937 = vmatpush3.msra.mxu0 %v2034_v58  ;;  %3965 = vmatpush3.msra.mxu1 %v2159_v5  ;;  %v1451_v5 = vadd.f32 %v4984_v48, %v4961_v50 }
 0x48c   : > { %3938 = vmatprep.subr.mxu0 %v2033_v59 }
 0x48d   : > { %3939 = vmatpush3.msra.mxu0 %v2033_v59 }
 0x48e   : > { %3940 = vmatprep.subr.mxu0 %v2032_v18 }
 0x48f   : > { %3941 = vmatpush3.msra.mxu0 %v2032_v18 }
 0x490   : > { %3942 = vmatprep.subr.mxu0 %v2031_v60 }
 0x491   : > { %3943 = vmatpush3.msra.mxu0 %v2031_v60 }
 0x492   : > { %3944 = vmatprep.subr.mxu0 %v2030_v61 }
 0x493   : > { %3945 = vmatpush3.msra.mxu0 %v2030_v61  ;;  %v1448_v61 = vadd.f32 %v4984_v48, %v4958_v45  ;;  %v2292_v45 = vld [vmem:[#allocation11 + $0x68] sm:$0xff] }
 0x494   : > { %3947 = vmatmul.mubr.f32.vlgmr.msra.gmra.mxu0 %v2026_v62  ;;  %3990 = vmatprep.subr.mxu0 %v2315_v11 }
 0x495   : > { %3949 = vmatprep.mubr.f32.mxu0 %v2027_v63  ;;  %3991 = vmatpush3.msra.mxu0 %v2315_v11 }
 0x496   : > { %3992 = vmatprep.subr.mxu0 %v2314_v13 }
 0x497   : > { %3993 = vmatpush3.msra.mxu0 %v2314_v13  ;;  %v2289_v13 = vld [vmem:[#allocation11 + $0x50] sm:$0xff] }
 0x498   : > { %3950 = vmatmul.mubr.f32.gmra.mxu0 %v4977_v26  ;;  %v2158_v26 = vld [vmem:[#allocation14 + $0x40] sm:$0xff]  ;;  %3994 = vmatprep.subr.mxu0 %v2313_v15 }
 0x499   : > { %4022 = vmatprep.mubr.f32.mxu0 %v4984_v48  ;;  %3966 = vmatprep.subr.mxu1 %v2158_v26 }
 0x49a   : > { %3967 = vmatpush3.msra.mxu1 %v2158_v26  ;;  %3995 = vmatpush3.msra.mxu0 %v2313_v15  ;;  %v2288_v15 = vld [vmem:[#allocation11 + $0x48] sm:$0xff] }
 0x49b   : > { %3968 = vmatprep.subr.mxu1 %v2157_v6  ;;  %3996 = vmatprep.subr.mxu0 %v2312_v17 }
 0x49c   : > { %3969 = vmatpush3.msra.mxu1 %v2157_v6  ;;  %3997 = vmatpush3.msra.mxu0 %v2312_v17  ;;  %v2287_v17 = vld [vmem:[#allocation11 + $0x40] sm:$0xff] }
 0x49d   : > { %3970 = vmatprep.subr.mxu1 %v2156_v7  ;;  %3998 = vmatprep.subr.mxu0 %v2311_v19 }
 0x49e   : > { %3971 = vmatpush3.msra.mxu1 %v2156_v7  ;;  %3999 = vmatpush3.msra.mxu0 %v2311_v19  ;;  %v2286_v19 = vld [vmem:[#allocation11 + $0x38] sm:$0xff] }
 0x49f   : > { %3972 = vmatprep.subr.mxu1 %v2155_v8  ;;  %4000 = vmatprep.subr.mxu0 %v2310_v21 }
 0x4a0   : > { %3973 = vmatpush3.msra.mxu1 %v2155_v8  ;;  %4001 = vmatpush3.msra.mxu0 %v2310_v21  ;;  %v2284_v21 = vld [vmem:[#allocation11 + $0x28] sm:$0xff] }
 0x4a1   : > { %3974 = vmatprep.subr.mxu1 %v2154_v9  ;;  %4002 = vmatprep.subr.mxu0 %v2309_v23 }
 0x4a2   : > { %3975 = vmatpush3.msra.mxu1 %v2154_v9  ;;  %4003 = vmatpush3.msra.mxu0 %v2309_v23  ;;  %v5009_v9 = vld [vmem:[#allocation2 + $0x4] sm:$0xff] }
 0x4a3   : > { %3976 = vmatprep.subr.mxu1 %v2153_v10  ;;  %4004 = vmatprep.subr.mxu0 %v2308_v24 }
 0x4a4   : > { %3977 = vmatpush3.msra.mxu1 %v2153_v10  ;;  %4005 = vmatpush3.msra.mxu0 %v2308_v24  ;;  %v2291_v10 = vld [vmem:[#allocation11 + $0x60] sm:$0xff] }
 0x4a5   : > { %3978 = vmatprep.subr.mxu1 %v2152_v12  ;;  %4006 = vmatprep.subr.mxu0 %v2307_v31  ;;  %v2283_v24 = vld [vmem:[#allocation11 + $0x20] sm:$0xff] }
 0x4a6   : > { %3979 = vmatpush3.msra.mxu1 %v2152_v12  ;;  %4007 = vmatpush3.msra.mxu0 %v2307_v31 }
 0x4a7   : > { %3980 = vmatprep.subr.mxu1 %v2151_v14  ;;  %4008 = vmatprep.subr.mxu0 %v2306_v25 }
 0x4a8   : > { %3981 = vmatpush3.msra.mxu1 %v2151_v14  ;;  %4009 = vmatpush3.msra.mxu0 %v2306_v25 }
 0x4a9   : > { %3982 = vmatprep.subr.mxu1 %v2150_v16  ;;  %4010 = vmatprep.subr.mxu0 %v2305_v27 }
 0x4aa   : > { %3983 = vmatpush3.msra.mxu1 %v2150_v16  ;;  %4011 = vmatpush3.msra.mxu0 %v2305_v27  ;;  %v2282_v27 = vld [vmem:[#allocation11 + $0x18] sm:$0xff] }
 0x4ab   : > { %4028 = vmatprep.subr.mxu1 %v4989_v20  ;;  %4012 = vmatprep.subr.mxu0 %v2304_v28 }
 0x4ac   : > { %4013 = vmatpush3.msra.mxu0 %v2304_v28 }
 0x4ad   : > { %4014 = vmatprep.subr.mxu0 %v2303_v29 }
 0x4ae   : > { %4015 = vmatpush3.msra.mxu0 %v2303_v29  ;;  %v2281_v29 = vld [vmem:[#allocation11 + $0x10] sm:$0xff] }
 0x4af   : > { %4016 = vmatprep.subr.mxu0 %v2302_v30 }
 0x4b0   : > { %4017 = vmatpush3.msra.mxu0 %v2302_v30  ;;  %v2501_v30 = vld [vmem:[#allocation11 + $0x170] sm:$0xff] }
 0x4b1   : > { %4018 = vmatprep.subr.mxu0 %v2301_v32 }
 0x4b2   : > { %4019 = vmatpush3.msra.mxu0 %v2301_v32 }
 0x4b3   : > { %4020 = vmatprep.subr.mxu0 %v2300_v33 }
 0x4b4   : > { %4021 = vmatpush3.msra.mxu0 %v2300_v33  ;;  %v2280_v33 = vld [vmem:[#allocation11 + $0x8] sm:$0xff] }
 0x4b5   : > { %4066 = vmatprep.subr.mxu0 %v4992_v34 }
 0x533   : > { %v3872_v22 = vpop.f32.mrf.mxu0 }
 0x535   : > { %v1921_v36 = vpop.f32.mrf.mxu0 }
 0x53b   : > { %v3910_v35 = vpop.f32.mrf.mxu1  ;;  %v3875_v37 = vpop.f32.mrf.mxu0 }
 0x53c   : > { %v2012_v42 = vadd.f32 %v3910_v35, %v3872_v22  ;;  %v2500_v22 = vld [vmem:[#allocation11 + $0x168] sm:$0xff] }
 0x53d   : > { %v2006_v38 = vpop.f32.mrf.mxu1  ;;  %v1931_v41 = vpop.f32.mrf.mxu0 }
 0x53e   : > { %v2007_v49 = vadd.f32 %v2006_v38, %v1921_v36  ;;  %v2499_v38 = vld [vmem:[#allocation11 + $0x160] sm:$0xff] }
 0x542   : > { %v3913_v39 = vpop.f32.mrf.mxu1 }
 0x543   : > { %v2022_v54 = vadd.f32 %v3913_v39, %v3875_v37  ;;  %v2279_v37 = vld [vmem:[#allocation11] sm:$0xff] }
 0x544   : > { %v2016_v52 = vpop.f32.mrf.mxu1 }
 0x545   : > { %v2017_v58 = vadd.f32 %v2016_v52, %v1931_v41  ;;  %v2498_v41 = vld [vmem:[#allocation11 + $0x158] sm:$0xff] }
 0x546   : > { %v2494_v52 = vld [vmem:[#allocation11 + $0x138] sm:$0xff] }
 0x554   : > { %v3948_v46 = vpop.f32.mrf.mxu0 }
 0x555   : > { %v2132_v51 = vadd.f32 %v3948_v46, %v2012_v42  ;;  %v2497_v42 = vld [vmem:[#allocation11 + $0x150] sm:$0xff]  ;;  %v2496_v46 = vld [vmem:[#allocation11 + $0x148] sm:$0xff] }
 0x556   : > { %v2112_v53 = vpop.f32.mrf.mxu0 }
 0x557   : > { %v2143_v43 = vadd.f32 %v3100_v47, %v2132_v51  ;;  %v2131_v56 = vadd.f32 %v2112_v53, %v2007_v49  ;;  %v2493_v53 = vld [vmem:[#allocation11 + $0x130] sm:$0xff] }
 0x558   : > { %v3951_v57 = vpop.f32.mrf.mxu0 }
 0x559   : > { %v2147_v59 = vadd.f32 %v2143_v43, %v4956_v44  ;;  %v2142_v18 = vadd.f32 %v3100_v47, %v2131_v56  ;;  %v2134_v60 = vadd.f32 %v3951_v57, %v2022_v54  ;;  %v2492_v54 = vld [vmem:[#allocation11 + $0x128] sm:$0xff]  ;;  %v2491_v43 = vld [vmem:[#allocation11 + $0x120] sm:$0xff]  ;;  %v2490_v56 = vld [vmem:[#allocation11 + $0x118] sm:$0xff] }
 0x55a   : > { %v2122_v62 = vpop.f32.mrf.mxu0  ;;  %v2489_v57 = vld [vmem:[#allocation11 + $0x110] sm:$0xff] }
 0x55b   : > { %v2257_v63 = vmul.f32 0.044715, %v2147_v59  ;;  %v2133_v40 = vadd.f32 %v2122_v62, %v2017_v58  ;;  %v2146_v0 = vadd.f32 %v2142_v18, %v1448_v61  ;;  %v2145_v2 = vadd.f32 %v3100_v47, %v2134_v60  ;;  %v2488_v58 = vld [vmem:[#allocation11 + $0x108] sm:$0xff]  ;;  %v5019_v18 = vld [vmem:[#allocation2 + $0x24] sm:$0xff] }
 0x55c   : > { %v2255_v31 = vmul.f32 0.5, %v2147_v59  ;;  %v2657_v60 = vld [vmem:[#allocation12 + $0xf8] sm:$0xff]  ;;  %v2656_v61 = vld [vmem:[#allocation12 + $0xf0] sm:$0xff]  ;;  %v2655_v62 = vld [vmem:[#allocation12 + $0xe8] sm:$0xff] }
 0x55d   : > { %v2259_v1 = vmul.f32 %v2257_v63, %v2147_v59  ;;  %v2144_v3 = vadd.f32 %v3100_v47, %v2133_v40  ;;  %3984 = vmatprep.mubr.f32.mxu1 %v2146_v0  ;;  %v2149_v8 = vadd.f32 %v2145_v2, %v1451_v5  ;;  %v2495_v47 = vld [vmem:[#allocation11 + $0x140] sm:$0xff]  ;;  %v2636_v40 = vld [vmem:[#allocation12 + $0x78] sm:$0xff]  ;;  %v2652_v2 = vld [vmem:[#allocation12 + $0xd0] sm:$0xff] }
 0x55e   : > { %3985 = vmatmul.mubr.f32.vlgmr.msra.gmra.mxu1 %v2147_v59  ;;  %v2654_v63 = vld [vmem:[#allocation12 + $0xe0] sm:$0xff]  ;;  %v2653_v0 = vld [vmem:[#allocation12 + $0xd8] sm:$0xff] }
 0x55f   : > { %v2261_v26 = vmul.f32 %v2259_v1, %v2147_v59  ;;  %v5004_v44 = vadd.f32 %v2144_v3, %v4966_v55  ;;  %4029 = vmatpush3.msra.mxu1 %v4989_v20  ;;  %v2290_v55 = vld [vmem:[#allocation11 + $0x58] sm:$0xff]  ;;  %v2285_v20 = vld [vmem:[#allocation11 + $0x30] sm:$0xff]  ;;  %v2634_v3 = vld [vmem:[#allocation12 + $0x68] sm:$0xff] }
 0x560   : > { %4030 = vmatprep.subr.mxu1 %v2293_v4  ;;  %v2635_v1 = vld [vmem:[#allocation12 + $0x70] sm:$0xff]  ;;  %v2633_v5 = vld [vmem:[#allocation12 + $0x60] sm:$0xff] }
 0x561   : > { %v2263_v6 = vadd.f32 %v2261_v26, %v2147_v59  ;;  %v2258_v7 = vmul.f32 0.044715, %v5004_v44  ;;  %3987 = vmatprep.mubr.f32.mxu1 %v5004_v44  ;;  %4031 = vmatpush3.msra.mxu1 %v2293_v4  ;;  %v2256_v35 = vmul.f32 0.5, %v5004_v44  ;;  %v2487_v59 = vld [vmem:[#allocation11 + $0x100] sm:$0xff]  ;;  %v2651_v4 = vld [vmem:[#allocation12 + $0xc8] sm:$0xff] }
 0x562   : > { %3988 = vmatmul.mubr.f32.gmra.mxu1 %v2149_v8  ;;  %4032 = vmatprep.subr.mxu1 %v2292_v45  ;;  %v2650_v26 = vld [vmem:[#allocation12 + $0xc0] sm:$0xff]  ;;  %v2630_v8 = vld [vmem:[#allocation12 + $0x48] sm:$0xff] }
 0x563   : > { %v2265_v50 = vmul.f32 0.7978846, %v2263_v6  ;;  %v2260_v11 = vmul.f32 %v2258_v7, %v5004_v44  ;;  %4033 = vmatpush3.msra.mxu1 %v2292_v45  ;;  %4060 = vmatprep.mubr.f32.mxu1 %v5009_v9  ;;  %v2649_v45 = vld [vmem:[#allocation12 + $0xb8] sm:$0xff]  ;;  %v2631_v6 = vld [vmem:[#allocation12 + $0x50] sm:$0xff] }
 0x564   : > { %4034 = vmatprep.subr.mxu1 %v2291_v10  ;;  %v2648_v7 = vld [vmem:[#allocation12 + $0xb0] sm:$0xff] }
 0x565   : > { %4379 = vtanh.f32 %v2265_v50  ;;  %v2262_v12 = vmul.f32 %v2260_v11, %v5004_v44  ;;  %4035 = vmatpush3.msra.mxu1 %v2291_v10  ;;  %v2629_v10 = vld [vmem:[#allocation12 + $0x40] sm:$0xff]  ;;  %v2628_v11 = vld [vmem:[#allocation12 + $0x38] sm:$0xff] }
 0x566   : > { %4036 = vmatprep.subr.mxu1 %v2290_v55  ;;  %v2646_v50 = vld [vmem:[#allocation12 + $0xa0] sm:$0xff] }
 0x567   : > { %v2264_v14 = vadd.f32 %v2262_v12, %v5004_v44  ;;  %4037 = vmatpush3.msra.mxu1 %v2290_v55  ;;  %v2632_v44 = vld [vmem:[#allocation12 + $0x58] sm:$0xff]  ;;  %v2627_v12 = vld [vmem:[#allocation12 + $0x30] sm:$0xff] }
 0x568   : > { %4038 = vmatprep.subr.mxu1 %v2289_v13  ;;  %v2645_v55 = vld [vmem:[#allocation12 + $0x98] sm:$0xff] }
 0x569   : > { %v2266_v16 = vmul.f32 0.7978846, %v2264_v14  ;;  %4039 = vmatpush3.msra.mxu1 %v2289_v13  ;;  %v2644_v13 = vld [vmem:[#allocation12 + $0x90] sm:$0xff]  ;;  %v2626_v14 = vld [vmem:[#allocation12 + $0x28] sm:$0xff] }
 0x56a   : > { %4040 = vmatprep.subr.mxu1 %v2288_v15 }
 0x56b   : > { %4381 = vtanh.f32 %v2266_v16  ;;  %4041 = vmatpush3.msra.mxu1 %v2288_v15  ;;  %v2643_v15 = vld [vmem:[#allocation12 + $0x88] sm:$0xff]  ;;  %v2625_v16 = vld [vmem:[#allocation12 + $0x20] sm:$0xff] }
 0x56c   : > { %4042 = vmatprep.subr.mxu1 %v2287_v17 }
 0x56d   : > { %4043 = vmatpush3.msra.mxu1 %v2287_v17  ;;  %v2642_v17 = vld [vmem:[#allocation12 + $0x80] sm:$0xff] }
 0x56e   : > { %4044 = vmatprep.subr.mxu1 %v2286_v19 }
 0x56f   : > { %4045 = vmatpush3.msra.mxu1 %v2286_v19  ;;  %v2624_v19 = vld [vmem:[#allocation12 + $0x18] sm:$0xff] }
 0x570   : > { %4046 = vmatprep.subr.mxu1 %v2285_v20 }
 0x571   : > { %4047 = vmatpush3.msra.mxu1 %v2285_v20  ;;  %v5023_v20 = vld [vmem:[#allocation12 + $0x178] sm:$0xff] }
 0x572   : > { %v4380_v23 = vpop.eup %4379  ;;  %4048 = vmatprep.subr.mxu1 %v2284_v21 }
 0x573   : > { %v2269_v25 = vadd.f32 1.0, %v4380_v23  ;;  %4049 = vmatpush3.msra.mxu1 %v2284_v21  ;;  %v2623_v21 = vld [vmem:[#allocation12 + $0x10] sm:$0xff]  ;;  %v2622_v23 = vld [vmem:[#allocation12 + $0x8] sm:$0xff] }
 0x574   : > { %4050 = vmatprep.subr.mxu1 %v2283_v24 }
 0x575   : > { %v2271_v28 = vmul.f32 %v2269_v25, %v2255_v31  ;;  %4051 = vmatpush3.msra.mxu1 %v2283_v24  ;;  %v2621_v24 = vld [vmem:[#allocation12] sm:$0xff] }
 0x576   : > { %4052 = vmatprep.subr.mxu1 %v2282_v27 }
 0x577   : > { %2273 = vst [vmem:[#allocation2 + $0x10] sm:$0xff] %v2271_v28  ;;  %4023 = vmatmul.mubr.f32.vlgmr.msra.gmra.mxu0 %v2271_v28  ;;  %4053 = vmatpush3.msra.mxu1 %v2282_v27 }
 0x578   : > { %v4382_v32 = vpop.eup %4381  ;;  %4067 = vmatpush3.msra.mxu0 %v4992_v34  ;;  %4054 = vmatprep.subr.mxu1 %v2281_v29 }
 0x579   : > { %v2270_v36 = vadd.f32 1.0, %v4382_v32  ;;  %4068 = vmatprep.subr.mxu0 %v2501_v30  ;;  %4055 = vmatpush3.msra.mxu1 %v2281_v29 }
 0x57a   : > { %4069 = vmatpush3.msra.mxu0 %v2501_v30  ;;  %4056 = vmatprep.subr.mxu1 %v2280_v33 }
 0x57b   : > { %v2272_v39 = vmul.f32 %v2270_v36, %v2256_v35  ;;  %4070 = vmatprep.subr.mxu0 %v2500_v22  ;;  %4057 = vmatpush3.msra.mxu1 %v2280_v33 }
 0x57c   : > { %4071 = vmatpush3.msra.mxu0 %v2500_v22  ;;  %4058 = vmatprep.subr.mxu1 %v2279_v37 }
 0x57d   : > { %2274 = vst [vmem:[#allocation2 + $0x18] sm:$0xff] %v2272_v39  ;;  %4072 = vmatprep.subr.mxu0 %v2499_v38  ;;  %4059 = vmatpush3.msra.mxu1 %v2279_v37 }
 0x57e   : > { %v2276_v34 = vld [vmem:[#allocation2 + $0xc] sm:$0xff]  ;;  %4025 = vmatprep.mubr.f32.mxu0 %v2272_v39  ;;  %4073 = vmatpush3.msra.mxu0 %v2499_v38  ;;  %v3102_v39 = vld [vmem:[%s5089_s12] ss:$0 sm:$0xff] }
 0x57f   : > { %4061 = vmatmul.mubr.f32.vlgmr.msra.gmra.mxu1 %v2276_v34  ;;  %4026 = vmatmul.mubr.f32.gmra.mxu0 %v4984_v48 }
 0x580   : > { %4074 = vmatprep.subr.mxu0 %v2498_v41  ;;  %4098 = vmatprep.mubr.f32.mxu0 %v2276_v34 }
 0x581   : > { %4075 = vmatpush3.msra.mxu0 %v2498_v41  ;;  %4104 = vmatprep.subr.mxu1 %v2657_v60 }
 0x582   : > { %4076 = vmatprep.subr.mxu0 %v2497_v42  ;;  %4105 = vmatpush3.msra.mxu1 %v2657_v60 }
 0x583   : > { %4077 = vmatpush3.msra.mxu0 %v2497_v42  ;;  %4106 = vmatprep.subr.mxu1 %v2656_v61 }
 0x584   : > { %v2277_v49 = vld [vmem:[#allocation2 + $0x14] sm:$0xff]  ;;  %v2278_v51 = vld [vmem:[#allocation2 + $0x1c] sm:$0xff]  ;;  %4078 = vmatprep.subr.mxu0 %v2496_v46  ;;  %4107 = vmatpush3.msra.mxu1 %v2656_v61 }
 0x585   : > { %4063 = vmatprep.mubr.f32.mxu1 %v2277_v49  ;;  %4079 = vmatpush3.msra.mxu0 %v2496_v46 }
 0x586   : > { %4064 = vmatmul.mubr.f32.gmra.mxu1 %v2278_v51  ;;  %4080 = vmatprep.subr.mxu0 %v2495_v47 }
 0x587   : > { %4081 = vmatpush3.msra.mxu0 %v2495_v47  ;;  %4136 = vmatprep.mubr.f32.mxu1 %v4984_v48 }
 0x588   : > { %4082 = vmatprep.subr.mxu0 %v2494_v52  ;;  %4108 = vmatprep.subr.mxu1 %v2655_v62 }
 0x589   : > { %4083 = vmatpush3.msra.mxu0 %v2494_v52  ;;  %4109 = vmatpush3.msra.mxu1 %v2655_v62 }
 0x58a   : > { %4084 = vmatprep.subr.mxu0 %v2493_v53  ;;  %4110 = vmatprep.subr.mxu1 %v2654_v63 }
 0x58b   : > { %4085 = vmatpush3.msra.mxu0 %v2493_v53  ;;  %4111 = vmatpush3.msra.mxu1 %v2654_v63 }
 0x58c   : > { %4086 = vmatprep.subr.mxu0 %v2492_v54  ;;  %4112 = vmatprep.subr.mxu1 %v2653_v0 }
 0x58d   : > { %4087 = vmatpush3.msra.mxu0 %v2492_v54  ;;  %4113 = vmatpush3.msra.mxu1 %v2653_v0 }
 0x58e   : > { %4088 = vmatprep.subr.mxu0 %v2491_v43  ;;  %4114 = vmatprep.subr.mxu1 %v2652_v2 }
 0x58f   : > { %4089 = vmatpush3.msra.mxu0 %v2491_v43  ;;  %4115 = vmatpush3.msra.mxu1 %v2652_v2 }
 0x590   : > { %4090 = vmatprep.subr.mxu0 %v2490_v56  ;;  %4116 = vmatprep.subr.mxu1 %v2651_v4 }
 0x591   : > { %4091 = vmatpush3.msra.mxu0 %v2490_v56  ;;  %4117 = vmatpush3.msra.mxu1 %v2651_v4 }
 0x592   : > { %4092 = vmatprep.subr.mxu0 %v2489_v57  ;;  %4118 = vmatprep.subr.mxu1 %v2650_v26 }
 0x593   : > { %4093 = vmatpush3.msra.mxu0 %v2489_v57  ;;  %4119 = vmatpush3.msra.mxu1 %v2650_v26 }
 0x594   : > { %4094 = vmatprep.subr.mxu0 %v2488_v58  ;;  %4120 = vmatprep.subr.mxu1 %v2649_v45 }
 0x595   : > { %4095 = vmatpush3.msra.mxu0 %v2488_v58  ;;  %4121 = vmatpush3.msra.mxu1 %v2649_v45  ;;  %v2839_v45 = vld [vmem:[#allocation12 + $0x160] sm:$0xff] }
 0x596   : > { %4096 = vmatprep.subr.mxu0 %v2487_v59  ;;  %4122 = vmatprep.subr.mxu1 %v2648_v7 }
 0x597   : > { %4097 = vmatpush3.msra.mxu0 %v2487_v59  ;;  %4123 = vmatpush3.msra.mxu1 %v2648_v7  ;;  %v2838_v7 = vld [vmem:[#allocation12 + $0x158] sm:$0xff] }
 0x598   : > { %4099 = vmatmul.mubr.f32.vlgmr.msra.gmra.mxu0 %v2277_v49  ;;  %4142 = vmatprep.subr.mxu0 %v2636_v40 }
 0x599   : > { %4101 = vmatprep.mubr.f32.mxu0 %v2278_v51  ;;  %4143 = vmatpush3.msra.mxu0 %v2636_v40 }
 0x59a   : > { %4144 = vmatprep.subr.mxu0 %v2635_v1 }
 0x59b   : > { %4145 = vmatpush3.msra.mxu0 %v2635_v1 }
 0x59c   : > { %4102 = vmatmul.mubr.f32.gmra.mxu0 %v5019_v18  ;;  %4146 = vmatprep.subr.mxu0 %v2634_v3 }
 0x59d   : > { %4174 = vmatprep.mubr.f32.mxu0 %v5009_v9  ;;  %4147 = vmatpush3.msra.mxu0 %v2634_v3  ;;  %v2647_v9 = vld [vmem:[#allocation12 + $0xa8] sm:$0xff]  ;;  %v2841_v3 = vld [vmem:[#allocation12 + $0x170] sm:$0xff] }
 0x59e   : > { %4148 = vmatprep.subr.mxu0 %v2633_v5  ;;  %4124 = vmatprep.subr.mxu1 %v2647_v9 }
 0x59f   : > { %4149 = vmatpush3.msra.mxu0 %v2633_v5  ;;  %4125 = vmatpush3.msra.mxu1 %v2647_v9  ;;  %v2840_v5 = vld [vmem:[#allocation12 + $0x168] sm:$0xff]  ;;  %v2837_v9 = vld [vmem:[#allocation12 + $0x150] sm:$0xff] }
 0x5a0   : > { %4150 = vmatprep.subr.mxu0 %v2632_v44  ;;  %4126 = vmatprep.subr.mxu1 %v2646_v50 }
 0x5a1   : > { %4151 = vmatpush3.msra.mxu0 %v2632_v44  ;;  %4127 = vmatpush3.msra.mxu1 %v2646_v50 }
 0x5a2   : > { %4152 = vmatprep.subr.mxu0 %v2631_v6  ;;  %4128 = vmatprep.subr.mxu1 %v2645_v55 }
 0x5a3   : > { %4153 = vmatpush3.msra.mxu0 %v2631_v6  ;;  %4129 = vmatpush3.msra.mxu1 %v2645_v55  ;;  %v2834_v55 = vld [vmem:[#allocation12 + $0x138] sm:$0xff] }
 0x5a4   : > { %4154 = vmatprep.subr.mxu0 %v2630_v8  ;;  %4130 = vmatprep.subr.mxu1 %v2644_v13 }
 0x5a5   : > { %4155 = vmatpush3.msra.mxu0 %v2630_v8  ;;  %4131 = vmatpush3.msra.mxu1 %v2644_v13  ;;  %v2832_v13 = vld [vmem:[#allocation12 + $0x128] sm:$0xff] }
 0x5a6   : > { %4156 = vmatprep.subr.mxu0 %v2629_v10  ;;  %4132 = vmatprep.subr.mxu1 %v2643_v15 }
 0x5a7   : > { %4157 = vmatpush3.msra.mxu0 %v2629_v10  ;;  %4133 = vmatpush3.msra.mxu1 %v2643_v15  ;;  %v2836_v10 = vld [vmem:[#allocation12 + $0x148] sm:$0xff]  ;;  %v2830_v15 = vld [vmem:[#allocation12 + $0x118] sm:$0xff] }
 0x5a8   : > { %4158 = vmatprep.subr.mxu0 %v2628_v11  ;;  %4134 = vmatprep.subr.mxu1 %v2642_v17 }
 0x5a9   : > { %4159 = vmatpush3.msra.mxu0 %v2628_v11  ;;  %4135 = vmatpush3.msra.mxu1 %v2642_v17  ;;  %v2828_v17 = vld [vmem:[#allocation12 + $0x108] sm:$0xff] }
 0x5aa   : > { %4160 = vmatprep.subr.mxu0 %v2627_v12  ;;  %4218 = vmatprep.subr.mxu1 %v5023_v20 }
 0x5ab   : > { %4161 = vmatpush3.msra.mxu0 %v2627_v12  ;;  %v2833_v12 = vld [vmem:[#allocation12 + $0x130] sm:$0xff] }
 0x5ac   : > { %4162 = vmatprep.subr.mxu0 %v2626_v14 }
 0x5ad   : > { %4163 = vmatpush3.msra.mxu0 %v2626_v14  ;;  %v2831_v14 = vld [vmem:[#allocation12 + $0x120] sm:$0xff] }
 0x5ae   : > { %4164 = vmatprep.subr.mxu0 %v2625_v16 }
 0x5af   : > { %4165 = vmatpush3.msra.mxu0 %v2625_v16  ;;  %v2829_v16 = vld [vmem:[#allocation12 + $0x110] sm:$0xff] }
 0x5b0   : > { %4166 = vmatprep.subr.mxu0 %v2624_v19 }
 0x5b1   : > { %4167 = vmatpush3.msra.mxu0 %v2624_v19  ;;  %v2827_v19 = vld [vmem:[#allocation12 + $0x100] sm:$0xff] }
 0x5b2   : > { %4168 = vmatprep.subr.mxu0 %v2623_v21 }
 0x5b3   : > { %4169 = vmatpush3.msra.mxu0 %v2623_v21 }
 0x5b4   : > { %4170 = vmatprep.subr.mxu0 %v2622_v23 }
 0x5b5   : > { %4171 = vmatpush3.msra.mxu0 %v2622_v23 }
 0x5b6   : > { %4172 = vmatprep.subr.mxu0 %v2621_v24 }
 0x5b7   : > { %4173 = vmatpush3.msra.mxu0 %v2621_v24 }
 0x5b8   : > { %4180 = vmatprep.subr.mxu0 %v5023_v20 }
 0x61e   : > { %v3986_v31 = vpop.f32.mrf.mxu1 }
 0x620   : > { %v2239_v25 = vpop.f32.mrf.mxu1 }
 0x622   : > { %v3989_v27 = vpop.f32.mrf.mxu1 }
 0x624   : > { %v5027_v30 = vpop.f32.mrf.mxu1 }
 0x637   : > { %v4024_v28 = vpop.f32.mrf.mxu0 }
 0x639   : > { %v2382_v29 = vpop.f32.mrf.mxu0 }
 0x63f   : > { %v4062_v32 = vpop.f32.mrf.mxu1  ;;  %v4027_v33 = vpop.f32.mrf.mxu0 }
 0x640   : > { %v2470_v37 = vadd.f32 %v4062_v32, %v4024_v28  ;;  %v3101_v33 = vld [vmem:[%s5093_s16] ss:$0 sm:$0xff] }
 0x641   : > { %v2465_v22 = vpop.f32.mrf.mxu1  ;;  %v2391_v36 = vpop.f32.mrf.mxu0 }
 0x642   : > { %v3103_v22 = vld [vmem:[%s5091_s14] ss:$0 sm:$0xff] }
 0x646   : > { %v4065_v35 = vpop.f32.mrf.mxu1 }
 0x648   : > { %v2474_v34 = vpop.f32.mrf.mxu1 }
 0x649   : > { %v2475_v49 = vadd.f32 %v2474_v34, %v2391_v36 }
 0x658   : > { %v4100_v38 = vpop.f32.mrf.mxu0 }
 0x659   : > { %v2586_v41 = vadd.f32 %v4100_v38, %v2470_v37  ;;  %v2248_v37 = vadd.f32 %v3101_v33, %v5027_v30 }
 0x65a   : > { %v2569_v42 = vpop.f32.mrf.mxu0 }
 0x65b   : > { %v2595_v46 = vadd.f32 %v3102_v39, %v2586_v41 }
 0x65c   : > { %v4103_v47 = vpop.f32.mrf.mxu0 }
 0x65d   : > { %v2599_v51 = vmul.f32 0.044715, %v2595_v46  ;;  %v2597_v0 = vmul.f32 0.5, %v2595_v46 }
 0x65e   : > { %v2578_v52 = vpop.f32.mrf.mxu0 }
 0x65f   : > { %v2601_v53 = vmul.f32 %v2599_v51, %v2595_v46  ;;  %v2587_v54 = vadd.f32 %v2578_v52, %v2475_v49 }
 0x661   : > { %v2603_v43 = vmul.f32 %v2601_v53, %v2595_v46  ;;  %v2596_v56 = vadd.f32 %v3102_v39, %v2587_v54 }
 0x663   : > { %v2605_v57 = vadd.f32 %v2603_v43, %v2595_v46  ;;  %v2600_v58 = vmul.f32 0.044715, %v2596_v56  ;;  %v2598_v26 = vmul.f32 0.5, %v2596_v56 }
 0x665   : > { %v2607_v59 = vmul.f32 0.7978846, %v2605_v57  ;;  %v2602_v60 = vmul.f32 %v2600_v58, %v2596_v56 }
 0x667   : > { %4383 = vtanh.f32 %v2607_v59  ;;  %v2604_v61 = vmul.f32 %v2602_v60, %v2596_v56 }
 0x669   : > { %v2606_v62 = vadd.f32 %v2604_v61, %v2596_v56 }
 0x66b   : > { %v2608_v63 = vmul.f32 0.7978846, %v2606_v62 }
 0x66d   : > { %4385 = vtanh.f32 %v2608_v63 }
 0x674   : > { %v4384_v40 = vpop.eup %4383 }
 0x675   : > { %v2611_v1 = vadd.f32 1.0, %v4384_v40 }
 0x677   : > { %v2613_v2 = vmul.f32 %v2611_v1, %v2597_v0 }
 0x679   : > { %2615 = vst [vmem:[#allocation2 + $0x10] sm:$0xff] %v2613_v2  ;;  %4137 = vmatmul.mubr.f32.vlgmr.msra.gmra.mxu1 %v2613_v2 }
 0x67a   : > { %v4386_v4 = vpop.eup %4385  ;;  %4234 = vmatpush3.msra.mxu1 %v5023_v20 }
 0x67b   : > { %v2612_v44 = vadd.f32 1.0, %v4386_v4  ;;  %4219 = vmatprep.subr.mxu1 %v2841_v3 }
 0x67c   : > { %4235 = vmatpush3.msra.mxu1 %v2841_v3 }
 0x67d   : > { %v2614_v6 = vmul.f32 %v2612_v44, %v2598_v26  ;;  %4220 = vmatprep.subr.mxu1 %v2840_v5 }
 0x67e   : > { %4236 = vmatpush3.msra.mxu1 %v2840_v5 }
 0x67f   : > { %2616 = vst [vmem:[#allocation2 + $0x18] sm:$0xff] %v2614_v6  ;;  %4221 = vmatprep.subr.mxu1 %v2839_v45  ;;  %4139 = vmatprep.mubr.f32.mxu1 %v2614_v6 }
 0x680   : > { %v2618_v8 = vld [vmem:[#allocation2 + $0xc] sm:$0xff]  ;;  %4237 = vmatpush3.msra.mxu1 %v2839_v45 }
 0x681   : > { %4175 = vmatmul.mubr.f32.vlgmr.msra.gmra.mxu0 %v2618_v8  ;;  %4140 = vmatmul.mubr.f32.gmra.mxu1 %v4984_v48  ;;  %v2835_v48 = vld [vmem:[#allocation12 + $0x140] sm:$0xff] }
 0x682   : > { %4181 = vmatpush3.msra.mxu0 %v5023_v20  ;;  %4222 = vmatprep.subr.mxu1 %v2838_v7 }
 0x683   : > { %4182 = vmatprep.subr.mxu0 %v2841_v3  ;;  %4238 = vmatpush3.msra.mxu1 %v2838_v7 }
 0x684   : > { %4183 = vmatpush3.msra.mxu0 %v2841_v3  ;;  %4223 = vmatprep.subr.mxu1 %v2837_v9 }
 0x685   : > { %4184 = vmatprep.subr.mxu0 %v2840_v5  ;;  %4239 = vmatpush3.msra.mxu1 %v2837_v9 }
 0x686   : > { %4185 = vmatpush3.msra.mxu0 %v2840_v5  ;;  %v2619_v50 = vld [vmem:[#allocation2 + $0x14] sm:$0xff]  ;;  %v2620_v11 = vld [vmem:[#allocation2 + $0x1c] sm:$0xff]  ;;  %4224 = vmatprep.subr.mxu1 %v2836_v10 }
 0x687   : > { %4186 = vmatprep.subr.mxu0 %v2839_v45  ;;  %4177 = vmatprep.mubr.f32.mxu0 %v2619_v50 }
 0x688   : > { %4187 = vmatpush3.msra.mxu0 %v2839_v45  ;;  %4215 = vmatprep.mubr.f32.mxu1 %v2620_v11 }
 0x689   : > { %4178 = vmatmul.mubr.f32.gmra.mxu0 %v2620_v11  ;;  %4188 = vmatprep.subr.mxu0 %v2838_v7 }
 0x68a   : > { %4189 = vmatpush3.msra.mxu0 %v2838_v7  ;;  %4212 = vmatprep.mubr.f32.mxu0 %v2618_v8 }
 0x68b   : > { %4190 = vmatprep.subr.mxu0 %v2837_v9  ;;  %4240 = vmatpush3.msra.mxu1 %v2836_v10 }
 0x68c   : > { %4191 = vmatpush3.msra.mxu0 %v2837_v9  ;;  %4225 = vmatprep.subr.mxu1 %v2835_v48 }
 0x68d   : > { %4192 = vmatprep.subr.mxu0 %v2836_v10  ;;  %4241 = vmatpush3.msra.mxu1 %v2835_v48 }
 0x68e   : > { %4193 = vmatpush3.msra.mxu0 %v2836_v10  ;;  %4226 = vmatprep.subr.mxu1 %v2834_v55 }
 0x68f   : > { %4194 = vmatprep.subr.mxu0 %v2835_v48  ;;  %4242 = vmatpush3.msra.mxu1 %v2834_v55 }
 0x690   : > { %4195 = vmatpush3.msra.mxu0 %v2835_v48  ;;  %4227 = vmatprep.subr.mxu1 %v2833_v12 }
 0x691   : > { %4196 = vmatprep.subr.mxu0 %v2834_v55  ;;  %4243 = vmatpush3.msra.mxu1 %v2833_v12 }
 0x692   : > { %4197 = vmatpush3.msra.mxu0 %v2834_v55  ;;  %4228 = vmatprep.subr.mxu1 %v2832_v13 }
 0x693   : > { %4198 = vmatprep.subr.mxu0 %v2833_v12  ;;  %4244 = vmatpush3.msra.mxu1 %v2832_v13 }
 0x694   : > { %4199 = vmatpush3.msra.mxu0 %v2833_v12  ;;  %4229 = vmatprep.subr.mxu1 %v2831_v14 }
 0x695   : > { %4200 = vmatprep.subr.mxu0 %v2832_v13  ;;  %4245 = vmatpush3.msra.mxu1 %v2831_v14 }
 0x696   : > { %4201 = vmatpush3.msra.mxu0 %v2832_v13  ;;  %4230 = vmatprep.subr.mxu1 %v2830_v15 }
 0x697   : > { %4202 = vmatprep.subr.mxu0 %v2831_v14  ;;  %4246 = vmatpush3.msra.mxu1 %v2830_v15 }
 0x698   : > { %4203 = vmatpush3.msra.mxu0 %v2831_v14  ;;  %4231 = vmatprep.subr.mxu1 %v2829_v16 }
 0x699   : > { %4204 = vmatprep.subr.mxu0 %v2830_v15  ;;  %4247 = vmatpush3.msra.mxu1 %v2829_v16 }
 0x69a   : > { %4205 = vmatpush3.msra.mxu0 %v2830_v15  ;;  %4232 = vmatprep.subr.mxu1 %v2828_v17 }
 0x69b   : > { %4206 = vmatprep.subr.mxu0 %v2829_v16  ;;  %4248 = vmatpush3.msra.mxu1 %v2828_v17 }
 0x69c   : > { %4207 = vmatpush3.msra.mxu0 %v2829_v16  ;;  %4233 = vmatprep.subr.mxu1 %v2827_v19 }
 0x69d   : > { %4208 = vmatprep.subr.mxu0 %v2828_v17  ;;  %4249 = vmatpush3.msra.mxu1 %v2827_v19 }
 0x69e   : > { %4209 = vmatpush3.msra.mxu0 %v2828_v17  ;;  %4216 = vmatmul.mubr.f32.vlgmr.msra.gmra.mxu1 %v5019_v18 }
 0x69f   : > { %4210 = vmatprep.subr.mxu0 %v2827_v19 }
 0x6a0   : > { %4211 = vmatpush3.msra.mxu0 %v2827_v19 }
 0x6a1   : > { %4213 = vmatmul.mubr.f32.vlgmr.msra.gmra.mxu0 %v2619_v50 }
 0x739   : > { %v4138_v20 = vpop.f32.mrf.mxu1 }
 0x73b   : > { %v2724_v21 = vpop.f32.mrf.mxu1 }
 0x741   : > { %v4176_v23 = vpop.f32.mrf.mxu0  ;;  %v4141_v24 = vpop.f32.mrf.mxu1 }
 0x743   : > { %v2806_v31 = vpop.f32.mrf.mxu0  ;;  %v2732_v27 = vpop.f32.mrf.mxu1 }
 0x749   : > { %v4179_v25 = vpop.f32.mrf.mxu0 }
 0x74b   : > { %v2814_v28 = vpop.f32.mrf.mxu0 }
 0x74c   : > { %v2815_v32 = vadd.f32 %v2814_v28, %v2732_v27 }
 0x75e   : > { %v4217_v29 = vpop.f32.mrf.mxu1 }
 0x760   : > { %v2917_v18 = vpop.f32.mrf.mxu1 }
 0x761   : > { %v4214_v35 = vpop.f32.mrf.mxu0  ;;  %v2925_v36 = vadd.f32 %v2917_v18, %v2815_v32 }
 0x763   : > { %v2909_v38 = vpop.f32.mrf.mxu0  ;;  %v2933_v39 = vadd.f32 %v3103_v22, %v2925_v36 }
 0x765   : > { %v2934_v41 = vadd.f32 %v2933_v39, %v2248_v37 }
 0x767   : > { %2935 = vst [vmem:[%s642_s23 - $0x7] sm:$0x80] %v2934_v41 }
 0x768   : > { %4583 = shalt.err (!%p4580_p7)
}
 0x769   : > { %s4584_s27 = scalar_lea.hbm %s2947_s19, 16  ;;  %s4588_s17 = scalar_lea.hbm %s5129_s22, 32 }
 0x76a   : > { %p4585_p11 = scmp.ne.s32.totalorder %s2947_s19, %s4584_s27  ;;  %p4589_p0 = scmp.lt.s32.totalorder %s2947_s19, %s5129_s22 }
 0x76b   : > { %p4590_p3 = scmp.lt.s32.totalorder %s4588_s17, %s4584_s27 }
 0x76c   : > { %p4586_p12 = pnand %p4585_p11, %p4787_p5 }
 0x76d   : > { %p4591_p2 = por %p4590_p3, %p4589_p0 }
 0x76e   : > { %p4587_p10 = pneg %p4586_p12 }
 0x770   : > { %p4592_p1 = pnand %p4591_p2, %p4587_p10 }
 0x772   : > { %4595 = shalt.err (!%p4592_p1)
}
 0x773   : > { %4278 = dma.vmem_to_hbm [thread:$0]  (%p4787_p5), %s2950_s0, 16, %s2947_s19, %s2937_s18  }
 0x774 PF: > { %s5130_s29 = sld [smem:[#allocation23_spill]] }
 0x775   : > { %s5131_s30 = sld [smem:[#allocation21_spill]] }
 0x77a   : > { %p4320_p4 = scmp.ge.s32.totalorder %s5130_s29, 2 }
 0x77b   : > { %s2961_s24 = sand.u32 1, %s5131_s30  }
 0x77c   : > { %p4303_p13 = pnand %p4320_p4, %p4791_p6  ;;  %s2962_s20 = scalar_lea.sflag [#allocation5], %s2961_s24 }
 0x77e   : > { %p4304_p9 = pneg %p4303_p13 }
 0x780   : > { %4629 = dma.done.wait (%p4304_p9), %s2962_s20, 16  }
 0x781   : > { %4631 = vsyncadd (%p4304_p9), %s2962_s20, 4294967280  ;;  %s5133_s27 = sld [smem:[#allocation24_spill]]  ;;  %s5136_s24 = smov %s4638_s25 }
 0x782   : > { %s5134_s26 = sld [smem:[#allocation22_spill]] }
 0x783   : > { %s5135_s5 = sld [smem:[#allocation25_spill]] }
 0x787   : > { %p31_p8 = scmp.ge.s32.totalorder %s5133_s27, 4  }
 0x788   : > { %s5137_s25 = smov %s5134_s26 }
 0x789   : > { %s5138_s26 = smov %s5135_s5  ;;  %33 = sbr.rel (!%p31_p8) target bundleno = 12 (0xc), region = 164 }
 0x78e   :  { %2966 = vsyncpa [#allocation4], 1 }
 0x78f   :  { %2968 = vsyncpa [#allocation4 + $0x1], 1 }
 0x790   :  { %2969 = vsyncpa [#allocation7], 1 }
 0x791   :  { %2970 = vsyncpa [#allocation10], 1 }
 0x792   :  { %2971 = vsyncpa [#allocation13], 1 }
 0x793   :  { %2972 = vsyncpa [#allocation5], 1 }
 0x794   :  { %2974 = vsyncpa [#allocation5 + $0x1], 1 }

</bundles_post_ra>
